<compile_context>
chip_gen: v7x
topology: tpu7x:2x2x1
jax: 0.10.0
libtpu: 0.0.40
codegen_flags: <defaults>
</compile_context>

<pallas_src>
import functools

import jax
import jax.numpy as jnp
from jax.experimental import pallas as pl
from jax.experimental.pallas import tpu as pltpu


# ------------------------------- kernel ------------------------------------ #

def _fire_kernel(x_ref, wsq_ref, wexp_ref, bexp_ref, o_ref, *, wp):
    """Fused Fire forward for a block of whole (spatially zero-padded) images.

    x_ref:    (R, Cin+1)    compute dtype; last channel = validity (1 real / 0 pad)
    wsq_ref:  (Cin+1, S)    compute dtype; last row = squeeze bias
    wexp_ref: (9*S, Epad)   compute dtype; rows [4S:5S, :E1] carry the 1x1 expand
    bexp_ref: (1, Epad)     f32
    o_ref:    (R, Epad)     output dtype (bf16 by default), Epad % 128 == 0
    wp:       padded image width (static) -> row shift of one image row
    """
    # --- squeeze 1x1 conv + bias + ReLU, all on the MXU (f32 accumulate) ---
    # Halo / alignment rows have x == 0 and validity == 0, so y == 0 there,
    # which gives the 3x3 conv its zero padding for free.
    y = jnp.dot(x_ref[...], wsq_ref[...], preferred_element_type=jnp.float32)
    y = jnp.maximum(y, 0.0)                                # (R, S), f32

    # --- build the 9 shifted taps entirely in VMEM via XLU rotates ---------
    # tap (kh, kw) needs y[row + (kh-1)*wp + (kw-1)]; wrap-around rows only
    # land on padding rows whose outputs are discarded by the wrapper.
    r = y.shape[0]
    taps = []
    for kh in range(3):
        for kw in range(3):
            d = (kh - 1) * wp + (kw - 1)
            taps.append(y if d == 0
                        else pltpu.roll(y, shift=(-d) % r, axis=0))
    patches = jnp.concatenate(taps, axis=1).astype(wexp_ref.dtype)  # (R, 9S)

    # --- fused expand 1x1 + 3x3: one lane-dense matmul + bias + ReLU -------
    # (single (R, 9S) matmul kept on purpose: nine K=S matmuls would waste
    #  most of the 256-deep MXU contraction on v6e/v7x.)
    acc = jnp.dot(patches, wexp_ref[...], preferred_element_type=jnp.float32)
    o_ref[...] = jnp.maximum(acc + bexp_ref[...], 0.0).astype(o_ref.dtype)


# ------------------------------- wrapper ----------------------------------- #

def _sublane_multiple(dtype):
    # rows per native sublane tile: 8 for 4-byte, 16 for 2-byte, 32 for 1-byte
    return max(8, 32 // jnp.dtype(dtype).itemsize)


def _pick_images_per_block(n, rp, max_rows):
    """Largest divisor of n whose block fits the row cap, preferring >= 4
    (else >= 2) grid steps so both v7x TensorCores get work and the pipeline
    always has an i+1 block to prefetch."""
    for min_steps in (min(n, 4), min(n, 2), 1):
        best = 0
        for cand in range(1, n + 1):
            if (n % cand == 0 and cand * rp <= max_rows
                    and n // cand >= min_steps):
                best = cand
        if best:
            return best
    # A single padded image already exceeds the cap.
    # TODO(synk): row-chunk within an image with a +/-(wp+1)-row halo per
    # chunk so large-spatial inputs still respect the VMEM cap on v7x.
    return 1


def fire_forward(x_nchw, params, *, compute_dtype=jnp.bfloat16, out_dtype=None,
                 max_rows_per_block=2048):
    """Fire module forward. x_nchw: (N, Cin, H, W) -> (N, E1+E3, H, W).

    Output dtype defaults to compute_dtype (bf16): the f32 store would be the
    dominant HBM stream; cast in the consumer if f32 is required.
    """
    if out_dtype is None:
        out_dtype = compute_dtype
    wsq, bsq, w1, b1, w3, b3 = params          # w3: (3, 3, S, E3) (HWIO)
    n, cin, h, w = x_nchw.shape
    s = wsq.shape[1]
    e1 = w1.shape[1]
    e3 = w3.shape[-1]
    e = e1 + e3
    e_pad = ((e + 127) // 128) * 128           # lane-dense output slab

    hp, wp = h + 2, w + 2                      # zero-padded spatial extent
    rows_img = hp * wp
    sub = max(_sublane_multiple(compute_dtype), _sublane_multiple(out_dtype))
    rp = -(-rows_img // sub) * sub             # per-image rows, sublane aligned

    ipb = _pick_images_per_block(n, rp, max_rows_per_block)
    rows_blk = ipb * rp
    grid = n // ipb

    # ---- glue: NCHW -> NHWC, zero spatial pad, validity channel, flatten --
    # TODO(synk): keep activations NHWC (+halo) and bf16 across consecutive
    # Fire modules so these transposes/pads are not paid per module.
    x_nhwc = jnp.transpose(x_nchw, (0, 2, 3, 1)).astype(compute_dtype)
    x_pad = jnp.pad(x_nhwc, ((0, 0), (1, 1), (1, 1), (0, 0)))
    hh = jnp.arange(hp)[:, None]
    ww = jnp.arange(wp)[None, :]
    valid = ((hh >= 1) & (hh <= h) & (ww >= 1) & (ww <= w)).astype(compute_dtype)
    valid = jnp.broadcast_to(valid[None, :, :, None], (n, hp, wp, 1))
    x_aug = jnp.concatenate([x_pad, valid], axis=-1)       # (n, hp, wp, cin+1)
    x_rows = x_aug.reshape(n, rows_img, cin + 1)
    x_rows = jnp.pad(x_rows, ((0, 0), (0, rp - rows_img), (0, 0)))
    x2d = x_rows.reshape(n * rp, cin + 1)

    # Squeeze weight with the bias folded in as an extra input row (paired
    # with the validity channel), so bias + zero-masking happen on the MXU.
    wsq_aug = jnp.concatenate(
        [wsq, bsq.reshape(1, s)], axis=0).astype(compute_dtype)  # (cin+1, s)

    # Fold expand-1x1 into the centre tap of a combined (9S, Epad) weight.
    wexp = jnp.zeros((9, s, e_pad), jnp.float32)
    wexp = wexp.at[:, :, e1:e].set(w3.reshape(9, s, e3))
    wexp = wexp.at[4, :, :e1].set(w1)                      # centre tap (1, 1)
    wexp = wexp.reshape(9 * s, e_pad).astype(compute_dtype)
    bexp = jnp.zeros((e_pad,), jnp.float32)
    bexp = bexp.at[:e1].set(b1).at[e1:e].set(b3).reshape(1, e_pad)

    out2d = pl.pallas_call(
        functools.partial(_fire_kernel, wp=wp),
        out_shape=jax.ShapeDtypeStruct((n * rp, e_pad), out_dtype),
        grid=(grid,),
        in_specs=[
            pl.BlockSpec((rows_blk, cin + 1), lambda i: (i, 0)),
            pl.BlockSpec((cin + 1, s), lambda i: (0, 0)),
            pl.BlockSpec((9 * s, e_pad), lambda i: (0, 0)),
            pl.BlockSpec((1, e_pad), lambda i: (0, 0)),
        ],
        out_specs=pl.BlockSpec((rows_blk, e_pad), lambda i: (i, 0)),
        compiler_params=pltpu.CompilerParams(
            dimension_semantics=("parallel",),
            vmem_limit_bytes=32 * 1024 * 1024),
    )(x2d, wsq_aug, wexp, bexp)

    # ---- glue: drop padding rows/halo/lane-pad, NHWC -> NCHW --------------
    out = out2d.reshape(n, rp, e_pad)[:, :rows_img, :e].reshape(n, hp, wp, e)
    out = out[:, 1:h + 1, 1:w + 1, :]
    return jnp.transpose(out, (0, 3, 1, 2))


# ------------------------------ reference ----------------------------------- #

def fire_reference(x_nchw, params):
    wsq, bsq, w1, b1, w3, b3 = params
    dn = ('NHWC', 'HWIO', 'NHWC')
    x = jnp.transpose(x_nchw, (0, 2, 3, 1))
    y = jax.lax.conv_general_dilated(
        x, wsq.reshape(1, 1, *wsq.shape), (1, 1), 'VALID',
        dimension_numbers=dn) + bsq
    y = jnp.maximum(y, 0.0)
    o1 = jax.lax.conv_general_dilated(
        y, w1.reshape(1, 1, *w1.shape), (1, 1), 'VALID',
        dimension_numbers=dn) + b1
    o1 = jnp.maximum(o1, 0.0)
    o3 = jax.lax.conv_general_dilated(
        y, w3, (1, 1), ((1, 1), (1, 1)), dimension_numbers=dn) + b3
    o3 = jnp.maximum(o3, 0.0)
    out = jnp.concatenate([o1, o3], axis=-1)
    return jnp.transpose(out, (0, 3, 1, 2))


# -------------------------------- main --------------------------------------- #

if __name__ == "__main__":
    # Fire(in_channels=4, squeeze_channels=8, e1x1_channels=16, e3x3_channels=16)
    N, CIN, H, W = 2, 4, 16, 16
    S, E1, E3 = 8, 16, 16

    key = jax.random.PRNGKey(0)
    ks = jax.random.split(key, 7)
    params = (
        jax.random.normal(ks[0], (CIN, S), jnp.float32) * 0.1,       # squeeze W
        jax.random.normal(ks[1], (S,), jnp.float32) * 0.1,           # squeeze b
        jax.random.normal(ks[2], (S, E1), jnp.float32) * 0.1,        # expand1x1 W
        jax.random.normal(ks[3], (E1,), jnp.float32) * 0.1,          # expand1x1 b
        jax.random.normal(ks[4], (3, 3, S, E3), jnp.float32) * 0.1,  # expand3x3 W (HWIO)
        jax.random.normal(ks[5], (E3,), jnp.float32) * 0.1,          # expand3x3 b
    )
    x = jax.random.normal(ks[6], (N, CIN, H, W), jnp.float32)

    out = jax.jit(fire_forward)(x, params)
    out = jax.block_until_ready(out)

    ref = fire_reference(x, params)
    assert out.shape == (N, E1 + E3, H, W), out.shape
    out_f32 = out.astype(jnp.float32)
    max_err = float(jnp.max(jnp.abs(out_f32 - ref)))
    # bf16 streaming + bf16 output store with f32 accumulation: < 2e-2.
    assert jnp.allclose(out_f32, ref, atol=2e-2, rtol=2e-2), max_err

    print("KERNEL_OK")
</pallas_src>

<mosaic_0001>
module attributes {stable_mosaic.version = 11 : i64} {
  func.func @_fire_kernel(%arg0: i32, %arg1: memref<336x5xbf16, #tpu.memory_space<vmem>>, %arg2: memref<5x8xbf16, #tpu.memory_space<vmem>>, %arg3: memref<72x128xbf16, #tpu.memory_space<vmem>>, %arg4: memref<1x128xf32, #tpu.memory_space<vmem>>, %arg5: memref<336x128xbf16, #tpu.memory_space<vmem>>) attributes {dimension_semantics = [#tpu.dimension_semantics<parallel>], iteration_bounds = array<i64: 2>, scalar_prefetch = 0 : i64, scratch_operands = 0 : i64, tpu.core_type = #tpu.core_type<tc>, window_params = [{transform_indices = @transform_0, window_bounds = array<i64: 336, 5>}, {pipeline_mode = #tpu.pipeline_mode<synchronous>, transform_indices = @transform_1, window_bounds = array<i64: 5, 8>}, {pipeline_mode = #tpu.pipeline_mode<synchronous>, transform_indices = @transform_2, window_bounds = array<i64: 72, 128>}, {pipeline_mode = #tpu.pipeline_mode<synchronous>, transform_indices = @transform_3, window_bounds = array<i64: 1, 128>}, {transform_indices = @transform_4, window_bounds = array<i64: 336, 128>}]} {
    %c0 = arith.constant 0 : index
    %c0_0 = arith.constant 0 : index
    %0 = vector.load %arg1[%c0, %c0_0] : memref<336x5xbf16, #tpu.memory_space<vmem>>, vector<336x5xbf16>
    %c0_1 = arith.constant 0 : index
    %c0_2 = arith.constant 0 : index
    %1 = vector.load %arg2[%c0_1, %c0_2] : memref<5x8xbf16, #tpu.memory_space<vmem>>, vector<5x8xbf16>
    %cst = arith.constant dense<0.000000e+00> : vector<336x8xf32>
    %2 = tpu.matmul %0, %1, %cst {dimension_numbers = #tpu.dot_dimension_numbers<[1], [0], [0], [1], [0, 0, 1, 1], [], []>} : vector<336x5xbf16>, vector<5x8xbf16>, vector<336x8xf32> -> vector<336x8xf32>
    %cst_3 = arith.constant 0.000000e+00 : f32
    %3 = vector.broadcast %cst_3 : f32 to vector<336x8xf32>
    %4 = arith.maximumf %2, %3 : vector<336x8xf32>
    %c19_i32 = arith.constant 19 : i32
    %5 = tpu.dynamic_rotate %4 by %c19_i32 dim 0 : vector<336x8xf32>, i32 -> vector<336x8xf32>
    %c18_i32 = arith.constant 18 : i32
    %6 = tpu.dynamic_rotate %4 by %c18_i32 dim 0 : vector<336x8xf32>, i32 -> vector<336x8xf32>
    %c17_i32 = arith.constant 17 : i32
    %7 = tpu.dynamic_rotate %4 by %c17_i32 dim 0 : vector<336x8xf32>, i32 -> vector<336x8xf32>
    %c1_i32 = arith.constant 1 : i32
    %8 = tpu.dynamic_rotate %4 by %c1_i32 dim 0 : vector<336x8xf32>, i32 -> vector<336x8xf32>
    %c335_i32 = arith.constant 335 : i32
    %9 = tpu.dynamic_rotate %4 by %c335_i32 dim 0 : vector<336x8xf32>, i32 -> vector<336x8xf32>
    %c319_i32 = arith.constant 319 : i32
    %10 = tpu.dynamic_rotate %4 by %c319_i32 dim 0 : vector<336x8xf32>, i32 -> vector<336x8xf32>
    %c318_i32 = arith.constant 318 : i32
    %11 = tpu.dynamic_rotate %4 by %c318_i32 dim 0 : vector<336x8xf32>, i32 -> vector<336x8xf32>
    %c317_i32 = arith.constant 317 : i32
    %12 = tpu.dynamic_rotate %4 by %c317_i32 dim 0 : vector<336x8xf32>, i32 -> vector<336x8xf32>
    %13 = tpu.concatenate %5, %6, %7, %8, %4, %9, %10, %11, %12 in 1 : vector<336x8xf32>, vector<336x8xf32>, vector<336x8xf32>, vector<336x8xf32>, vector<336x8xf32>, vector<336x8xf32>, vector<336x8xf32>, vector<336x8xf32>, vector<336x8xf32> -> vector<336x72xf32>
    %14 = arith.truncf %13 : vector<336x72xf32> to vector<336x72xbf16>
    %c0_4 = arith.constant 0 : index
    %c0_5 = arith.constant 0 : index
    %15 = vector.load %arg3[%c0_4, %c0_5] : memref<72x128xbf16, #tpu.memory_space<vmem>>, vector<72x128xbf16>
    %cst_6 = arith.constant dense<0.000000e+00> : vector<336x128xf32>
    %16 = tpu.matmul %14, %15, %cst_6 {dimension_numbers = #tpu.dot_dimension_numbers<[1], [0], [0], [1], [0, 0, 1, 1], [], []>} : vector<336x72xbf16>, vector<72x128xbf16>, vector<336x128xf32> -> vector<336x128xf32>
    %c0_7 = arith.constant 0 : index
    %c0_8 = arith.constant 0 : index
    %17 = vector.load %arg4[%c0_7, %c0_8] : memref<1x128xf32, #tpu.memory_space<vmem>>, vector<1x128xf32>
    %18 = vector.broadcast %17 : vector<1x128xf32> to vector<336x128xf32>
    %19 = arith.addf %16, %18 : vector<336x128xf32>
    %cst_9 = arith.constant 0.000000e+00 : f32
    %20 = vector.broadcast %cst_9 : f32 to vector<336x128xf32>
    %21 = arith.maximumf %19, %20 : vector<336x128xf32>
    %22 = arith.truncf %21 : vector<336x128xf32> to vector<336x128xbf16>
    %c0_10 = arith.constant 0 : index
    %c0_11 = arith.constant 0 : index
    %23 = vector.load %arg5[%c0_10, %c0_11] : memref<336x128xbf16, #tpu.memory_space<vmem>>, vector<336x128xbf16>
    tpu.vector_store %arg5[%c0_10, %c0_11], %22 {strides = array<i32>} : memref<336x128xbf16, #tpu.memory_space<vmem>>, vector<336x128xbf16>,
    return
  }
  func.func @transform_0(%arg0: i32) -> (i32, i32) {
    %c0_i32 = arith.constant 0 : i32
    %c0_i32_0 = arith.constant 0 : i32
    return %arg0, %c0_i32 : i32, i32
  }
  func.func @transform_1(%arg0: i32) -> (i32, i32) {
    %c0_i32 = arith.constant 0 : i32
    %c0_i32_0 = arith.constant 0 : i32
    %c0_i32_1 = arith.constant 0 : i32
    return %c0_i32, %c0_i32_0 : i32, i32
  }
  func.func @transform_2(%arg0: i32) -> (i32, i32) {
    %c0_i32 = arith.constant 0 : i32
    %c0_i32_0 = arith.constant 0 : i32
    %c0_i32_1 = arith.constant 0 : i32
    return %c0_i32, %c0_i32_0 : i32, i32
  }
  func.func @transform_3(%arg0: i32) -> (i32, i32) {
    %c0_i32 = arith.constant 0 : i32
    %c0_i32_0 = arith.constant 0 : i32
    %c0_i32_1 = arith.constant 0 : i32
    return %c0_i32, %c0_i32_0 : i32, i32
  }
  func.func @transform_4(%arg0: i32) -> (i32, i32) {
    %c0_i32 = arith.constant 0 : i32
    %c0_i32_0 = arith.constant 0 : i32
    return %arg0, %c0_i32 : i32, i32
  }
}

</mosaic_0001>

<bundles_post_ra>
// kernel: fire_forward.1
= control target key start
LH: loop header
LB: loop body
LE: loop exit
PB: predicated region body
PF: predicated region fallthrough
CT: control target
= control target key end

     0   :  { %s4875_s15 = smov 0   ;;  %s8055_s0 = inlined_call_operand.vmem [shape: bf16[672,5], index: 0, kind: input, shape index: {}]   ;;  %s8056_s1 = inlined_call_operand.vmem [shape: bf16[5,8], index: 1, kind: input, shape index: {}]   ;;  %s8057_s2 = inlined_call_operand.vmem [shape: bf16[72,128], index: 2, kind: input, shape index: {}]   ;;  %s8058_s3 = inlined_call_operand.vmem [shape: f32[1,128], index: 3, kind: input, shape index: {}]   ;;  %s8059_s4 = inlined_call_operand.vmem [shape: bf16[672,128], index: 4, kind: output, shape index: {}]  }
   0x1 LB: > { %s3421_s16 = sadd.s32 4294967295, %s4837_s15   ;;  %p3425_p0 = scmp.ge.s32.totalorder %s4837_s15, 1  ;;  %s4837_s15 = sphi %s4875_s15, %s14_s15  }
   0x2   : > { %p163_p1 = scmp.lt.s32.totalorder %s4837_s15, 3 }
   0x4   : > { %p164_p2 = pnand %p3425_p0, %p163_p1 }
   0x6   : > { %167 = sbr.rel (%p164_p2) target bundleno = 935 (0x3a7), region = 36 }
   0xd   : > { %v244_v0 = vld [vmem:[%s8056_s1] sm:$0x7]  ;;  %vm414_vm0 = vcmask 1041408   ;;  %vm415_vm1 = vcmask 1042432   ;;  %v8067_v1 = vmov 0.0   ;;  %v4840_v2 = vmov 65535  }
   0xe   : > { %3756 = vmatprep.subr.bf16.mxu0 %v8067_v1  ;;  %v416_v3 = vsel %vm414_vm0, 4294967295, %v4840_v2  ;;  %s189_s19 = smul.u32 42, %s3421_s16  ;;  %3936 = vmatprep.subr.bf16.mxu1 %v8067_v1  ;;  %vm4841_vm2 = vmmov 0   ;;  %vm350_vm3 = vcmask 39936   ;;  %v706_v27 = vlaneseq  ;;  %s4842_s24 = smov 32  }
   0xf   : > { %v417_v4 = vsel %vm415_vm1, %v416_v3, 0  ;;  %3758 = vmatprep.mubr.msk.bf16.mxu0 %vm4841_vm2, %v8067_v1  ;;  %3856 = vmatprep.mubr.msk.bf16.mxu1 %vm4841_vm2, %v8067_v1  ;;  %s4843_s25 = smov 8   ;;  %s4844_s26 = smov 16   ;;  %vm2436_vm10 = vcmask 64512   ;;  %vm2479_vm11 = vcmask 130048   ;;  %vm2522_vm12 = vcmask 195584  }
  0x10   : > { %v419_v5 = vand.u32 %v417_v4, %v244_v0  ;;  %p190_p3 = scmp.lt.s32.totalorder %s189_s19, 83  ;;  %v4987_v28 = vshrl.u32 %v706_v27, 7  ;;  %s4845_s27 = smov 24   ;;  %vm2565_vm13 = vcmask 261120   ;;  %vm2608_vm14 = vcmask 326656  }
  0x11   : > { %s4846_s28 = smov 40   ;;  %s4847_s29 = smov 56   ;;  %vm2651_vm15 = vcmask 392192   ;;  %vm2694_vm0 = vcmask 457728   ;;  %vm2737_vm1 = vcmask 523264  }
  0x12   : > { %3757 = vmatpush3.bf16.msra.mxu0 %v419_v5  ;;  %s8673_s19 = smov (!%p190_p3, %s189_s19), 83  ;;  %vm793_vm4 = vcmp.lt.s32.totalorder %v4987_v28, 2  ;;  %vm878_vm5 = vcmp.lt.s32.totalorder %v4987_v28, 1  ;;  %vm963_vm6 = vcmp.lt.s32.totalorder %v4987_v28, 7  ;;  %vm1048_vm7 = vcmp.lt.s32.totalorder %v4987_v28, 6  ;;  %s4848_s30 = smov 48  }
  0x13   : > { %3842 = vmatprep.subr.bf16.mxu0 %v8067_v1  ;;  %s3426_s20 = sshll.u32 %s8673_s19, 2  ;;  %vm1133_vm8 = vcmp.lt.s32.totalorder %v4987_v28, 5  ;;  %vm708_vm9 = vcmp.lt.s32.totalorder %v4987_v28, 3  ;;  %s4849_s5 = smov 64  }
  0x14   : > { %s4901_s23 = scalar_lea.vmem %s8055_s0, %s3426_s20 }
  0x15   : > { %v4805_v6 = vld [vmem:[%s4901_s23] sm:$0xff]   ;;  %v4806_v7 = vld [vmem:[%s4901_s23 + $0x8] sm:$0xff]   ;;  %v4807_v8 = vld [vmem:[%s4901_s23 + $0x10] sm:$0xff]  }
  0x16   : > { %3759 = vmatmul.mubr.msk.bf16.vlgmr.msra.gmra.mrb[0].mxu0 %vm350_vm3, %v4805_v6  ;;  %v4808_v9 = vld [vmem:[%s4901_s23 + $0x18] sm:$0xff]   ;;  %v4809_v10 = vld [vmem:[%s4901_s23 + $0x20] sm:$0xff]   ;;  %v4810_v11 = vld [vmem:[%s4901_s23 + $0x28] sm:$0xff]  }
  0x17   : > { %3762 = vmatprep.mubr.msk.bf16.mxu0 %vm4841_vm2, %v8067_v1  ;;  %v4811_v12 = vld [vmem:[%s4901_s23 + $0x30] sm:$0xff]   ;;  %v4812_v13 = vld [vmem:[%s4901_s23 + $0x38] sm:$0xff]   ;;  %v4813_v14 = vld [vmem:[%s4901_s23 + $0x40] sm:$0xff]  }
  0x18   : > { %v4814_v15 = vld [vmem:[%s4901_s23 + $0x48] sm:$0xff]   ;;  %v4815_v16 = vld [vmem:[%s4901_s23 + $0x50] sm:$0xff]   ;;  %v4816_v17 = vld [vmem:[%s4901_s23 + $0x58] sm:$0xff]  }
  0x19   : > { %v4817_v18 = vld [vmem:[%s4901_s23 + $0x60] sm:$0xff]   ;;  %v4818_v19 = vld [vmem:[%s4901_s23 + $0x68] sm:$0xff]   ;;  %v4819_v20 = vld [vmem:[%s4901_s23 + $0x70] sm:$0xff]  }
  0x1a   : > { %v4820_v21 = vld [vmem:[%s4901_s23 + $0x78] sm:$0xff]   ;;  %v4821_v22 = vld [vmem:[%s4901_s23 + $0x80] sm:$0xff]   ;;  %v4822_v23 = vld [vmem:[%s4901_s23 + $0x88] sm:$0xff]  }
  0x1b   : > { %v4823_v24 = vld [vmem:[%s4901_s23 + $0x90] sm:$0xff]   ;;  %v4824_v25 = vld [vmem:[%s4901_s23 + $0x98] sm:$0xff]   ;;  %v4825_v26 = vld [vmem:[%s4901_s23 + $0xa0] sm:$0xff]   ;;  %s7989_s23 = scalar_lea.vmem %s8059_s4, %s3426_s20 }
  0x1e   : > { %3763 = vmatmul.mubr.msk.bf16.gmra.mrb[4].mxu0 %vm350_vm3, %v4806_v7 }
  0x1f   : > { %3766 = vmatprep.mubr.msk.bf16.mxu0 %vm4841_vm2, %v8067_v1 }
  0x26   : > { %3767 = vmatmul.mubr.msk.bf16.gmra.mrb[8].mxu0 %vm350_vm3, %v4807_v8 }
  0x27   : > { %3770 = vmatprep.mubr.msk.bf16.mxu0 %vm4841_vm2, %v8067_v1 }
  0x2e   : > { %3771 = vmatmul.mubr.msk.bf16.gmra.mrb[12].mxu0 %vm350_vm3, %v4808_v9 }
  0x2f   : > { %3774 = vmatprep.mubr.msk.bf16.mxu0 %vm4841_vm2, %v8067_v1 }
  0x36   : > { %3775 = vmatmul.mubr.msk.bf16.gmra.mrb[16].mxu0 %vm350_vm3, %v4809_v10 }
  0x37   : > { %3778 = vmatprep.mubr.msk.bf16.mxu0 %vm4841_vm2, %v8067_v1 }
  0x3e   : > { %3779 = vmatmul.mubr.msk.bf16.gmra.mrb[20].mxu0 %vm350_vm3, %v4810_v11 }
  0x3f   : > { %3782 = vmatprep.mubr.msk.bf16.mxu0 %vm4841_vm2, %v8067_v1 }
  0x46   : > { %3783 = vmatmul.mubr.msk.bf16.gmra.mrb[24].mxu0 %vm350_vm3, %v4811_v12 }
  0x47   : > { %3786 = vmatprep.mubr.msk.bf16.mxu0 %vm4841_vm2, %v8067_v1 }
  0x4e   : > { %3787 = vmatmul.mubr.msk.bf16.gmra.mrb[28].mxu0 %vm350_vm3, %v4812_v13 }
  0x4f   : > { %3790 = vmatprep.mubr.msk.bf16.mxu0 %vm4841_vm2, %v8067_v1 }
  0x56   : > { %3791 = vmatmul.mubr.msk.bf16.gmra.mrb[32].mxu0 %vm350_vm3, %v4813_v14 }
  0x57   : > { %3794 = vmatprep.mubr.msk.bf16.mxu0 %vm4841_vm2, %v8067_v1 }
  0x5e   : > { %3795 = vmatmul.mubr.msk.bf16.gmra.mrb[36].mxu0 %vm350_vm3, %v4814_v15 }
  0x5f   : > { %3798 = vmatprep.mubr.msk.bf16.mxu0 %vm4841_vm2, %v8067_v1 }
  0x66   : > { %3799 = vmatmul.mubr.msk.bf16.gmra.mrb[40].mxu0 %vm350_vm3, %v4815_v16 }
  0x67   : > { %3802 = vmatprep.mubr.msk.bf16.mxu0 %vm4841_vm2, %v8067_v1 }
  0x6e   : > { %3803 = vmatmul.mubr.msk.bf16.gmra.mrb[44].mxu0 %vm350_vm3, %v4816_v17 }
  0x6f   : > { %3806 = vmatprep.mubr.msk.bf16.mxu0 %vm4841_vm2, %v8067_v1 }
  0x76   : > { %3807 = vmatmul.mubr.msk.bf16.gmra.mrb[48].mxu0 %vm350_vm3, %v4817_v18 }
  0x77   : > { %3810 = vmatprep.mubr.msk.bf16.mxu0 %vm4841_vm2, %v8067_v1 }
  0x7e   : > { %3811 = vmatmul.mubr.msk.bf16.gmra.mrb[52].mxu0 %vm350_vm3, %v4818_v19 }
  0x7f   : > { %3814 = vmatprep.mubr.msk.bf16.mxu0 %vm4841_vm2, %v8067_v1 }
  0x86   : > { %3815 = vmatmul.mubr.msk.bf16.gmra.mrb[56].mxu0 %vm350_vm3, %v4819_v20 }
  0x87   : > { %3818 = vmatprep.mubr.msk.bf16.mxu0 %vm4841_vm2, %v8067_v1 }
  0x8e   : > { %3819 = vmatmul.mubr.msk.bf16.gmra.mrb[60].mxu0 %vm350_vm3, %v4820_v21 }
  0x8f   : > { %3822 = vmatprep.mubr.msk.bf16.mxu0 %vm4841_vm2, %v8067_v1 }
  0x96   : > { %3823 = vmatmul.mubr.msk.bf16.gmra.mrb[64].mxu0 %vm350_vm3, %v4821_v22 }
  0x97   : > { %3826 = vmatprep.mubr.msk.bf16.mxu0 %vm4841_vm2, %v8067_v1 }
  0x9e   : > { %3827 = vmatmul.mubr.msk.bf16.gmra.mrb[68].mxu0 %vm350_vm3, %v4822_v23 }
  0x9f   : > { %3830 = vmatprep.mubr.msk.bf16.mxu0 %vm4841_vm2, %v8067_v1 }
  0xa6   : > { %3831 = vmatmul.mubr.msk.bf16.gmra.mrb[72].mxu0 %vm350_vm3, %v4823_v24 }
  0xa7   : > { %3834 = vmatprep.mubr.msk.bf16.mxu0 %vm4841_vm2, %v8067_v1 }
  0xae   : > { %3835 = vmatmul.mubr.msk.bf16.gmra.mrb[76].mxu0 %vm350_vm3, %v4824_v25 }
  0xaf   : > { %3838 = vmatprep.mubr.msk.bf16.mxu0 %vm4841_vm2, %v8067_v1 }
  0xb6   : > { %3839 = vmatmul.mubr.msk.bf16.gmra.mrb[80].mxu0 %vm350_vm3, %v4825_v26  ;;  %vm2908_vm3 = vcmask 1043456  }
  0xb7   : > { %3852 = vmatprep.mubr.msk.bf16.mxu0 %vm4841_vm2, %v8067_v1 }
  0xe9   : > { %v455_v29 = vpop.f32.mrb[0].mxu0 }
  0xea   : > { %v4989_v30 = vmax.f32 %v455_v29, 0.0  ;;  %v3760_v31 = vpop.f32.mrb[1].mxu0 }
  0xeb   : > { %v458_v32 = vpop.f32.mrb[2].mxu0 }
  0xec   : > { %8208 = vst [vmem:[#allocation2_spill] sm:$0xff] %v4989_v30  ;;  %v4995_v33 = vmax.f32 %v458_v32, 0.0  ;;  %v3761_v34 = vpop.f32.mrb[3].mxu0  ;;  %v8070_v35 = vrot.slane %v4989_v30, 6  ;;  %v8069_v36 = vrot.slane %v4989_v30, 7  ;;  %v8066_v37 = vrot.slane %v4989_v30, 5 }
  0xed   : > { %v8064_v38 = vrot.slane %v4989_v30, 1  ;;  %v8065_v39 = vrot.slane %v4989_v30, 2  ;;  %v8063_v46 = vrot.slane %v4989_v30, 3 }
  0xee   : > { %8209 = vst [vmem:[#allocation3_spill] sm:$0xff] %v4995_v33  ;;  %v752_v40 = vrot.slane %v4995_v33, 6  ;;  %v837_v41 = vrot.slane %v4995_v33, 7  ;;  %v665_v42 = vrot.slane %v4995_v33, 5  ;;  %v922_v43 = vrot.slane %v4995_v33, 1 }
  0xef   : > { %v1007_v45 = vrot.slane %v4995_v33, 2  ;;  %v1092_v47 = vrot.slane %v4995_v33, 3 }
  0xf0   : > { %v5017_v48 = vsel %vm793_vm4, %v8070_v35, %v752_v40  ;;  %v5023_v49 = vsel %vm878_vm5, %v8069_v36, %v837_v41  ;;  %v5029_v50 = vsel %vm708_vm9, %v8066_v37, %v665_v42  ;;  %v1004_v51 = vsel %vm963_vm6, %v8064_v38, %v922_v43 }
  0xf1   : > { %8210 = vst [vmem:[#allocation4_spill] sm:$0xff] %v5017_v48  ;;  %8211 = vst [vmem:[#allocation5_spill] sm:$0xff] %v5023_v49  ;;  %v463_v52 = vpop.f32.mrb[4].mxu0  ;;  %v5039_v53 = vsel %vm1048_vm7, %v8065_v39, %v1007_v45  ;;  %v5045_v54 = vsel %vm1133_vm8, %v8063_v46, %v1092_v47 }
  0xf2   : > { %8212 = vst [vmem:[#allocation6_spill] sm:$0xff] %v5029_v50  ;;  %8213 = vst [vmem:[#allocation7_spill] sm:$0xff] %v5039_v53  ;;  %v5047_v55 = vmax.f32 %v463_v52, 0.0  ;;  %v3764_v56 = vpop.f32.mrb[5].mxu0 }
  0xf3   : > { %8214 = vst [vmem:[#allocation8_spill] sm:$0xff] %v5045_v54  ;;  %v466_v57 = vpop.f32.mrb[6].mxu0 }
  0xf4   : > { %8215 = vst [vmem:[#allocation9_spill] sm:$0xff] %v5047_v55  ;;  %v5049_v58 = vmax.f32 %v466_v57, 0.0  ;;  %v3765_v59 = vpop.f32.mrb[7].mxu0  ;;  %v753_v60 = vrot.slane %v5047_v55, 6  ;;  %v838_v61 = vrot.slane %v5047_v55, 7  ;;  %v923_v62 = vrot.slane %v5047_v55, 1 }
  0xf5   : > { %v8073_v63 = vrot.slane %v5047_v55, 5  ;;  %v8062_v0 = vrot.slane %v5047_v55, 2  ;;  %v8060_v8 = vrot.slane %v5047_v55, 3 }
  0xf6   : > { %8216 = vst [vmem:[#allocation10_spill] sm:$0xff] %v5049_v58  ;;  %v3965_v2 = vpack.i.bf16 %v5049_v58, %v5047_v55  ;;  %v754_v3 = vrot.slane %v5049_v58, 6  ;;  %v833_v4 = vsel %vm793_vm4, %v752_v40, %v753_v60  ;;  %v839_v5 = vrot.slane %v5049_v58, 7 }
  0xf7   : > { %v918_v6 = vsel %vm878_vm5, %v837_v41, %v838_v61  ;;  %v5068_v7 = vsel %vm708_vm9, %v665_v42, %v8073_v63  ;;  %v1003_v11 = vsel %vm963_vm6, %v922_v43, %v923_v62  ;;  %v5082_v12 = vsel %vm1048_vm7, %v1007_v45, %v8062_v0 }
  0xf8   : > { %3966 = vrot.lane.b32.xlu1 %v3965_v2, %s4842_s24  ;;  %v832_v9 = vsel %vm793_vm4, %v753_v60, %v754_v3  ;;  %v917_v10 = vsel %vm878_vm5, %v838_v61, %v839_v5  ;;  %8217 = vst [vmem:[#allocation11_spill] sm:$0xff] %v5082_v12  ;;  %v924_v16 = vrot.slane %v5049_v58, 1  ;;  %v5087_v19 = vpack.i.bf16 %v1003_v11, %v1004_v51 }
  0xf9   : > { %v471_v13 = vpop.f32.mrb[8].mxu0  ;;  %v3970_v14 = vpack.i.bf16 %v832_v9, %v833_v4  ;;  %v3975_v15 = vpack.i.bf16 %v917_v10, %v918_v6  ;;  %v5095_v22 = vsel %vm1133_vm8, %v1092_v47, %v8060_v8 }
  0xfa   : > { %v5085_v17 = vmax.f32 %v471_v13, 0.0  ;;  %v3768_v18 = vpop.f32.mrb[9].mxu0  ;;  %8219 = vst [vmem:[#allocation13_spill] sm:$0xff] %v5087_v19  ;;  %8220 = vst [vmem:[#allocation14_spill] sm:$0xff] %v5095_v22  ;;  %v1002_v27 = vsel %vm963_vm6, %v923_v62, %v924_v16 }
  0xfb   : > { %v474_v20 = vpop.f32.mrb[10].mxu0 }
  0xfc   : > { %8218 = vst [vmem:[#allocation12_spill] sm:$0xff] %v5085_v17  ;;  %v5097_v23 = vmax.f32 %v474_v20, 0.0  ;;  %3971 = vrot.lane.b32.xlu1 %v3970_v14, %s4843_s25  ;;  %v3769_v24 = vpop.f32.mrb[11].mxu0  ;;  %v925_v25 = vrot.slane %v5085_v17, 1  ;;  %v840_v26 = vrot.slane %v5085_v17, 7  ;;  %v755_v29 = vrot.slane %v5085_v17, 6 }
  0xfd   : > { %v8071_v31 = vrot.slane %v5085_v17, 2  ;;  %v8061_v41 = vrot.slane %v5085_v17, 3 }
  0xfe   : > { %v3985_v32 = vpack.i.bf16 %v5097_v23, %v5085_v17  ;;  %v1001_v34 = vsel %vm963_vm6, %v924_v16, %v925_v25  ;;  %v841_v40 = vrot.slane %v5097_v23, 7  ;;  %v916_v43 = vsel %vm878_vm5, %v839_v5, %v840_v26 }
  0xff   : > { %v5112_v42 = vpack.i.bf16 %v1001_v34, %v1002_v27  ;;  %v756_v45 = vrot.slane %v5097_v23, 6  ;;  %v1011_v51 = vrot.slane %v5097_v23, 2  ;;  %v926_v52 = vrot.slane %v5097_v23, 1 }
 0x100   : > { %3976 = vrot.lane.b32.xlu1 %v3975_v15, %s4844_s26  ;;  %3986 = vrot.lane.b32.xlu0 %v3985_v32, %s4842_s24  ;;  %v915_v47 = vsel %vm878_vm5, %v840_v26, %v841_v40  ;;  %v1096_v56 = vrot.slane %v5097_v23, 3  ;;  %v831_v61 = vsel %vm793_vm4, %v754_v3, %v755_v29  ;;  %v8072_v3 = vrot.slane %v5085_v17, 5 }
 0x101   : > { %8221 = vst [vmem:[#allocation15_spill] sm:$0xff] %v5112_v42  ;;  %v479_v57 = vpop.f32.mrb[12].mxu0  ;;  %v4000_v59 = vpack.i.bf16 %v915_v47, %v916_v43  ;;  %v830_v60 = vsel %vm793_vm4, %v755_v29, %v756_v45  ;;  %v5134_v5 = vsel %vm1048_vm7, %v8071_v31, %v1011_v51  ;;  %v1000_v6 = vsel %vm963_vm6, %v925_v25, %v926_v52 }
 0x102   : > { %v5128_v62 = vmax.f32 %v479_v57, 0.0  ;;  %v3772_v2 = vpop.f32.mrb[13].mxu0  ;;  %v3995_v4 = vpack.i.bf16 %v830_v60, %v831_v61  ;;  %v5142_v10 = vsel %vm1133_vm8, %v8061_v41, %v1096_v56  ;;  %v669_v11 = vrot.slane %v5097_v23, 5 }
 0x103   : > { %v482_v9 = vpop.f32.mrb[14].mxu0 }
 0x104   : > { %v5148_v14 = vmax.f32 %v482_v9, 0.0  ;;  %3981 = vrot.lane.b32.xlu1 %v3975_v15, %s4845_s27  ;;  %3991 = vrot.lane.b32.xlu0 %v5112_v42, %s4846_s28  ;;  %v3773_v16 = vpop.f32.mrb[15].mxu0  ;;  %v1012_v18 = vrot.slane %v5128_v62, 2  ;;  %v927_v20 = vrot.slane %v5128_v62, 1  ;;  %v1097_v24 = vrot.slane %v5128_v62, 3 }
 0x105   : > { %v757_v23 = vrot.slane %v5128_v62, 6  ;;  %v842_v25 = vrot.slane %v5128_v62, 7  ;;  %v5162_v15 = vsel %vm708_vm9, %v8072_v3, %v669_v11  ;;  %v670_v26 = vrot.slane %v5128_v62, 5 }
 0x106   : > { %8222 = vst [vmem:[#allocation16_spill] sm:$0xff] %v5162_v15  ;;  %v4010_v27 = vpack.i.bf16 %v5148_v14, %v5128_v62  ;;  %v1084_v29 = vsel %vm1048_vm7, %v1011_v51, %v1012_v18  ;;  %v999_v32 = vsel %vm963_vm6, %v926_v52, %v927_v20  ;;  %v5173_v34 = vsel %vm1133_vm8, %v1096_v56, %v1097_v24 }
 0x107   : > { %v4020_v43 = vpack.i.bf16 %v1084_v29, %v5134_v5  ;;  %v5176_v47 = vpack.i.bf16 %v999_v32, %v1000_v6  ;;  %v4025_v57 = vpack.i.bf16 %v5173_v34, %v5142_v10  ;;  %v758_v60 = vrot.slane %v5148_v14, 6 }
 0x108   : > { %4001 = vrot.lane.b32.xlu0 %v4000_v59, %s4844_s26  ;;  %3996 = vrot.lane.b32.xlu1 %v3995_v4, %s4843_s25  ;;  %v829_v51 = vsel %vm793_vm4, %v756_v45, %v757_v23  ;;  %v843_v52 = vrot.slane %v5148_v14, 7  ;;  %v914_v56 = vsel %vm878_vm5, %v841_v40, %v842_v25  ;;  %v928_v2 = vrot.slane %v5148_v14, 1 }
 0x109   : > { %v487_v61 = vpop.f32.mrb[16].mxu0  ;;  %v828_v62 = vsel %vm793_vm4, %v757_v23, %v758_v60  ;;  %v1098_v5 = vrot.slane %v5148_v14, 3  ;;  %v1013_v6 = vrot.slane %v5148_v14, 2  ;;  %v5199_v40 = vsel %vm708_vm9, %v669_v11, %v670_v26 }
 0x10a   : > { %v5193_v9 = vmax.f32 %v487_v61, 0.0  ;;  %v3776_v4 = vpop.f32.mrb[17].mxu0  ;;  %v4035_v10 = vpack.i.bf16 %v828_v62, %v829_v51  ;;  %v913_v45 = vsel %vm878_vm5, %v842_v25, %v843_v52  ;;  %8223 = vst [vmem:[#allocation17_spill] sm:$0xff] %v5199_v40  ;;  %v998_v23 = vsel %vm963_vm6, %v927_v20, %v928_v2 }
 0x10b   : > { %v490_v16 = vpop.f32.mrb[18].mxu0  ;;  %v5201_v29 = vpack.i.bf16 %v913_v45, %v914_v56  ;;  %v5207_v32 = vsel %vm1133_vm8, %v1097_v24, %v1098_v5  ;;  %v5218_v20 = vsel %vm1048_vm7, %v1012_v18, %v1013_v6  ;;  %v8074_v62 = vrot.slane %v5148_v14, 5 }
 0x10c   : > { %v5209_v34 = vmax.f32 %v490_v16, 0.0  ;;  %4006 = vrot.lane.b32.xlu0 %v4000_v59, %s4845_s27  ;;  %4011 = vrot.lane.b32.xlu1 %v4010_v27, %s4842_s24  ;;  %v3777_v25 = vpop.f32.mrb[19].mxu0  ;;  %v929_v11 = vrot.slane %v5193_v9, 1  ;;  %v1099_v51 = vrot.slane %v5193_v9, 3  ;;  %v1014_v56 = vrot.slane %v5193_v9, 2 }
 0x10d   : > { %v844_v24 = vrot.slane %v5193_v9, 7  ;;  %v759_v61 = vrot.slane %v5193_v9, 6  ;;  %v5259_v13 = vsel %vm708_vm9, %v670_v26, %v8074_v62  ;;  %v8228_v12 = vrot.slane %v5193_v9, 5 }
 0x10e   : > { %v4050_v59 = vpack.i.bf16 %v5209_v34, %v5193_v9  ;;  %v997_v27 = vsel %vm963_vm6, %v928_v2, %v929_v11  ;;  %v5229_v4 = vsel %vm1133_vm8, %v1098_v5, %v1099_v51  ;;  %v5233_v18 = vsel %vm1048_vm7, %v1013_v6, %v1014_v56  ;;  %8224 = vst [vmem:[#allocation18_spill] sm:$0xff] %v5259_v13 }
 0x10f   : > { %v5235_v45 = vpack.i.bf16 %v997_v27, %v998_v23  ;;  %v4065_v16 = vpack.i.bf16 %v5229_v4, %v5207_v32  ;;  %v845_v2 = vrot.slane %v5209_v34, 7  ;;  %v912_v5 = vsel %vm878_vm5, %v843_v52, %v844_v24 }
 0x110   : > { %4021 = vrot.lane.b32.xlu0 %v4020_v43, %s4847_s29  ;;  %4016 = vrot.lane.b32.xlu1 %v5176_v47, %s4848_s30  ;;  %v760_v6 = vrot.slane %v5209_v34, 6  ;;  %v5250_v23 = vsel %vm793_vm4, %v758_v60, %v759_v61  ;;  %v1015_v8 = vrot.slane %v5209_v34, 2  ;;  %v930_v43 = vrot.slane %v5209_v34, 1 }
 0x111   : > { %v495_v27 = vpop.f32.mrb[20].mxu0  ;;  %v1100_v41 = vrot.slane %v5209_v34, 3  ;;  %v911_v60 = vsel %vm878_vm5, %v844_v24, %v845_v2  ;;  %v8229_v33 = vrot.slane %v5148_v14, 5 }
 0x112   : > { %v5261_v52 = vmax.f32 %v495_v27, 0.0  ;;  %v3780_v21 = vpop.f32.mrb[21].mxu0  ;;  %v5267_v44 = vsel %vm793_vm4, %v759_v61, %v760_v6  ;;  %v5269_v46 = vpack.i.bf16 %v911_v60, %v912_v5  ;;  %v5275_v26 = vsel %vm1048_vm7, %v1014_v56, %v1015_v8 }
 0x113   : > { %v498_v0 = vpop.f32.mrb[22].mxu0  ;;  %v996_v5 = vsel %vm963_vm6, %v929_v11, %v930_v43  ;;  %v5288_v56 = vsel %vm1133_vm8, %v1099_v51, %v1100_v41 }
 0x114   : > { %v5277_v27 = vmax.f32 %v498_v0, 0.0  ;;  %4026 = vrot.lane.b32.xlu1 %v4025_v57, %s4849_s5  ;;  %4036 = vrot.lane.b32.xlu0 %v4035_v10, %s4843_s25  ;;  %v3781_v21 = vpop.f32.mrb[23].mxu0  ;;  %v1016_v24 = vrot.slane %v5261_v52, 2  ;;  %v931_v61 = vrot.slane %v5261_v52, 1  ;;  %v1101_v60 = vrot.slane %v5261_v52, 3 }
 0x115   : > { %v761_v0 = vrot.slane %v5261_v52, 6  ;;  %v846_v57 = vrot.slane %v5261_v52, 7 }
 0x116   : > { %v5296_v21 = vsel %vm1048_vm7, %v1015_v8, %v1016_v24  ;;  %v995_v11 = vsel %vm963_vm6, %v930_v43, %v931_v61  ;;  %v762_v39 = vrot.slane %v5277_v27, 6  ;;  %v5307_v1 = vsel %vm1133_vm8, %v1100_v41, %v1101_v60 }
 0x117   : > { %v5303_v37 = vpack.i.bf16 %v995_v11, %v996_v5  ;;  %v5311_v36 = vsel %vm793_vm4, %v760_v6, %v761_v0  ;;  %v847_v5 = vrot.slane %v5277_v27, 7  ;;  %v910_v6 = vsel %vm878_vm5, %v845_v2, %v846_v57 }
 0x118   : > { %4031 = vrot.lane.b32.xlu1 %v5176_v47, %s4846_s28  ;;  %4051 = vrot.lane.b32.xlu0 %v4050_v59, %s4842_s24  ;;  %v5320_v43 = vsel %vm793_vm4, %v761_v0, %v762_v39  ;;  %v932_v47 = vrot.slane %v5277_v27, 1  ;;  %v1102_v59 = vrot.slane %v5277_v27, 3  ;;  %v1017_v3 = vrot.slane %v5277_v27, 2 }
 0x119   : > { %v503_v41 = vpop.f32.mrb[24].mxu0  ;;  %v909_v0 = vsel %vm878_vm5, %v846_v57, %v847_v5  ;;  %v8231_v14 = vpack.i.bf16 %v5277_v27, %v5261_v52 }
 0x11a   : > { %v5329_v35 = vmax.f32 %v503_v41, 0.0  ;;  %v3784_v31 = vpop.f32.mrb[25].mxu0  ;;  %v5334_v8 = vpack.i.bf16 %v909_v0, %v910_v6  ;;  %v994_v11 = vsel %vm963_vm6, %v931_v61, %v932_v47  ;;  %v5340_v2 = vsel %vm1133_vm8, %v1101_v60, %v1102_v59 }
 0x11b   : > { %v506_v63 = vpop.f32.mrb[26].mxu0  ;;  %v5353_v61 = vsel %vm1048_vm7, %v1016_v24, %v1017_v3 }
 0x11c   : > { %4041 = vrot.lane.b32.xlu1 %v5201_v29, %s4844_s26  ;;  %4056 = vrot.lane.b32.xlu0 %v5235_v45, %s4848_s30  ;;  %v5346_v31 = vmax.f32 %v506_v63, 0.0  ;;  %v3785_v57 = vpop.f32.mrb[27].mxu0  ;;  %v933_v41 = vrot.slane %v5329_v35, 1  ;;  %v1103_v6 = vrot.slane %v5329_v35, 3  ;;  %v1018_v0 = vrot.slane %v5329_v35, 2 }
 0x11d   : > { %v848_v60 = vrot.slane %v5329_v35, 7  ;;  %v763_v51 = vrot.slane %v5329_v35, 6 }
 0x11e   : > { %v993_v63 = vsel %vm963_vm6, %v932_v47, %v933_v41  ;;  %v5363_v57 = vsel %vm1133_vm8, %v1102_v59, %v1103_v6  ;;  %v5367_v62 = vsel %vm1048_vm7, %v1017_v3, %v1018_v0  ;;  %v849_v47 = vrot.slane %v5346_v31, 7 }
 0x11f   : > { %v5369_v24 = vpack.i.bf16 %v993_v63, %v994_v11  ;;  %v908_v3 = vsel %vm878_vm5, %v847_v5, %v848_v60  ;;  %v764_v11 = vrot.slane %v5346_v31, 6  ;;  %v5387_v59 = vsel %vm793_vm4, %v762_v39, %v763_v51 }
 0x120   : > { %4046 = vrot.lane.b32.xlu1 %v5201_v29, %s4845_s27  ;;  %4066 = vrot.lane.b32.xlu0 %v4065_v16, %s4849_s5  ;;  %v1019_v25 = vrot.slane %v5346_v31, 2  ;;  %v934_v29 = vrot.slane %v5346_v31, 1  ;;  %v1104_v38 = vrot.slane %v5346_v31, 3  ;;  %v907_v16 = vsel %vm878_vm5, %v848_v60, %v849_v47 }
 0x121   : > { %v511_v63 = vpop.f32.mrb[28].mxu0  ;;  %v5398_v5 = vsel %vm793_vm4, %v763_v51, %v764_v11  ;;  %v5401_v54 = vpack.i.bf16 %v907_v16, %v908_v3  ;;  %v8225_v60 = vpack.i.bf16 %v5233_v18, %v5218_v20 }
 0x122   : > { %v5392_v32 = vmax.f32 %v511_v63, 0.0  ;;  %v3788_v4 = vpop.f32.mrb[29].mxu0  ;;  %v5407_v63 = vsel %vm1048_vm7, %v1018_v0, %v1019_v25  ;;  %v992_v22 = vsel %vm963_vm6, %v933_v41, %v934_v29  ;;  %v5424_v39 = vsel %vm1133_vm8, %v1103_v6, %v1104_v38 }
 0x123   : > { %v514_v10 = vpop.f32.mrb[30].mxu0 }
 0x124   : > { %4061 = vrot.lane.b32.xlu1 %v8225_v60, %s4847_s29  ;;  %4071 = vrot.lane.b32.xlu0 %v5235_v45, %s4846_s28  ;;  %v5415_v51 = vmax.f32 %v514_v10, 0.0  ;;  %v3789_v4 = vpop.f32.mrb[31].mxu0  ;;  %v1020_v3 = vrot.slane %v5392_v32, 2  ;;  %v935_v16 = vrot.slane %v5392_v32, 1  ;;  %v1105_v0 = vrot.slane %v5392_v32, 3 }
 0x125   : > { %v765_v20 = vrot.slane %v5392_v32, 6  ;;  %v850_v18 = vrot.slane %v5392_v32, 7 }
 0x126   : > { %v5432_v10 = vsel %vm1048_vm7, %v1019_v25, %v1020_v3  ;;  %v991_v41 = vsel %vm963_vm6, %v934_v29, %v935_v16  ;;  %v766_v60 = vrot.slane %v5415_v51, 6  ;;  %v5443_v42 = vsel %vm1133_vm8, %v1104_v38, %v1105_v0 }
 0x127   : > { %v5439_v4 = vpack.i.bf16 %v991_v41, %v992_v22  ;;  %v5447_v45 = vsel %vm793_vm4, %v764_v11, %v765_v20  ;;  %v8226_v25 = vpack.i.bf16 %v5267_v44, %v5250_v23  ;;  %v936_v38 = vrot.slane %v5415_v51, 1 }
 0x128   : > { %4081 = vrot.lane.b32.xlu0 %v5269_v46, %s4844_s26  ;;  %v5459_v29 = vsel %vm793_vm4, %v765_v20, %v766_v60  ;;  %v851_v6 = vrot.slane %v5415_v51, 7  ;;  %v906_v53 = vsel %vm878_vm5, %v849_v47, %v850_v18  ;;  %v1106_v44 = vrot.slane %v5415_v51, 3 }
 0x129   : > { %4076 = vrot.lane.b32.xlu1 %v8226_v25, %s4843_s25  ;;  %v519_v41 = vpop.f32.mrb[32].mxu0  ;;  %v990_v20 = vsel %vm963_vm6, %v935_v16, %v936_v38  ;;  %v1021_v22 = vrot.slane %v5415_v51, 2  ;;  %v5479_v11 = vsel %vm708_vm9, %v8229_v33, %v8228_v12  ;;  %v673_v16 = vrot.slane %v5209_v34, 5 }
 0x12a   : > { %v5468_v23 = vmax.f32 %v519_v41, 0.0  ;;  %v3792_v25 = vpop.f32.mrb[33].mxu0  ;;  %8230 = vst [vmem:[#allocation20_spill] sm:$0xff] %v5479_v11  ;;  %v905_v47 = vsel %vm878_vm5, %v850_v18, %v851_v6  ;;  %v5485_v41 = vsel %vm1133_vm8, %v1105_v0, %v1106_v44 }
 0x12b   : > { %v522_v19 = vpop.f32.mrb[34].mxu0  ;;  %v5497_v18 = vpack.i.bf16 %v905_v47, %v906_v53 }
 0x12c   : > { %8227 = vst [vmem:[#allocation19_spill] sm:$0xff] %v5468_v23  ;;  %4086 = vrot.lane.b32.xlu0 %v5269_v46, %s4845_s27  ;;  %v5494_v33 = vmax.f32 %v522_v19, 0.0  ;;  %v3793_v12 = vpop.f32.mrb[35].mxu0  ;;  %v937_v25 = vrot.slane %v5468_v23, 1  ;;  %v1107_v0 = vrot.slane %v5468_v23, 3  ;;  %v852_v50 = vrot.slane %v5468_v23, 7 }
 0x12d   : > { %4091 = vrot.lane.b32.xlu1 %v8231_v14, %s4842_s24  ;;  %v1022_v34 = vrot.slane %v5468_v23, 2  ;;  %v5504_v46 = vsel %vm1048_vm7, %v1020_v3, %v1021_v22  ;;  %v767_v47 = vrot.slane %v5468_v23, 6 }
 0x12e   : > { %8232 = vst [vmem:[#allocation21_spill] sm:$0xff] %v5494_v33  ;;  %v989_v14 = vsel %vm963_vm6, %v936_v38, %v937_v25  ;;  %v5510_v19 = vsel %vm1133_vm8, %v1106_v44, %v1107_v0  ;;  %v853_v53 = vrot.slane %v5494_v33, 7  ;;  %v904_v3 = vsel %vm878_vm5, %v851_v6, %v852_v50 }
 0x12f   : > { %v5514_v12 = vpack.i.bf16 %v989_v14, %v990_v20  ;;  %v5522_v13 = vsel %vm1048_vm7, %v1021_v22, %v1022_v34  ;;  %v8234_v38 = vpack.i.bf16 %v5296_v21, %v5275_v26  ;;  %v768_v6 = vrot.slane %v5494_v33, 6 }
 0x130   : > { %v903_v44 = vsel %vm878_vm5, %v852_v50, %v853_v53  ;;  %v5537_v22 = vsel %vm793_vm4, %v766_v60, %v767_v47  ;;  %v8235_v26 = vrot.slane %v5193_v9, 5  ;;  %v674_v50 = vrot.slane %v5261_v52, 5 }
 0x131   : > { %8233 = vst [vmem:[#allocation22_spill] sm:$0xff] %v5514_v12  ;;  %4101 = vrot.lane.b32.xlu0 %v8234_v38, %s4847_s29  ;;  %4096 = vrot.lane.b32.xlu1 %v5303_v37, %s4848_s30  ;;  %v527_v14 = vpop.f32.mrb[36].mxu0  ;;  %v5539_v11 = vpack.i.bf16 %v903_v44, %v904_v3  ;;  %v5552_v40 = vsel %vm793_vm4, %v767_v47, %v768_v6  ;;  %v675_v60 = vrot.slane %v5277_v27, 5  ;;  %v938_v3 = vrot.slane %v5494_v33, 1 }
 0x132   : > { %v5545_v21 = vsel %vm708_vm9, %v8235_v26, %v673_v16  ;;  %v5548_v38 = vmax.f32 %v527_v14, 0.0  ;;  %v3796_v20 = vpop.f32.mrb[37].mxu0  ;;  %v5560_v26 = vsel %vm708_vm9, %v673_v16, %v674_v50  ;;  %v1108_v52 = vrot.slane %v5494_v33, 3 }
 0x133   : > { %8236 = vst [vmem:[#allocation23_spill] sm:$0xff] %v5545_v21  ;;  %v530_v44 = vpop.f32.mrb[38].mxu0  ;;  %8238 = vst [vmem:[#allocation25_spill] sm:$0xff] %v5560_v26  ;;  %v8239_v20 = vpack.i.bf16 %v5307_v1, %v5288_v56  ;;  %v8240_v27 = vpack.i.bf16 %v5320_v43, %v5311_v36  ;;  %v5577_v26 = vsel %vm708_vm9, %v674_v50, %v675_v60 }
 0x134   : > { %8237 = vst [vmem:[#allocation24_spill] sm:$0xff] %v5548_v38  ;;  %v5571_v47 = vmax.f32 %v530_v44, 0.0  ;;  %v3797_v14 = vpop.f32.mrb[39].mxu0  ;;  %v769_v9 = vrot.slane %v5548_v38, 6  ;;  %v854_v16 = vrot.slane %v5548_v38, 7  ;;  %8242 = vst [vmem:[#allocation27_spill] sm:$0xff] %v5577_v26  ;;  %v988_v1 = vsel %vm963_vm6, %v937_v25, %v938_v3 }
 0x135   : > { %4106 = vrot.lane.b32.xlu1 %v8239_v20, %s4849_s5  ;;  %4116 = vrot.lane.b32.xlu0 %v8240_v27, %s4843_s25  ;;  %v939_v21 = vrot.slane %v5548_v38, 1  ;;  %v8082_v56 = vrot.slane %v5548_v38, 3  ;;  %v5585_v36 = vsel %vm1133_vm8, %v1107_v0, %v1108_v52  ;;  %v1023_v27 = vrot.slane %v5494_v33, 2 }
 0x136   : > { %8241 = vst [vmem:[#allocation26_spill] sm:$0xff] %v5571_v47  ;;  %8243 = vst [vmem:[#allocation28_spill] sm:$0xff] %v5585_v36  ;;  %v770_v43 = vrot.slane %v5571_v47, 6  ;;  %v5590_v44 = vsel %vm793_vm4, %v768_v6, %v769_v9  ;;  %v855_v50 = vrot.slane %v5571_v47, 7  ;;  %v902_v20 = vsel %vm878_vm5, %v853_v53, %v854_v16 }
 0x137   : > { %v987_v25 = vsel %vm963_vm6, %v938_v3, %v939_v21  ;;  %v5601_v0 = vsel %vm1133_vm8, %v1108_v52, %v8082_v56  ;;  %v1024_v14 = vrot.slane %v5548_v38, 2  ;;  %v8244_v53 = vpack.i.bf16 %v5346_v31, %v5329_v35 }
 0x138   : > { %v5613_v6 = vsel %vm793_vm4, %v769_v9, %v770_v43  ;;  %v901_v3 = vsel %vm878_vm5, %v854_v16, %v855_v50  ;;  %v5617_v52 = vpack.i.bf16 %v987_v25, %v988_v1  ;;  %v1025_v56 = vrot.slane %v5571_v47, 2 }
 0x139   : > { %4111 = vrot.lane.b32.xlu1 %v5303_v37, %s4846_s28  ;;  %4131 = vrot.lane.b32.xlu0 %v8244_v53, %s4842_s24  ;;  %v535_v26 = vpop.f32.mrb[40].mxu0  ;;  %v5622_v15 = vpack.i.bf16 %v901_v3, %v902_v20  ;;  %v5630_v48 = vsel %vm1048_vm7, %v1023_v27, %v1024_v14  ;;  %v5634_v16 = vsel %vm1048_vm7, %v1022_v34, %v1023_v27  ;;  %v676_v3 = vrot.slane %v5329_v35, 5 }
 0x13a   : > { %v5626_v49 = vmax.f32 %v535_v26, 0.0  ;;  %v3800_v9 = vpop.f32.mrb[41].mxu0  ;;  %8246 = vst [vmem:[#allocation30_spill] sm:$0xff] %v5630_v48  ;;  %8247 = vst [vmem:[#allocation31_spill] sm:$0xff] %v5634_v16  ;;  %v5640_v20 = vsel %vm1048_vm7, %v1024_v14, %v1025_v56  ;;  %v677_v35 = vrot.slane %v5346_v31, 5  ;;  %v940_v37 = vrot.slane %v5571_v47, 1 }
 0x13b   : > { %v538_v1 = vpop.f32.mrb[42].mxu0  ;;  %8248 = vst [vmem:[#allocation32_spill] sm:$0xff] %v5640_v20  ;;  %v5656_v26 = vsel %vm708_vm9, %v675_v60, %v676_v3  ;;  %v1110_v20 = vrot.slane %v5571_v47, 3 }
 0x13c   : > { %8245 = vst [vmem:[#allocation29_spill] sm:$0xff] %v5626_v49  ;;  %v5649_v34 = vmax.f32 %v538_v1, 0.0  ;;  %v3801_v27 = vpop.f32.mrb[43].mxu0  ;;  %v856_v9 = vrot.slane %v5626_v49, 7  ;;  %v771_v25 = vrot.slane %v5626_v49, 6  ;;  %8250 = vst [vmem:[#allocation34_spill] sm:$0xff] %v5656_v26  ;;  %v5678_v53 = vsel %vm708_vm9, %v676_v3, %v677_v35 }
 0x13d   : > { %4121 = vrot.lane.b32.xlu1 %v5334_v8, %s4844_s26  ;;  %4136 = vrot.lane.b32.xlu0 %v5369_v24, %s4848_s30  ;;  %v8251_v60 = vrot.slane %v5626_v49, 2  ;;  %8253 = vst [vmem:[#allocation36_spill] sm:$0xff] %v5678_v53  ;;  %v941_v26 = vrot.slane %v5626_v49, 1 }
 0x13e   : > { %8249 = vst [vmem:[#allocation33_spill] sm:$0xff] %v5649_v34  ;;  %v857_v1 = vrot.slane %v5649_v34, 7  ;;  %v900_v27 = vsel %vm878_vm5, %v855_v50, %v856_v9  ;;  %v772_v16 = vrot.slane %v5649_v34, 6  ;;  %v5668_v14 = vsel %vm793_vm4, %v770_v43, %v771_v25 }
 0x13f   : > { %v5674_v31 = vsel %vm1048_vm7, %v1025_v56, %v8251_v60  ;;  %v986_v50 = vsel %vm963_vm6, %v939_v21, %v940_v37  ;;  %v8254_v43 = vpack.i.bf16 %v5363_v57, %v5340_v2  ;;  %v942_v21 = vrot.slane %v5649_v34, 1 }
 0x140   : > { %8252 = vst [vmem:[#allocation35_spill] sm:$0xff] %v5674_v31  ;;  %v899_v56 = vsel %vm878_vm5, %v856_v9, %v857_v1  ;;  %v5693_v3 = vsel %vm793_vm4, %v771_v25, %v772_v16  ;;  %v985_v2 = vsel %vm963_vm6, %v940_v37, %v941_v26  ;;  %v8257_v37 = vpack.i.bf16 %v5367_v62, %v5353_v61 }
 0x141   : > { %4126 = vrot.lane.b32.xlu1 %v5334_v8, %s4845_s27  ;;  %4146 = vrot.lane.b32.xlu0 %v8254_v43, %s4849_s5  ;;  %v543_v53 = vpop.f32.mrb[44].mxu0  ;;  %v5698_v48 = vpack.i.bf16 %v899_v56, %v900_v27  ;;  %v5706_v43 = vpack.i.bf16 %v985_v2, %v986_v50  ;;  %v984_v25 = vsel %vm963_vm6, %v941_v26, %v942_v21  ;;  %v1111_v27 = vrot.slane %v5626_v49, 3 }
 0x142   : > { %v5704_v57 = vmax.f32 %v543_v53, 0.0  ;;  %v3804_v9 = vpop.f32.mrb[45].mxu0  ;;  %v1112_v56 = vrot.slane %v5649_v34, 3  ;;  %v678_v8 = vrot.slane %v5392_v32, 5  ;;  %v8260_v31 = vrot.slane %v5548_v38, 3 }
 0x143   : > { %8256 = vst [vmem:[#allocation38_spill] sm:$0xff] %v5706_v43  ;;  %v546_v60 = vpop.f32.mrb[46].mxu0  ;;  %v5727_v43 = vsel %vm1133_vm8, %v1110_v20, %v1111_v27 }
 0x144   : > { %8255 = vst [vmem:[#allocation37_spill] sm:$0xff] %v5704_v57  ;;  %v5720_v53 = vmax.f32 %v546_v60, 0.0  ;;  %v3805_v26 = vpop.f32.mrb[47].mxu0  ;;  %v773_v50 = vrot.slane %v5704_v57, 6  ;;  %v858_v2 = vrot.slane %v5704_v57, 7  ;;  %v943_v9 = vrot.slane %v5704_v57, 1 }
 0x145   : > { %4141 = vrot.lane.b32.xlu1 %v8257_v37, %s4847_s29  ;;  %4151 = vrot.lane.b32.xlu0 %v5369_v24, %s4846_s28  ;;  %8259 = vst [vmem:[#allocation40_spill] sm:$0xff] %v5727_v43  ;;  %v5733_v62 = vsel %vm1133_vm8, %v8260_v31, %v1110_v20  ;;  %v8090_v61 = vrot.slane %v5704_v57, 3  ;;  %v5738_v24 = vsel %vm1133_vm8, %v1111_v27, %v1112_v56 }
 0x146   : > { %8258 = vst [vmem:[#allocation39_spill] sm:$0xff] %v5720_v53  ;;  %8261 = vst [vmem:[#allocation41_spill] sm:$0xff] %v5733_v62  ;;  %v774_v60 = vrot.slane %v5720_v53, 6  ;;  %v5743_v37 = vsel %vm793_vm4, %v772_v16, %v773_v50  ;;  %v859_v26 = vrot.slane %v5720_v53, 7  ;;  %v898_v36 = vsel %vm878_vm5, %v857_v1, %v858_v2 }
 0x147   : > { %8262 = vst [vmem:[#allocation42_spill] sm:$0xff] %v5738_v24  ;;  %v983_v20 = vsel %vm963_vm6, %v942_v21, %v943_v9  ;;  %v5756_v27 = vsel %vm1133_vm8, %v1112_v56, %v8090_v61  ;;  %v5760_v16 = vsel %vm708_vm9, %v677_v35, %v678_v8  ;;  %v8265_v1 = vpack.i.bf16 %v5398_v5, %v5387_v59 }
 0x148   : > { %8263 = vst [vmem:[#allocation43_spill] sm:$0xff] %v5756_v27  ;;  %8264 = vst [vmem:[#allocation44_spill] sm:$0xff] %v5760_v16  ;;  %v5770_v21 = vsel %vm793_vm4, %v773_v50, %v774_v60  ;;  %v897_v56 = vsel %vm878_vm5, %v858_v2, %v859_v26  ;;  %v5774_v31 = vpack.i.bf16 %v983_v20, %v984_v25  ;;  %v8092_v35 = vrot.slane %v5415_v51, 5 }
 0x149   : > { %4161 = vrot.lane.b32.xlu0 %v5401_v54, %s4844_s26  ;;  %4156 = vrot.lane.b32.xlu1 %v8265_v1, %s4843_s25  ;;  %v551_v61 = vpop.f32.mrb[48].mxu0  ;;  %v5779_v62 = vpack.i.bf16 %v897_v56, %v898_v36  ;;  %v1027_v2 = vrot.slane %v5649_v34, 2  ;;  %v1028_v1 = vrot.slane %v5704_v57, 2  ;;  %v1029_v36 = vrot.slane %v5720_v53, 2 }
 0x14a   : > { %8266 = vst [vmem:[#allocation45_spill] sm:$0xff] %v5774_v31  ;;  %v5783_v5 = vmax.f32 %v551_v61, 0.0  ;;  %v3808_v50 = vpop.f32.mrb[49].mxu0  ;;  %v5789_v25 = vsel %vm708_vm9, %v678_v8, %v8092_v35  ;;  %v8269_v8 = vpack.i.bf16 %v5415_v51, %v5392_v32  ;;  %v8271_v56 = vrot.slane %v5626_v49, 2 }
 0x14b   : > { %8268 = vst [vmem:[#allocation47_spill] sm:$0xff] %v5789_v25  ;;  %v554_v20 = vpop.f32.mrb[50].mxu0  ;;  %v8276_v43 = vpack.i.bf16 %v5432_v10, %v5407_v63  ;;  %v680_v63 = vrot.slane %v5468_v23, 5 }
 0x14c   : > { %8267 = vst [vmem:[#allocation46_spill] sm:$0xff] %v5783_v5  ;;  %v5804_v50 = vmax.f32 %v554_v20, 0.0  ;;  %v3809_v59 = vpop.f32.mrb[51].mxu0  ;;  %v860_v16 = vrot.slane %v5783_v5, 7  ;;  %v775_v35 = vrot.slane %v5783_v5, 6  ;;  %v5812_v61 = vsel %vm1048_vm7, %v8271_v56, %v1027_v2 }
 0x14d   : > { %4166 = vrot.lane.b32.xlu0 %v5401_v54, %s4845_s27  ;;  %4171 = vrot.lane.b32.xlu1 %v8269_v8, %s4842_s24  ;;  %8272 = vst [vmem:[#allocation49_spill] sm:$0xff] %v5812_v61  ;;  %v5816_v54 = vsel %vm1048_vm7, %v1027_v2, %v1028_v1  ;;  %v8096_v32 = vrot.slane %v5783_v5, 2  ;;  %v5821_v20 = vsel %vm1048_vm7, %v1028_v1, %v1029_v36  ;;  %v944_v59 = vrot.slane %v5720_v53, 1 }
 0x14e   : > { %8270 = vst [vmem:[#allocation48_spill] sm:$0xff] %v5804_v50  ;;  %8273 = vst [vmem:[#allocation50_spill] sm:$0xff] %v5816_v54  ;;  %v861_v8 = vrot.slane %v5804_v50, 7  ;;  %v896_v25 = vsel %vm878_vm5, %v859_v26, %v860_v16  ;;  %v776_v56 = vrot.slane %v5804_v50, 6  ;;  %v5830_v24 = vsel %vm793_vm4, %v774_v60, %v775_v35 }
 0x14f   : > { %8274 = vst [vmem:[#allocation51_spill] sm:$0xff] %v5821_v20  ;;  %v5838_v1 = vsel %vm1048_vm7, %v1029_v36, %v8096_v32  ;;  %v945_v27 = vrot.slane %v5783_v5, 1  ;;  %v982_v26 = vsel %vm963_vm6, %v943_v9, %v944_v59  ;;  %v946_v9 = vrot.slane %v5804_v50, 1 }
 0x150   : > { %8275 = vst [vmem:[#allocation52_spill] sm:$0xff] %v5838_v1  ;;  %v895_v60 = vsel %vm878_vm5, %v860_v16, %v861_v8  ;;  %v5853_v36 = vsel %vm793_vm4, %v775_v35, %v776_v56  ;;  %v1114_v2 = vrot.slane %v5720_v53, 3 }
 0x151   : > { %4181 = vrot.lane.b32.xlu0 %v8276_v43, %s4847_s29  ;;  %4176 = vrot.lane.b32.xlu1 %v5439_v4, %s4848_s30  ;;  %v559_v32 = vpop.f32.mrb[52].mxu0  ;;  %v5858_v61 = vpack.i.bf16 %v895_v60, %v896_v25  ;;  %v981_v10 = vsel %vm963_vm6, %v944_v59, %v945_v27  ;;  %v980_v35 = vsel %vm963_vm6, %v945_v27, %v946_v9  ;;  %v1115_v25 = vrot.slane %v5783_v5, 3 }
 0x152   : > { %v5864_v43 = vmax.f32 %v559_v32, 0.0  ;;  %v3812_v16 = vpop.f32.mrb[53].mxu0  ;;  %v5866_v54 = vpack.i.bf16 %v981_v10, %v982_v26  ;;  %v1116_v60 = vrot.slane %v5804_v50, 3  ;;  %v8279_v32 = vpack.i.bf16 %v5443_v42, %v5424_v39 }
 0x153   : > { %v562_v20 = vpop.f32.mrb[54].mxu0  ;;  %v8280_v59 = vpack.i.bf16 %v5459_v29, %v5447_v45  ;;  %v5889_v1 = vsel %vm1133_vm8, %v1114_v2, %v1115_v25  ;;  %v8282_v42 = vrot.slane %v5704_v57, 3 }
 0x154   : > { %8277 = vst [vmem:[#allocation53_spill] sm:$0xff] %v5864_v43  ;;  %8278 = vst [vmem:[#allocation54_spill] sm:$0xff] %v5866_v54  ;;  %v5882_v27 = vmax.f32 %v562_v20, 0.0  ;;  %v3813_v26 = vpop.f32.mrb[55].mxu0  ;;  %v777_v10 = vrot.slane %v5864_v43, 6  ;;  %v862_v16 = vrot.slane %v5864_v43, 7  ;;  %v5900_v29 = vsel %vm1133_vm8, %v1115_v25, %v1116_v60 }
 0x155   : > { %4186 = vrot.lane.b32.xlu1 %v8279_v32, %s4849_s5  ;;  %4196 = vrot.lane.b32.xlu0 %v8280_v59, %s4843_s25  ;;  %v8104_v54 = vrot.slane %v5864_v43, 1  ;;  %8281 = vst [vmem:[#allocation55_spill] sm:$0xff] %v5889_v1  ;;  %v5895_v39 = vsel %vm1133_vm8, %v8282_v42, %v1114_v2  ;;  %v8103_v45 = vrot.slane %v5864_v43, 3  ;;  %8284 = vst [vmem:[#allocation57_spill] sm:$0xff] %v5900_v29 }
 0x156   : > { %8283 = vst [vmem:[#allocation56_spill] sm:$0xff] %v5895_v39  ;;  %v778_v20 = vrot.slane %v5882_v27, 6  ;;  %v5905_v32 = vsel %vm793_vm4, %v776_v56, %v777_v10  ;;  %v863_v59 = vrot.slane %v5882_v27, 7  ;;  %v894_v26 = vsel %vm878_vm5, %v861_v8, %v862_v16 }
 0x157   : > { %v979_v2 = vsel %vm963_vm6, %v946_v9, %v8104_v54  ;;  %v5920_v42 = vsel %vm1133_vm8, %v1116_v60, %v8103_v45  ;;  %v8286_v56 = vrot.slane %v5415_v51, 5  ;;  %v681_v51 = vrot.slane %v5494_v33, 5 }
 0x158   : > { %8285 = vst [vmem:[#allocation58_spill] sm:$0xff] %v5920_v42  ;;  %v5934_v8 = vsel %vm793_vm4, %v777_v10, %v778_v20  ;;  %v893_v9 = vsel %vm878_vm5, %v862_v16, %v863_v59  ;;  %v5938_v60 = vpack.i.bf16 %v979_v2, %v980_v35  ;;  %v682_v35 = vrot.slane %v5548_v38, 5 }
 0x159   : > { %v5926_v31 = vsel %vm708_vm9, %v8286_v56, %v680_v63  ;;  %4191 = vrot.lane.b32.xlu1 %v5439_v4, %s4846_s28  ;;  %4211 = vrot.lane.b32.xlu0 %v5514_v12, %s4848_s30  ;;  %v567_v25 = vpop.f32.mrb[56].mxu0  ;;  %v5943_v45 = vpack.i.bf16 %v893_v9, %v894_v26  ;;  %v683_v16 = vrot.slane %v5571_v47, 5  ;;  %v1031_v39 = vrot.slane %v5804_v50, 2 }
 0x15a   : > { %8287 = vst [vmem:[#allocation59_spill] sm:$0xff] %v5926_v31  ;;  %8288 = vst [vmem:[#allocation60_spill] sm:$0xff] %v5938_v60  ;;  %v5947_v54 = vmax.f32 %v567_v25, 0.0  ;;  %v3816_v10 = vpop.f32.mrb[57].mxu0  ;;  %v5951_v31 = vsel %vm708_vm9, %v680_v63, %v681_v51  ;;  %v1032_v26 = vrot.slane %v5864_v43, 2  ;;  %v1033_v9 = vrot.slane %v5882_v27, 2 }
 0x15b   : > { %8290 = vst [vmem:[#allocation62_spill] sm:$0xff] %v5951_v31  ;;  %v570_v2 = vpop.f32.mrb[58].mxu0  ;;  %v8291_v25 = vpack.i.bf16 %v5510_v19, %v5485_v41  ;;  %v5970_v31 = vsel %vm708_vm9, %v681_v51, %v682_v35  ;;  %v5974_v29 = vsel %vm708_vm9, %v682_v35, %v683_v16  ;;  %v8295_v41 = vrot.slane %v5783_v5, 2 }
 0x15c   : > { %8289 = vst [vmem:[#allocation61_spill] sm:$0xff] %v5947_v54  ;;  %v5964_v63 = vmax.f32 %v570_v2, 0.0  ;;  %v3817_v10 = vpop.f32.mrb[59].mxu0  ;;  %v864_v4 = vrot.slane %v5947_v54, 7  ;;  %v779_v56 = vrot.slane %v5947_v54, 6  ;;  %8292 = vst [vmem:[#allocation63_spill] sm:$0xff] %v5970_v31  ;;  %v5978_v42 = vsel %vm1048_vm7, %v1031_v39, %v1032_v26 }
 0x15d   : > { %4201 = vrot.lane.b32.xlu1 %v5497_v18, %s4844_s26  ;;  %4221 = vrot.lane.b32.xlu0 %v8291_v25, %s4849_s5  ;;  %8293 = vst [vmem:[#allocation64_spill] sm:$0xff] %v5974_v29  ;;  %8294 = vst [vmem:[#allocation65_spill] sm:$0xff] %v5978_v42  ;;  %v5984_v19 = vsel %vm1048_vm7, %v8295_v41, %v1031_v39  ;;  %v8108_v2 = vrot.slane %v5947_v54, 2  ;;  %v6005_v41 = vsel %vm1048_vm7, %v1032_v26, %v1033_v9 }
 0x15e   : > { %8296 = vst [vmem:[#allocation66_spill] sm:$0xff] %v5984_v19  ;;  %v865_v25 = vrot.slane %v5964_v63, 7  ;;  %v892_v51 = vsel %vm878_vm5, %v863_v59, %v864_v4  ;;  %v780_v35 = vrot.slane %v5964_v63, 6  ;;  %v5993_v10 = vsel %vm793_vm4, %v778_v20, %v779_v56  ;;  %8298 = vst [vmem:[#allocation68_spill] sm:$0xff] %v6005_v41 }
 0x15f   : > { %v6001_v39 = vsel %vm1048_vm7, %v1033_v9, %v8108_v2  ;;  %v948_v9 = vrot.slane %v5882_v27, 1  ;;  %v8299_v42 = vrot.slane %v5864_v43, 1  ;;  %v684_v41 = vrot.slane %v5626_v49, 5 }
 0x160   : > { %8297 = vst [vmem:[#allocation67_spill] sm:$0xff] %v6001_v39  ;;  %v891_v20 = vsel %vm878_vm5, %v864_v4, %v865_v25  ;;  %v6017_v29 = vsel %vm793_vm4, %v779_v56, %v780_v35  ;;  %v949_v56 = vrot.slane %v5947_v54, 1  ;;  %v692_v12 = vrot.slane %v5947_v54, 5 }
 0x161   : > { %4206 = vrot.lane.b32.xlu1 %v5497_v18, %s4845_s27  ;;  %4231 = vrot.lane.b32.xlu0 %v5539_v11, %s4844_s26  ;;  %v575_v2 = vpop.f32.mrb[60].mxu0  ;;  %v6022_v59 = vpack.i.bf16 %v891_v20, %v892_v51  ;;  %v978_v26 = vsel %vm963_vm6, %v8299_v42, %v948_v9  ;;  %v685_v20 = vrot.slane %v5649_v34, 5  ;;  %v686_v18 = vrot.slane %v5704_v57, 5 }
 0x162   : > { %v6028_v19 = vmax.f32 %v575_v2, 0.0  ;;  %v3820_v4 = vpop.f32.mrb[61].mxu0  ;;  %v950_v2 = vrot.slane %v5964_v63, 1  ;;  %v977_v39 = vsel %vm963_vm6, %v948_v9, %v949_v56  ;;  %v6056_v49 = vsel %vm708_vm9, %v683_v16, %v684_v41 }
 0x163   : > { %v578_v51 = vpop.f32.mrb[62].mxu0  ;;  %v8300_v4 = vpack.i.bf16 %v5522_v13, %v5504_v46  ;;  %v6052_v57 = vpack.i.bf16 %v977_v39, %v978_v26  ;;  %8302 = vst [vmem:[#allocation70_spill] sm:$0xff] %v6056_v49  ;;  %v6060_v13 = vsel %vm708_vm9, %v684_v41, %v685_v20  ;;  %v8305_v26 = vrot.slane %v5720_v53, 5 }
 0x164   : > { %v6046_v42 = vmax.f32 %v578_v51, 0.0  ;;  %v3821_v31 = vpop.f32.mrb[63].mxu0  ;;  %v781_v1 = vrot.slane %v6028_v19, 6  ;;  %v866_v60 = vrot.slane %v6028_v19, 7  ;;  %8303 = vst [vmem:[#allocation71_spill] sm:$0xff] %v6060_v13  ;;  %v976_v51 = vsel %vm963_vm6, %v949_v56, %v950_v2 }
 0x165   : > { %4216 = vrot.lane.b32.xlu1 %v8300_v4, %s4847_s29  ;;  %4236 = vrot.lane.b32.xlu0 %v5539_v11, %s4845_s27  ;;  %8301 = vst [vmem:[#allocation69_spill] sm:$0xff] %v6052_v57  ;;  %v6064_v11 = vsel %vm708_vm9, %v685_v20, %v686_v18  ;;  %v6078_v41 = vsel %vm708_vm9, %v686_v18, %v8305_v26  ;;  %v1118_v20 = vrot.slane %v5882_v27, 3  ;;  %v1119_v56 = vrot.slane %v5947_v54, 3 }
 0x166   : > { %8304 = vst [vmem:[#allocation72_spill] sm:$0xff] %v6064_v11  ;;  %v782_v46 = vrot.slane %v6046_v42, 6  ;;  %v6069_v31 = vsel %vm793_vm4, %v780_v35, %v781_v1  ;;  %v867_v39 = vrot.slane %v6046_v42, 7  ;;  %v890_v16 = vsel %vm878_vm5, %v865_v25, %v866_v60  ;;  %8306 = vst [vmem:[#allocation73_spill] sm:$0xff] %v6078_v41 }
 0x167   : > { %v8307_v35 = vpack.i.bf16 %v5552_v40, %v5537_v22  ;;  %v8308_v25 = vpack.i.bf16 %v5613_v6, %v5590_v44  ;;  %v1120_v26 = vrot.slane %v5964_v63, 3  ;;  %v8309_v44 = vrot.slane %v6028_v19, 1 }
 0x168   : > { %v6094_v18 = vsel %vm793_vm4, %v781_v1, %v782_v46  ;;  %v889_v4 = vsel %vm878_vm5, %v866_v60, %v867_v39  ;;  %v6116_v41 = vsel %vm1133_vm8, %v1118_v20, %v1119_v56  ;;  %v8314_v40 = vrot.slane %v5864_v43, 3 }
 0x169   : > { %4226 = vrot.lane.b32.xlu1 %v8307_v35, %s4843_s25  ;;  %4241 = vrot.lane.b32.xlu0 %v8308_v25, %s4843_s25  ;;  %v583_v9 = vpop.f32.mrb[64].mxu0  ;;  %v6102_v22 = vpack.i.bf16 %v889_v4, %v890_v16  ;;  %v975_v6 = vsel %vm963_vm6, %v950_v2, %v8309_v44  ;;  %8313 = vst [vmem:[#allocation77_spill] sm:$0xff] %v6116_v41  ;;  %v1035_v2 = vrot.slane %v5964_v63, 2 }
 0x16a   : > { %v6108_v1 = vpop.permute.xlu1 %3966  ;;  %v6110_v35 = vmax.f32 %v583_v9, 0.0  ;;  %v3824_v60 = vpop.f32.mrb[65].mxu0  ;;  %v6112_v25 = vpack.i.bf16 %v975_v6, %v976_v51  ;;  %v6122_v16 = vsel %vm1133_vm8, %v8314_v40, %v1118_v20  ;;  %v8117_v9 = vrot.slane %v6028_v19, 3 }
 0x16b   : > { %8310 = vst [vmem:[#allocation74_spill] sm:$0xff] %v6108_v1  ;;  %8315 = vst [vmem:[#allocation78_spill] sm:$0xff] %v6122_v16  ;;  %v586_v4 = vpop.f32.mrb[66].mxu0  ;;  %v6137_v40 = vsel %vm1133_vm8, %v1119_v56, %v1120_v26  ;;  %v8324_v16 = vrot.slane %v5720_v53, 5 }
 0x16c   : > { %8311 = vst [vmem:[#allocation75_spill] sm:$0xff] %v6110_v35  ;;  %8312 = vst [vmem:[#allocation76_spill] sm:$0xff] %v6112_v25  ;;  %v6131_v51 = vmax.f32 %v586_v4, 0.0  ;;  %v3825_v44 = vpop.f32.mrb[67].mxu0  ;;  %v868_v6 = vrot.slane %v6110_v35, 7  ;;  %v783_v20 = vrot.slane %v6110_v35, 6  ;;  %v6143_v60 = vsel %vm1133_vm8, %v1120_v26, %v8117_v9 }
 0x16d   : > { %4246 = vrot.lane.b32.xlu1 %v5622_v15, %s4844_s26  ;;  %4261 = vrot.lane.b32.xlu0 %v5698_v48, %s4844_s26  ;;  %8317 = vst [vmem:[#allocation80_spill] sm:$0xff] %v6137_v40  ;;  %8318 = vst [vmem:[#allocation81_spill] sm:$0xff] %v6143_v60  ;;  %v688_v26 = vrot.slane %v5783_v5, 5  ;;  %v8322_v60 = vrot.slane %v6028_v19, 2 }
 0x16e   : > { %8316 = vst [vmem:[#allocation79_spill] sm:$0xff] %v6131_v51  ;;  %v6146_v11 = vpop.permute.xlu1 %3971  ;;  %v869_v4 = vrot.slane %v6131_v51, 7  ;;  %v888_v44 = vsel %vm878_vm5, %v867_v39, %v868_v6  ;;  %v784_v13 = vrot.slane %v6131_v51, 6  ;;  %v6154_v56 = vsel %vm793_vm4, %v782_v46, %v783_v20 }
 0x16f   : > { %v8319_v46 = vrot.slane %v5947_v54, 2 }
 0x170   : > { %v887_v39 = vsel %vm878_vm5, %v868_v6, %v869_v4  ;;  %v6167_v9 = vsel %vm793_vm4, %v783_v20, %v784_v13  ;;  %v8327_v20 = vpack.i.bf16 %v5770_v21, %v5743_v37 }
 0x171   : > { %4251 = vrot.lane.b32.xlu1 %v5622_v15, %s4845_s27  ;;  %4266 = vrot.lane.b32.xlu0 %v5698_v48, %s4845_s27  ;;  %v6173_v49 = vsel %vm1048_vm7, %v8319_v46, %v1035_v2  ;;  %v591_v1 = vpop.f32.mrb[68].mxu0  ;;  %v6176_v15 = vpack.i.bf16 %v887_v39, %v888_v44  ;;  %v6190_v46 = vsel %vm1048_vm7, %v1035_v2, %v8322_v60 }
 0x172   : > { %8320 = vst [vmem:[#allocation82_spill] sm:$0xff] %v6173_v49  ;;  %v6178_v40 = vpop.permute.xlu1 %3976  ;;  %v6180_v48 = vpop.permute.xlu0 %3986  ;;  %v6182_v6 = vmax.f32 %v591_v1, 0.0  ;;  %8323 = vst [vmem:[#allocation84_spill] sm:$0xff] %v6190_v46  ;;  %v6196_v44 = vsel %vm708_vm9, %v8324_v16, %v688_v26  ;;  %v8326_v1 = vpack.i.bf16 %v5693_v3, %v5668_v14  ;;  %v690_v14 = vrot.slane %v5864_v43, 5 }
 0x173   : > { %8325 = vst [vmem:[#allocation85_spill] sm:$0xff] %v6196_v44  ;;  %v3828_v39 = vpop.f32.mrb[69].mxu0 }
 0x174   : > { %8321 = vst [vmem:[#allocation83_spill] sm:$0xff] %v6182_v6  ;;  %v594_v41 = vpop.f32.mrb[70].mxu0  ;;  %v785_v2 = vrot.slane %v6182_v6, 6  ;;  %v870_v60 = vrot.slane %v6182_v6, 7  ;;  %v689_v39 = vrot.slane %v5804_v50, 5  ;;  %v8351_v23 = vrot.slane %v6182_v6, 1 }
 0x175   : > { %4256 = vrot.lane.b32.xlu1 %v8326_v1, %s4843_s25  ;;  %4271 = vrot.lane.b32.xlu0 %v8327_v20, %s4843_s25  ;;  %v6211_v44 = vmax.f32 %v594_v41, 0.0  ;;  %v3829_v25 = vpop.f32.mrb[71].mxu0  ;;  %v8128_v41 = vrot.slane %v5882_v27, 5 }
 0x176   : > { %v6214_v3 = vpop.permute.xlu1 %3981  ;;  %v6216_v1 = vpop.permute.xlu0 %3991  ;;  %v6220_v37 = vsel %vm793_vm4, %v784_v13, %v785_v2  ;;  %v886_v21 = vsel %vm878_vm5, %v869_v4, %v870_v60  ;;  %v6226_v20 = vsel %vm708_vm9, %v688_v26, %v689_v39  ;;  %v6237_v16 = vsel %vm708_vm9, %v689_v39, %v690_v14 }
 0x177   : > { %8328 = vst [vmem:[#allocation86_spill] sm:$0xff] %v6211_v44  ;;  %8329 = vst [vmem:[#allocation87_spill] sm:$0xff] %v6214_v3  ;;  %v786_v25 = vrot.slane %v6211_v44, 6  ;;  %v871_v13 = vrot.slane %v6211_v44, 7  ;;  %v6243_v4 = vsel %vm708_vm9, %v690_v14, %v8128_v41 }
 0x178   : > { %8330 = vst [vmem:[#allocation88_spill] sm:$0xff] %v6216_v1  ;;  %8331 = vst [vmem:[#allocation89_spill] sm:$0xff] %v6226_v20  ;;  %v1037_v1 = vrot.slane %v6046_v42, 2 }
 0x179   : > { %4276 = vrot.lane.b32.xlu1 %v5779_v62, %s4844_s26  ;;  %4291 = vrot.lane.b32.xlu0 %v5858_v61, %s4844_s26  ;;  %8332 = vst [vmem:[#allocation90_spill] sm:$0xff] %v6237_v16  ;;  %8333 = vst [vmem:[#allocation91_spill] sm:$0xff] %v6243_v4  ;;  %v599_v26 = vpop.f32.mrb[72].mxu0  ;;  %v6258_v16 = vsel %vm793_vm4, %v785_v2, %v786_v25  ;;  %v885_v14 = vsel %vm878_vm5, %v870_v60, %v871_v13 }
 0x17a   : > { %v6250_v49 = vpop.permute.xlu0 %4001  ;;  %v6252_v46 = vpop.permute.xlu1 %3996  ;;  %v6254_v39 = vmax.f32 %v599_v26, 0.0  ;;  %v6269_v3 = vpack.i.bf16 %v885_v14, %v886_v21  ;;  %v8339_v14 = vpack.i.bf16 %v5934_v8, %v5905_v32  ;;  %v952_v32 = vrot.slane %v6046_v42, 1 }
 0x17b   : > { %v3832_v4 = vpop.f32.mrb[73].mxu0  ;;  %v953_v8 = vrot.slane %v6110_v35, 1 }
 0x17c   : > { %8334 = vst [vmem:[#allocation92_spill] sm:$0xff] %v6254_v39  ;;  %v602_v20 = vpop.f32.mrb[74].mxu0  ;;  %8335 = vst [vmem:[#allocation93_spill] sm:$0xff] %v6269_v3  ;;  %v872_v2 = vrot.slane %v6254_v39, 7  ;;  %v787_v41 = vrot.slane %v6254_v39, 6 }
 0x17d   : > { %4281 = vrot.lane.b32.xlu1 %v5779_v62, %s4845_s27  ;;  %4296 = vrot.lane.b32.xlu0 %v5858_v61, %s4845_s27  ;;  %v6272_v57 = vmax.f32 %v602_v20, 0.0  ;;  %v3833_v60 = vpop.f32.mrb[75].mxu0  ;;  %v8336_v61 = vrot.slane %v6110_v35, 2  ;;  %v8338_v20 = vpack.i.bf16 %v5853_v36, %v5830_v24  ;;  %v973_v53 = vsel %vm963_vm6, %v952_v32, %v953_v8 }
 0x17e   : > { %v6275_v4 = vpop.permute.xlu0 %4006  ;;  %v6277_v43 = vpop.permute.xlu1 %4011  ;;  %v884_v62 = vsel %vm878_vm5, %v871_v13, %v872_v2  ;;  %v6299_v26 = vsel %vm793_vm4, %v786_v25, %v787_v41 }
 0x17f   : > { %v6285_v21 = vsel %vm1048_vm7, %v1037_v1, %v8336_v61  ;;  %v873_v60 = vrot.slane %v6272_v57, 7  ;;  %v788_v13 = vrot.slane %v6272_v57, 6  ;;  %v8340_v61 = vrot.slane %v6028_v19, 2 }
 0x180   : > { %8337 = vst [vmem:[#allocation94_spill] sm:$0xff] %v6285_v21 }
 0x181   : > { %4286 = vrot.lane.b32.xlu1 %v8338_v20, %s4843_s25  ;;  %4301 = vrot.lane.b32.xlu0 %v8339_v14, %s4843_s25  ;;  %v6305_v5 = vsel %vm1048_vm7, %v8340_v61, %v1037_v1  ;;  %v607_v24 = vpop.f32.mrb[76].mxu0  ;;  %v883_v50 = vsel %vm878_vm5, %v872_v2, %v873_v60  ;;  %v667_v1 = vrot.slane %v5049_v58, 5 }
 0x182   : > { %8341 = vst [vmem:[#allocation95_spill] sm:$0xff] %v6305_v5  ;;  %v6311_v20 = vpop.permute.xlu0 %4021  ;;  %v6313_v14 = vpop.permute.xlu1 %4016  ;;  %v6315_v25 = vmax.f32 %v607_v24, 0.0  ;;  %v6324_v5 = vpack.i.bf16 %v883_v50, %v884_v62 }
 0x183   : > { %8342 = vst [vmem:[#allocation96_spill] sm:$0xff] %v6311_v20  ;;  %8343 = vst [vmem:[#allocation97_spill] sm:$0xff] %v6313_v14  ;;  %v3836_v61 = vpop.f32.mrb[77].mxu0  ;;  %v6328_v14 = vsel %vm793_vm4, %v787_v41, %v788_v13  ;;  %v8348_v41 = vrot.slane %v6028_v19, 1 }
 0x184   : > { %8344 = vst [vmem:[#allocation98_spill] sm:$0xff] %v6315_v25  ;;  %v610_v36 = vpop.f32.mrb[78].mxu0  ;;  %8345 = vst [vmem:[#allocation99_spill] sm:$0xff] %v6324_v5  ;;  %v789_v24 = vrot.slane %v6315_v25, 6  ;;  %v874_v21 = vrot.slane %v6315_v25, 7  ;;  %v8349_v61 = vrot.slane %v5047_v55, 5 }
 0x185   : > { %4306 = vrot.lane.b32.xlu1 %v5943_v45, %s4844_s26  ;;  %4321 = vrot.lane.b32.xlu0 %v6022_v59, %s4844_s26  ;;  %v6331_v20 = vmax.f32 %v610_v36, 0.0  ;;  %v3837_v2 = vpop.f32.mrb[79].mxu0  ;;  %v974_v62 = vsel %vm963_vm6, %v8348_v41, %v952_v32  ;;  %v954_v36 = vrot.slane %v6131_v51, 1  ;;  %v8354_v25 = vrot.slane %v5085_v17, 5 }
 0x186   : > { %v6338_v34 = vpop.permute.xlu1 %4026  ;;  %v6340_v50 = vpop.permute.xlu0 %4036  ;;  %v747_v38 = vsel %vm708_vm9, %v8349_v61, %v667_v1  ;;  %v6359_v2 = vpack.i.bf16 %v973_v53, %v974_v62  ;;  %v6363_v55 = vsel %vm793_vm4, %v788_v13, %v789_v24  ;;  %v882_v61 = vsel %vm878_vm5, %v873_v60, %v874_v21 }
 0x187   : > { %8346 = vst [vmem:[#allocation100_spill] sm:$0xff] %v6331_v20  ;;  %8347 = vst [vmem:[#allocation101_spill] sm:$0xff] %v6338_v34  ;;  %v3973_v34 = vunpack.i.l.bf16 %v6146_v11  ;;  %v790_v32 = vrot.slane %v6331_v20, 6  ;;  %v875_v41 = vrot.slane %v6331_v20, 7 }
 0x188   : > { %8350 = vst [vmem:[#allocation102_spill] sm:$0xff] %v6359_v2 }
 0x189   : > { %4311 = vrot.lane.b32.xlu1 %v5943_v45, %s4845_s27  ;;  %4326 = vrot.lane.b32.xlu0 %v6022_v59, %s4845_s27  ;;  %v615_v47 = vpop.f32.mrb[80].mxu0  ;;  %v971_v45 = vsel %vm963_vm6, %v954_v36, %v8351_v23  ;;  %v972_v59 = vsel %vm963_vm6, %v953_v8, %v954_v36  ;;  %v6381_v13 = vsel %vm793_vm4, %v789_v24, %v790_v32  ;;  %v3974_v23 = vunpack.i.h.bf16 %v6146_v11 }
 0x18a   : > { %v6373_v33 = vmax.f32 %v615_v47, 0.0  ;;  %v6375_v53 = vpop.permute.xlu1 %4031  ;;  %v6377_v62 = vpop.permute.xlu0 %4051  ;;  %v881_v60 = vsel %vm878_vm5, %v874_v21, %v875_v41  ;;  %v6385_v2 = vpack.i.bf16 %v971_v45, %v972_v59  ;;  %v746_v47 = vsel %vm708_vm9, %v667_v1, %v8354_v25 }
 0x18b   : > { %v3840_v8 = vpop.f32.mrb[81].mxu0  ;;  %v8151_v36 = vrot.slane %v5049_v58, 2  ;;  %v8355_v24 = vpack.i.bf16 %v6017_v29, %v5993_v10  ;;  %v8356_v21 = vpack.i.bf16 %v6094_v18, %v6069_v31  ;;  %v6403_v45 = vpack.i.bf16 %v881_v60, %v882_v61 }
 0x18c   : > { %8352 = vst [vmem:[#allocation103_spill] sm:$0xff] %v6373_v33  ;;  %8353 = vst [vmem:[#allocation104_spill] sm:$0xff] %v6385_v2  ;;  %v618_v20 = vpop.f32.mrb[82].mxu0  ;;  %v791_v25 = vrot.slane %v6373_v33, 6  ;;  %v3978_v1 = vunpack.i.l.bf16 %v6178_v40  ;;  %v876_v29 = vrot.slane %v6373_v33, 7  ;;  %v8359_v10 = vrot.slane %v5085_v17, 2 }
 0x18d   : > { %4316 = vrot.lane.b32.xlu1 %v8355_v24, %s4843_s25  ;;  %4331 = vrot.lane.b32.xlu0 %v8356_v21, %s4843_s25  ;;  %8357 = vst [vmem:[#allocation105_spill] sm:$0xff] %v6403_v45  ;;  %v6407_v59 = vmax.f32 %v618_v20, 0.0  ;;  %v3841_v8 = vpop.f32.mrb[83].mxu0  ;;  %v2441_v18 = vsel %vm2436_vm10, %v5068_v7, %v3973_v34  ;;  %v1122_v24 = vrot.slane %v6046_v42, 3  ;;  %v8157_v21 = vrot.slane %v6110_v35, 3 }
 0x18e   : > { %v6416_v31 = vsel %vm1048_vm7, %v8151_v36, %v8359_v10  ;;  %v6420_v61 = vpop.permute.xlu1 %4041  ;;  %v6422_v60 = vpop.permute.xlu0 %4056  ;;  %v6426_v20 = vsel %vm793_vm4, %v790_v32, %v791_v25  ;;  %v2442_v8 = vsel %vm2436_vm10, %v747_v38, %v3974_v23  ;;  %v3979_v10 = vunpack.i.h.bf16 %v6178_v40 }
 0x18f   : > { %8358 = vst [vmem:[#allocation106_spill] sm:$0xff] %v6407_v59  ;;  %8360 = vst [vmem:[#allocation107_spill] sm:$0xff] %v6416_v31  ;;  %v3989_v36 = vunpack.i.h.bf16 %v6180_v48  ;;  %v3998_v7 = vunpack.i.l.bf16 %v6252_v46  ;;  %v792_v34 = vrot.slane %v6407_v59, 6  ;;  %v877_v32 = vrot.slane %v6407_v59, 7 }
 0x190   : > { %v880_v11 = vsel %vm878_vm5, %v875_v41, %v876_v29  ;;  %v6446_v38 = vsel %vm1133_vm8, %v1122_v24, %v8157_v21  ;;  %v2484_v40 = vsel %vm2479_vm11, %v2441_v18, %v3978_v1  ;;  %v3988_v23 = vunpack.i.l.bf16 %v6180_v48 }
 0x191   : > { %4336 = vrot.lane.b32.xlu1 %v6102_v22, %s4844_s26  ;;  %4351 = vrot.lane.b32.xlu0 %v6176_v15, %s4844_s26  ;;  %v3999_v17 = vunpack.i.h.bf16 %v6252_v46  ;;  %v4008_v2 = vunpack.i.l.bf16 %v6275_v4  ;;  %v6458_v41 = vsel %vm793_vm4, %v791_v25, %v792_v34  ;;  %v879_v21 = vsel %vm878_vm5, %v876_v29, %v877_v32 }
 0x192   : > { %v6452_v31 = vpop.permute.xlu1 %4046  ;;  %v6454_v58 = vpop.permute.xlu0 %4066  ;;  %v8361_v59 = vrot.slane %v4989_v30, 6  ;;  %v8362_v46 = vrot.slane %v4989_v30, 7  ;;  %v4003_v18 = vunpack.i.l.bf16 %v6250_v49  ;;  %v2443_v33 = vsel %vm2436_vm10, %v746_v47, %v3998_v7 }
 0x193   : > { %v4009_v25 = vunpack.i.h.bf16 %v6275_v4  ;;  %v6482_v29 = vpack.i.bf16 %v879_v21, %v880_v11  ;;  %v4004_v47 = vunpack.i.h.bf16 %v6250_v49  ;;  %v8364_v4 = vld [vmem:[#allocation4_spill] sm:$0xff]  ;;  %v2527_v30 = vsel %vm2522_vm12, %v2484_v40, %v4008_v2 }
 0x194   : > { %v6466_v48 = vsel %vm793_vm4, %v792_v34, %v8361_v59  ;;  %v920_v1 = vsel %vm878_vm5, %v877_v32, %v8362_v46  ;;  %v693_v34 = vrot.slane %v5964_v63, 5  ;;  %v2485_v32 = vsel %vm2479_vm11, %v2442_v8, %v3979_v10  ;;  %v8365_v46 = vld [vmem:[#allocation5_spill] sm:$0xff] }
 0x195   : > { %4341 = vrot.lane.b32.xlu1 %v6102_v22, %s4845_s27  ;;  %4356 = vrot.lane.b32.xlu0 %v6176_v15, %s4845_s27  ;;  %8363 = vst [vmem:[#allocation108_spill] sm:$0xff] %v6482_v29  ;;  %v6490_v54 = vpack.i.bf16 %v8365_v46, %v920_v1  ;;  %v8367_v22 = vld [vmem:[#allocation16_spill] sm:$0xff]  ;;  %v8368_v8 = vrot.slane %v6028_v19, 3  ;;  %v2528_v10 = vsel %vm2522_vm12, %v2485_v32, %v4009_v25  ;;  %v4039_v1 = vunpack.i.h.bf16 %v6340_v50  ;;  %v4826_v32 = vld [vmem:[%s8057_s2] sm:$0xff]  }
 0x196   : > { %v2444_v15 = vsel %vm2436_vm10, %v8367_v22, %v3999_v17  ;;  %v6495_v11 = vpop.permute.xlu1 %4061  ;;  %v6497_v21 = vpop.permute.xlu0 %4071  ;;  %v4038_v46 = vunpack.i.l.bf16 %v6340_v50  ;;  %v6509_v17 = vsel %vm2479_vm11, %v2443_v33, %v4003_v18  ;;  %v8369_v2 = vpack.i.bf16 %v6167_v9, %v6154_v56  ;;  %3941 = vmatpush3.bf16.msra.mxu1 %v4826_v32  ;;  %3843 = vmatpush3.bf16.msra.mxu0 %v4826_v32 }
 0x197   : > { %8366 = vst [vmem:[#allocation4_spill] sm:$0xff] %v6490_v54  ;;  %v6503_v49 = vsel %vm1133_vm8, %v8368_v8, %v1122_v24  ;;  %v8370_v24 = vpack.i.bf16 %v6258_v16, %v6220_v37  ;;  %v8371_v25 = vrot.slane %v5882_v27, 5  ;;  %v6529_v50 = vsel %vm708_vm9, %v692_v12, %v693_v34 }
 0x198   : > { %v694_v9 = vrot.slane %v6028_v19, 5  ;;  %v2570_v37 = vsel %vm2565_vm13, %v2527_v30, %v3988_v23  ;;  %v2487_v18 = vsel %vm2479_vm11, %v2444_v15, %v4004_v47  ;;  %v8166_v30 = vrot.slane %v6182_v6, 3  ;;  %v8372_v23 = vld [vmem:[#allocation17_spill] sm:$0xff]  ;;  %v8373_v15 = vld [vmem:[#allocation18_spill] sm:$0xff] }
 0x199   : > { %4346 = vrot.lane.b32.xlu1 %v8369_v2, %s4843_s25  ;;  %4361 = vrot.lane.b32.xlu0 %v8370_v24, %s4843_s25  ;;  %v6525_v33 = vsel %vm708_vm9, %v8371_v25, %v692_v12  ;;  %v8167_v2 = vrot.slane %v6046_v42, 5  ;;  %v1124_v24 = vrot.slane %v6131_v51, 3  ;;  %v2445_v47 = vsel %vm2436_vm10, %v8372_v23, %v4038_v46 }
 0x19a   : > { %v6539_v22 = vpop.permute.xlu0 %4081  ;;  %v6545_v12 = vsel %vm708_vm9, %v693_v34, %v694_v9  ;;  %v2446_v25 = vsel %vm2436_vm10, %v8373_v15, %v4039_v1  ;;  %v2571_v40 = vsel %vm2565_vm13, %v2528_v10, %v3989_v36  ;;  %v4034_v7 = vunpack.i.h.bf16 %v6375_v53 }
 0x19b   : > { %v6541_v8 = vpop.permute.xlu1 %4076  ;;  %v6564_v34 = vsel %vm708_vm9, %v694_v9, %v8167_v2  ;;  %v6570_v36 = vsel %vm1133_vm8, %v1124_v24, %v8166_v30  ;;  %v8374_v10 = vrot.slane %v6110_v35, 3  ;;  %v1039_v46 = vrot.slane %v6131_v51, 2  ;;  %v4827_v30 = vld [vmem:[%s8057_s2 + $0x8] sm:$0xff]  }
 0x19c   : > { %v4033_v32 = vunpack.i.l.bf16 %v6375_v53  ;;  %v8375_v15 = vmov 0.0   ;;  %v1040_v53 = vrot.slane %v6182_v6, 2  ;;  %v4044_v9 = vunpack.i.h.bf16 %v6420_v61 }
 0x19d   : > { %4366 = vrot.lane.b32.xlu1 %v6269_v3, %s4844_s26  ;;  %4376 = vrot.lane.b32.xlu0 %v6324_v5, %s4844_s26  ;;  %v6576_v1 = vsel %vm1133_vm8, %v8374_v10, %v1124_v24  ;;  %v4043_v24 = vunpack.i.l.bf16 %v6420_v61  ;;  %v4059_v23 = vunpack.i.h.bf16 %v6422_v60  ;;  %v4049_v2 = vunpack.i.h.bf16 %v6452_v31 }
 0x19e   : > { %3937 = vmatprep.subr.bf16.mxu1 %v8375_v15  ;;  %v6589_v10 = vpop.permute.xlu0 %4086  ;;  %3844 = vmatprep.subr.bf16.mxu0 %v8375_v15  ;;  %v4048_v59 = vunpack.i.l.bf16 %v6452_v31  ;;  %v8376_v56 = vpack.i.bf16 %v6328_v14, %v6299_v26  ;;  %v8377_v5 = vpack.i.bf16 %v6381_v13, %v6363_v55  ;;  %v6609_v61 = vsel %vm1048_vm7, %v1039_v46, %v1040_v53 }
 0x19f   : > { %v6591_v16 = vpop.permute.xlu1 %4091  ;;  %3942 = vmatpush3.bf16.msra.mxu1 %v4827_v30  ;;  %3845 = vmatpush3.bf16.msra.mxu0 %v4827_v30  ;;  %v8378_v3 = vrot.slane %v6110_v35, 2  ;;  %v1041_v30 = vrot.slane %v6211_v44, 2  ;;  %v2614_v14 = vsel %vm2608_vm14, %v2571_v40, %v4034_v7  ;;  %v2613_v13 = vsel %vm2608_vm14, %v2570_v37, %v4033_v32 }
 0x1a0   : > { %3938 = vmatprep.subr.bf16.mxu1 %v8375_v15  ;;  %v8379_v7 = vrot.slane %v6254_v39, 2  ;;  %3846 = vmatprep.subr.bf16.mxu0 %v8375_v15  ;;  %v6646_v37 = vsel %vm2479_vm11, %v2446_v25, %v4044_v9  ;;  %v2530_v32 = vsel %vm2522_vm12, %v2487_v18, %v4049_v2  ;;  %v696_v25 = vrot.slane %v6110_v35, 5 }
 0x1a1   : > { %4371 = vrot.lane.b32.xlu1 %v8376_v56, %s4843_s25  ;;  %4381 = vrot.lane.b32.xlu0 %v8377_v5, %s4843_s25  ;;  %v6615_v31 = vsel %vm1048_vm7, %v8378_v3, %v1039_v46  ;;  %v4058_v56 = vunpack.i.l.bf16 %v6422_v60  ;;  %v6628_v3 = vsel %vm2479_vm11, %v2445_v47, %v4043_v24  ;;  %v6642_v40 = vsel %vm1048_vm7, %v1040_v53, %v1041_v30 }
 0x1a2   : > { %v6638_v60 = vsel %vm1048_vm7, %v1041_v30, %v8379_v7  ;;  %v2657_v47 = vsel %vm2651_vm15, %v2614_v14, %v4059_v23  ;;  %v2529_v24 = vsel %vm2522_vm12, %v6509_v17, %v4048_v59  ;;  %v8380_v53 = vpack.i.bf16 %v6458_v41, %v6426_v20  ;;  %v4828_v59 = vld [vmem:[%s8057_s2 + $0x10] sm:$0xff]  }
 0x1a3   : > { %v6630_v46 = vpop.permute.xlu0 %4101  ;;  %v6632_v26 = vpop.permute.xlu1 %4096  ;;  %v697_v23 = vrot.slane %v6131_v51, 5  ;;  %v698_v18 = vrot.slane %v6182_v6, 5  ;;  %v2656_v17 = vsel %vm2651_vm15, %v2613_v13, %v4058_v56  ;;  %v4063_v2 = vunpack.i.l.bf16 %v6495_v11  ;;  %3943 = vmatpush3.bf16.msra.mxu1 %v4828_v59  ;;  %v4829_v13 = vld [vmem:[%s8057_s2 + $0x18] sm:$0xff]   ;;  %3847 = vmatpush3.bf16.msra.mxu0 %v4828_v59 }
 0x1a4   : > { %v699_v20 = vrot.slane %v6211_v44, 5  ;;  %v956_v41 = vrot.slane %v6211_v44, 1  ;;  %v8381_v5 = vrot.slane %v6046_v42, 5  ;;  %v4064_v55 = vunpack.i.h.bf16 %v6495_v11  ;;  %3939 = vmatprep.subr.bf16.mxu1 %v8375_v15  ;;  %3848 = vmatprep.subr.bf16.mxu0 %v8375_v15 }
 0x1a5   : > { %4386 = vrot.lane.b32.xlu1 %v6403_v45, %s4844_s26  ;;  %4391 = vrot.lane.b32.xlu0 %v8380_v53, %s4843_s25  ;;  %v6684_v56 = vsel %vm708_vm9, %v696_v25, %v697_v23  ;;  %v8384_v9 = vunpack.i.l.bf16 %v6277_v43  ;;  %v8385_v45 = vunpack.i.h.bf16 %v6277_v43  ;;  %v8386_v11 = vpack.i.bf16 %v8364_v4, %v6466_v48 }
 0x1a6   : > { %v6680_v30 = vsel %vm708_vm9, %v8381_v5, %v696_v25  ;;  %8383 = vst [vmem:[#allocation16_spill] sm:$0xff] %v6684_v56  ;;  %v6710_v43 = vsel %vm708_vm9, %v698_v18, %v699_v20  ;;  %v6718_v59 = vsel %vm2694_vm0, %v2656_v17, %v4063_v2  ;;  %v4074_v48 = vunpack.i.h.bf16 %v6497_v21 }
 0x1a7   : > { %v6672_v7 = vpop.permute.xlu1 %4106  ;;  %v6674_v53 = vpop.permute.xlu0 %4116  ;;  %8382 = vst [vmem:[#allocation5_spill] sm:$0xff] %v6680_v30  ;;  %v2572_v14 = vsel %vm2565_vm13, %v2529_v24, %v8384_v9  ;;  %v2573_v5 = vsel %vm2565_vm13, %v2530_v32, %v8385_v45  ;;  %v4078_v30 = vunpack.i.l.bf16 %v6541_v8  ;;  %v6706_v24 = vsel %vm708_vm9, %v697_v23, %v698_v18  ;;  %8388 = vst [vmem:[#allocation18_spill] sm:$0xff] %v6710_v43  ;;  %v8390_v43 = vld [vmem:[#allocation20_spill] sm:$0xff] }
 0x1a8   : > { %8387 = vst [vmem:[#allocation17_spill] sm:$0xff] %v6706_v24  ;;  %v8172_v45 = vrot.slane %v6254_v39, 1  ;;  %v8389_v32 = vrot.slane %v6182_v6, 1  ;;  %v4073_v4 = vunpack.i.l.bf16 %v6497_v21  ;;  %v4079_v23 = vunpack.i.h.bf16 %v6541_v8  ;;  %3944 = vmatpush3.bf16.msra.mxu1 %v4829_v13  ;;  %3849 = vmatpush3.bf16.msra.mxu0 %v4829_v13 }
 0x1a9   : > { %4401 = vrot.lane.b32.xlu1 %v6482_v29, %s4844_s26  ;;  %4396 = vrot.lane.b32.xlu0 %v8386_v11, %s4843_s25  ;;  %v1126_v17 = vrot.slane %v6211_v44, 3  ;;  %v8173_v2 = vrot.slane %v6254_v39, 3  ;;  %v6736_v21 = vsel %vm2694_vm0, %v2657_v47, %v4064_v55  ;;  %v4084_v8 = vunpack.i.h.bf16 %v6539_v22  ;;  %v8393_v47 = vld [vmem:[#allocation23_spill] sm:$0xff] }
 0x1aa   : > { %v970_v25 = vsel %vm963_vm6, %v8389_v32, %v956_v41  ;;  %v969_v11 = vsel %vm963_vm6, %v956_v41, %v8172_v45  ;;  %v700_v32 = vrot.slane %v6254_v39, 5  ;;  %v4083_v29 = vunpack.i.l.bf16 %v6539_v22  ;;  %3940 = vmatprep.subr.bf16.mxu1 %v8375_v15  ;;  %3850 = vmatprep.subr.bf16.mxu0 %v8375_v15 }
 0x1ab   : > { %v6724_v18 = vpop.permute.xlu1 %4111  ;;  %v6726_v9 = vpop.permute.xlu0 %4131  ;;  %v2447_v24 = vsel %vm2436_vm10, %v8390_v43, %v4078_v30  ;;  %v6747_v41 = vpack.i.bf16 %v969_v11, %v970_v25  ;;  %v6753_v55 = vsel %vm1133_vm8, %v1126_v17, %v8173_v2  ;;  %v2448_v30 = vsel %vm2436_vm10, %v8393_v47, %v4079_v23  ;;  %v8401_v47 = vld [vmem:[#allocation22_spill] sm:$0xff] }
 0x1ac   : > { %8392 = vst [vmem:[#allocation109_spill] sm:$0xff] %v6753_v55  ;;  %v4089_v13 = vunpack.i.h.bf16 %v6589_v10  ;;  %v8394_v43 = vrot.slane %v6182_v6, 3  ;;  %v6767_v25 = vsel %vm708_vm9, %v699_v20, %v700_v32  ;;  %v2616_v11 = vsel %vm2608_vm14, %v2573_v5, %v4074_v48  ;;  %v8399_v48 = vld [vmem:[#allocation28_spill] sm:$0xff] }
 0x1ad   : > { %4416 = vrot.lane.b32.xlu1 %v5617_v52, %s4848_s30  ;;  %4406 = vrot.lane.b32.xlu0 %v6490_v54, %s4844_s26  ;;  %8391 = vst [vmem:[#allocation20_spill] sm:$0xff] %v6747_v41  ;;  %8396 = vst [vmem:[#allocation110_spill] sm:$0xff] %v6767_v25  ;;  %v2615_v2 = vsel %vm2608_vm14, %v2572_v14, %v4073_v4  ;;  %v4088_v20 = vunpack.i.l.bf16 %v6589_v10  ;;  %v4099_v54 = vunpack.i.h.bf16 %v6632_v26  ;;  %v4098_v5 = vunpack.i.l.bf16 %v6632_v26  ;;  %v8402_v10 = vld [vmem:[#allocation100_spill] sm:$0xff]  ;;  %v8403_v26 = vld [vmem:[#allocation98_spill] sm:$0xff] }
 0x1ae   : > { %v6763_v45 = vsel %vm1133_vm8, %v8394_v43, %v1126_v17  ;;  %v8397_v17 = vrot.slane %v6272_v57, 5  ;;  %v6788_v14 = vsel %vm2479_vm11, %v2447_v24, %v4083_v29  ;;  %v8400_v4 = vpack.i.bf16 %v5601_v0, %v8399_v48  ;;  %v8407_v24 = vld [vmem:[#allocation103_spill] sm:$0xff] }
 0x1af   : > { %8395 = vst [vmem:[#allocation23_spill] sm:$0xff] %v6763_v45  ;;  %v6772_v22 = vpop.permute.xlu1 %4121  ;;  %v6774_v23 = vpop.permute.xlu0 %4136  ;;  %v1043_v15 = vrot.slane %v6272_v57, 2  ;;  %v2532_v29 = vsel %vm2522_vm12, %v6646_v37, %v4089_v13  ;;  %v4103_v48 = vunpack.i.l.bf16 %v6630_v46  ;;  %v704_v0 = vrot.slane %v8407_v24, 5 }
 0x1b0   : > { %v6782_v43 = vsel %vm708_vm9, %v700_v32, %v8397_v17  ;;  %v6797_v32 = vsel %vm2479_vm11, %v2448_v30, %v4084_v8  ;;  %v8405_v30 = vrot.slane %v6254_v39, 2  ;;  %v2531_v17 = vsel %vm2522_vm12, %v6628_v3, %v4088_v20 }
 0x1b1   : > { %8398 = vst [vmem:[#allocation111_spill] sm:$0xff] %v6782_v43  ;;  %4426 = vrot.lane.b32.xlu1 %v8400_v4, %s4849_s5  ;;  %4411 = vrot.lane.b32.xlu0 %v8401_v47, %s4846_s28  ;;  %v8177_v43 = vrot.slane %v8403_v26, 2  ;;  %v4104_v25 = vunpack.i.h.bf16 %v6630_v46  ;;  %v2659_v45 = vsel %vm2651_vm15, %v2616_v11, %v4099_v54  ;;  %v8411_v6 = vrot.slane %v8402_v10, 5  ;;  %v8413_v54 = vld [vmem:[#allocation106_spill] sm:$0xff] }
 0x1b2   : > { %v6821_v37 = vsel %vm1048_vm7, %v8405_v30, %v1043_v15  ;;  %v8409_v30 = vld [vmem:[#allocation31_spill] sm:$0xff]  ;;  %v705_v46 = vrot.slane %v8413_v54, 5  ;;  %v4108_v11 = vunpack.i.l.bf16 %v6672_v7  ;;  %v959_v20 = vrot.slane %v8403_v26, 1 }
 0x1b3   : > { %v6807_v4 = vpop.permute.xlu1 %4126  ;;  %v6809_v47 = vpop.permute.xlu0 %4146  ;;  %v6815_v8 = vsel %vm1048_vm7, %v1043_v15, %v8177_v43  ;;  %8406 = vst [vmem:[#allocation22_spill] sm:$0xff] %v6821_v37  ;;  %v2658_v43 = vsel %vm2651_vm15, %v2615_v2, %v4098_v5  ;;  %v8408_v15 = vld [vmem:[#allocation30_spill] sm:$0xff]  ;;  %v6843_v3 = vsel %vm708_vm9, %v8411_v6, %v704_v0  ;;  %v958_v2 = vrot.slane %v6272_v57, 1 }
 0x1b4   : > { %8404 = vst [vmem:[#allocation28_spill] sm:$0xff] %v6815_v8  ;;  %v8410_v55 = vpack.i.bf16 %v8408_v15, %v8409_v30  ;;  %8412 = vst [vmem:[#allocation100_spill] sm:$0xff] %v6843_v3  ;;  %v2701_v5 = vsel %vm2694_vm0, %v2658_v43, %v4103_v48  ;;  %v8414_v15 = vunpack.i.l.bf16 %v6377_v62  ;;  %v6861_v3 = vsel %vm708_vm9, %v704_v0, %v705_v46  ;;  %v8418_v8 = vld [vmem:[#allocation32_spill] sm:$0xff]  ;;  %v8420_v0 = vld [vmem:[#allocation21_spill] sm:$0xff] }
 0x1b5   : > { %4436 = vrot.lane.b32.xlu1 %v5617_v52, %s4846_s28  ;;  %v4109_v52 = vunpack.i.h.bf16 %v6672_v7  ;;  %8415 = vst [vmem:[#allocation98_spill] sm:$0xff] %v6861_v3  ;;  %v8416_v7 = vrot.slane %v6254_v39, 1  ;;  %v2702_v37 = vsel %vm2694_vm0, %v2659_v45, %v4104_v25  ;;  %v4119_v43 = vunpack.i.h.bf16 %v6674_v53  ;;  %v8421_v3 = vld [vmem:[#allocation19_spill] sm:$0xff]  ;;  %v8423_v45 = vld [vmem:[#allocation2_spill] sm:$0xff] }
 0x1b6   : > { %4421 = vrot.lane.b32.xlu0 %v8410_v55, %s4847_s29  ;;  %v1128_v55 = vrot.slane %v6272_v57, 3  ;;  %v2574_v30 = vsel %vm2565_vm13, %v2531_v17, %v8414_v15  ;;  %v4118_v48 = vunpack.i.l.bf16 %v6674_v53  ;;  %v4114_v17 = vunpack.i.h.bf16 %v6724_v18  ;;  %v8417_v15 = vld [vmem:[#allocation35_spill] sm:$0xff] }
 0x1b7   : > { %v6855_v6 = vpop.permute.xlu1 %4141  ;;  %v6857_v13 = vpop.permute.xlu0 %4151  ;;  %v968_v44 = vsel %vm963_vm6, %v8416_v7, %v958_v2  ;;  %v8419_v56 = vpack.i.bf16 %v8417_v15, %v8418_v8  ;;  %v8422_v41 = vpack.i.bf16 %v8420_v0, %v8421_v3  ;;  %v967_v7 = vsel %vm963_vm6, %v958_v2, %v959_v20 }
 0x1b8   : > { %v8424_v25 = vrot.slane %v8423_v45, 5  ;;  %v1129_v35 = vrot.slane %v8403_v26, 3  ;;  %v8426_v51 = vrot.slane %v6254_v39, 3  ;;  %v6895_v8 = vsel %vm2737_vm1, %v2701_v5, %v4108_v11 }
 0x1b9   : > { %4446 = vrot.lane.b32.xlu1 %v8419_v56, %s4847_s29  ;;  %8428 = vst [vmem:[#allocation31_spill] sm:$0xff] %v6895_v8  ;;  %v8430_v3 = vunpack.i.h.bf16 %v6377_v62  ;;  %v1045_v11 = vrot.slane %v8402_v10, 2  ;;  %v8434_v62 = vld [vmem:[#allocation27_spill] sm:$0xff]  ;;  %v4128_v5 = vunpack.i.l.bf16 %v6807_v4  ;;  %v8442_v39 = vrot.slane %v8407_v24, 2  ;;  %v8466_v8 = vld [vmem:[#allocation29_spill] sm:$0xff] }
 0x1ba   : > { %4431 = vrot.lane.b32.xlu0 %v8422_v41, %s4842_s24  ;;  %v6885_v53 = vsel %vm708_vm9, %v705_v46, %v8424_v25  ;;  %v6892_v56 = vsel %vm1133_vm8, %v8426_v51, %v1128_v55  ;;  %v6898_v41 = vsel %vm2737_vm1, %v2702_v37, %v4109_v52  ;;  %v4113_v46 = vunpack.i.l.bf16 %v6724_v18  ;;  %v8433_v37 = vld [vmem:[#allocation25_spill] sm:$0xff] }
 0x1bb   : > { %8425 = vst [vmem:[#allocation103_spill] sm:$0xff] %v6885_v53  ;;  %8427 = vst [vmem:[#allocation30_spill] sm:$0xff] %v6892_v56  ;;  %v2575_v2 = vsel %vm2565_vm13, %v2532_v29, %v8430_v3  ;;  %v6904_v15 = vpop.permute.xlu0 %4161  ;;  %v6906_v0 = vpop.permute.xlu1 %4156  ;;  %v6908_v25 = vpack.i.bf16 %v967_v7, %v968_v44  ;;  %v6912_v51 = vsel %vm1133_vm8, %v1128_v55, %v1129_v35  ;;  %v4139_v18 = vunpack.i.h.bf16 %v6774_v23  ;;  %v8435_v7 = vld [vmem:[#allocation26_spill] sm:$0xff]  ;;  %v8436_v55 = vld [vmem:[#allocation24_spill] sm:$0xff] }
 0x1bc   : > { %8429 = vst [vmem:[#allocation106_spill] sm:$0xff] %v6898_v41  ;;  %8431 = vst [vmem:[#allocation35_spill] sm:$0xff] %v6904_v15  ;;  %v6917_v52 = vsel %vm2436_vm10, %v8433_v37, %v4118_v48  ;;  %v6921_v29 = vsel %vm2436_vm10, %v8434_v62, %v4119_v43  ;;  %v2618_v44 = vsel %vm2608_vm14, %v2575_v2, %v4114_v17  ;;  %v8438_v53 = vld [vmem:[#allocation38_spill] sm:$0xff]  ;;  %v4138_v2 = vunpack.i.l.bf16 %v6774_v23  ;;  %v8446_v15 = vld [vmem:[#allocation41_spill] sm:$0xff] }
 0x1bd   : > { %8432 = vst [vmem:[#allocation32_spill] sm:$0xff] %v6912_v51  ;;  %v8437_v3 = vpack.i.bf16 %v8435_v7, %v8436_v55  ;;  %v4830_v17 = vld [vmem:[%s8057_s2 + $0x20] ss:$0 sps:$4 sm:$0xff]   ;;  %v4129_v62 = vunpack.i.h.bf16 %v6807_v4  ;;  %v8439_v7 = vrot.slane %v8403_v26, 2  ;;  %v2617_v48 = vsel %vm2608_vm14, %v2574_v30, %v4113_v46  ;;  %v8444_v46 = vld [vmem:[#allocation45_spill] sm:$0xff] }
 0x1be   : > { %4441 = vrot.lane.b32.xlu0 %v8438_v53, %s4848_s30  ;;  %v6958_v23 = vsel %vm1048_vm7, %v1045_v11, %v8442_v39  ;;  %v961_v4 = vrot.slane %v8407_v24, 1  ;;  %v2661_v51 = vsel %vm2651_vm15, %v2618_v44, %v4139_v18  ;;  %v2533_v30 = vsel %vm2522_vm12, %v6788_v14, %v4128_v5 }
 0x1bf   : > { %4456 = vrot.lane.b32.xlu1 %v8437_v3, %s4842_s24  ;;  %v6946_v55 = vsel %vm1048_vm7, %v8439_v7, %v1045_v11  ;;  %v960_v3 = vrot.slane %v8402_v10, 1  ;;  %v6950_v43 = vpop.permute.xlu0 %4166  ;;  %v6952_v37 = vpop.permute.xlu1 %4171  ;;  %8443 = vst [vmem:[#allocation2_spill] sm:$0xff] %v6958_v23  ;;  %v2910_v44 = vsel %vm2908_vm3, %v4830_v17, 0  ;;  %v2660_v14 = vsel %vm2651_vm15, %v2617_v48, %v4138_v2 }
 0x1c0   : > { %8440 = vst [vmem:[#allocation21_spill] sm:$0xff] %v6946_v55  ;;  %8441 = vst [vmem:[#allocation19_spill] sm:$0xff] %v6952_v37  ;;  %v8445_v37 = vld [vmem:[#allocation40_spill] sm:$0xff]  ;;  %v2534_v5 = vsel %vm2522_vm12, %v6797_v32, %v4129_v62  ;;  %3945 = vmatpush3.bf16.msra.mxu1 %v2910_v44  ;;  %v1130_v55 = vrot.slane %v8402_v10, 3  ;;  %v1131_v23 = vrot.slane %v8407_v24, 3  ;;  %3851 = vmatpush3.bf16.msra.mxu0 %v2910_v44  ;;  %v8449_v48 = vunpack.i.l.bf16 %v6591_v16 }
 0x1c1   : > { %v8447_v39 = vpack.i.bf16 %v8445_v37, %v8446_v15  ;;  %v965_v7 = vsel %vm963_vm6, %v960_v3, %v961_v4  ;;  %v966_v18 = vsel %vm963_vm6, %v959_v20, %v960_v3  ;;  %v4154_v15 = vunpack.i.h.bf16 %v6857_v13  ;;  %v8450_v3 = vld [vmem:[#allocation43_spill] sm:$0xff] }
 0x1c2   : > { %v6981_v56 = vpack.i.bf16 %v965_v7, %v966_v18  ;;  %v4153_v37 = vunpack.i.l.bf16 %v6857_v13  ;;  %v4149_v20 = vunpack.i.h.bf16 %v6809_v47  ;;  %v2576_v32 = vsel %vm2565_vm13, %v2533_v30, %v8449_v48  ;;  %v8451_v13 = vld [vmem:[#allocation42_spill] sm:$0xff] }
 0x1c3   : > { %4466 = vrot.lane.b32.xlu1 %v8444_v46, %s4848_s30  ;;  %4451 = vrot.lane.b32.xlu0 %v8447_v39, %s4849_s5  ;;  %v4182_v39 = vpop.permute.xlu0 %4181  ;;  %v4177_v11 = vpop.permute.xlu1 %4176  ;;  %v4148_v62 = vunpack.i.l.bf16 %v6809_v47  ;;  %v8452_v7 = vpack.i.bf16 %v8450_v3, %v8451_v13  ;;  %v7000_v18 = vsel %vm1133_vm8, %v1130_v55, %v1131_v23  ;;  %v7004_v44 = vsel %vm1133_vm8, %v1129_v35, %v1130_v55 }
 0x1c4   : > { %8448 = vst [vmem:[#allocation25_spill] sm:$0xff] %v6981_v56  ;;  %v4179_v17 = vunpack.i.h.bf16 %v4177_v11  ;;  %v4178_v2 = vunpack.i.l.bf16 %v4177_v11  ;;  %v4144_v47 = vunpack.i.h.bf16 %v6855_v6  ;;  %v4143_v11 = vunpack.i.l.bf16 %v6855_v6 }
 0x1c5   : > { %v8453_v48 = vunpack.i.h.bf16 %v6591_v16  ;;  %v8454_v30 = vunpack.i.l.bf16 %v6454_v58  ;;  %v8455_v16 = vunpack.i.h.bf16 %v6454_v58  ;;  %vm2844_vm4 = vcmask 588800  }
 0x1c7   : > { %4476 = vrot.lane.b32.xlu1 %v8452_v7, %s4849_s5  ;;  %4461 = vrot.lane.b32.xlu0 %v8438_v53, %s4846_s28  ;;  %v2577_v3 = vsel %vm2565_vm13, %v2534_v5, %v8453_v48  ;;  %v2619_v7 = vsel %vm2608_vm14, %v2576_v32, %v4153_v37  ;;  %v4187_v35 = vpop.permute.xlu1 %4186  ;;  %v7017_v55 = vpop.permute.xlu0 %4196  ;;  %v7023_v56 = vsel %vm2737_vm1, %v6718_v59, %v8454_v30  ;;  %v4184_v5 = vunpack.i.h.bf16 %v4182_v39  ;;  %v8456_v32 = vld [vmem:[#allocation50_spill] sm:$0xff]  ;;  %v8462_v53 = vld [vmem:[#allocation52_spill] sm:$0xff] }
 0x1c8   : > { %v2620_v13 = vsel %vm2608_vm14, %v2577_v3, %v4154_v15  ;;  %v7029_v6 = vsel %vm2737_vm1, %v6736_v21, %v8455_v16  ;;  %v4183_v48 = vunpack.i.l.bf16 %v4182_v39  ;;  %v2662_v37 = vsel %vm2651_vm15, %v2619_v7, %v4178_v2  ;;  %v8457_v3 = vld [vmem:[#allocation49_spill] sm:$0xff] }
 0x1c9   : > { %v2663_v15 = vsel %vm2651_vm15, %v2620_v13, %v4179_v17  ;;  %v8458_v59 = vpack.i.bf16 %v8456_v32, %v8457_v3  ;;  %v1047_v21 = vrot.slane %v8413_v54, 2  ;;  %v962_v17 = vrot.slane %v8413_v54, 1 }
 0x1ca   : > { %v2703_v2 = vsel %vm2694_vm0, %v2660_v14, %v4143_v11  ;;  %v2704_v30 = vsel %vm2694_vm0, %v2661_v51, %v4144_v47  ;;  %v4188_v13 = vunpack.i.l.bf16 %v4187_v35  ;;  %v8459_v32 = vrot.slane %v8407_v24, 2 }
 0x1cb   : > { %4486 = vrot.lane.b32.xlu1 %v8444_v46, %s4846_s28  ;;  %4471 = vrot.lane.b32.xlu0 %v8458_v59, %s4847_s29  ;;  %v4189_v46 = vunpack.i.h.bf16 %v4187_v35  ;;  %v4192_v7 = vpop.permute.xlu1 %4191  ;;  %v4212_v16 = vpop.permute.xlu0 %4211  ;;  %v8460_v59 = vrot.slane %v8423_v45, 2  ;;  %v964_v14 = vsel %vm963_vm6, %v961_v4, %v962_v17  ;;  %v8461_v51 = vrot.slane %v8423_v45, 1  ;;  %v8465_v4 = vld [vmem:[#allocation33_spill] sm:$0xff] }
 0x1cc   : > { %v7051_v3 = vsel %vm1048_vm7, %v8459_v32, %v1047_v21  ;;  %v4169_v11 = vunpack.i.h.bf16 %v6950_v43  ;;  %v4168_v35 = vunpack.i.l.bf16 %v6950_v43  ;;  %v2705_v32 = vsel %vm2694_vm0, %v2662_v37, %v4183_v48 }
 0x1cd   : > { %v7057_v39 = vsel %vm1048_vm7, %v1047_v21, %v8460_v59  ;;  %v1005_v47 = vsel %vm963_vm6, %v962_v17, %v8461_v51  ;;  %v2706_v58 = vsel %vm2694_vm0, %v2663_v15, %v4184_v5  ;;  %v8463_v21 = vld [vmem:[#allocation51_spill] sm:$0xff]  ;;  %v8467_v41 = vpack.i.bf16 %v8465_v4, %v8466_v8 }
 0x1ce   : > { %v8464_v59 = vpack.i.bf16 %v8462_v53, %v8463_v21  ;;  %v7079_v51 = vpack.i.bf16 %v1005_v47, %v964_v14  ;;  %v1132_v43 = vrot.slane %v8413_v54, 3  ;;  %v7083_v48 = vsel %vm2737_vm1, %v2705_v32, %v4188_v13 }
 0x1cf   : > { %4481 = vrot.lane.b32.xlu0 %v8467_v41, %s4842_s24  ;;  %8468 = vst [vmem:[#allocation27_spill] sm:$0xff] %v7083_v48  ;;  %v7086_v5 = vsel %vm2737_vm1, %v2706_v58, %v4189_v46  ;;  %v7089_v53 = vsel %vm2737_vm1, %v2703_v2, %v4148_v62  ;;  %v7092_v15 = vsel %vm2737_vm1, %v2704_v30, %v4149_v20  ;;  %v8470_v8 = vunpack.i.l.bf16 %v6772_v22  ;;  %v7102_v14 = vpop.permute.xlu1 %4201  ;;  %v4222_v58 = vpop.permute.xlu0 %4221  ;;  %v8485_v62 = vld [vmem:[#allocation60_spill] sm:$0xff] }
 0x1d0   : > { %4496 = vrot.lane.b32.xlu1 %v8464_v59, %s4847_s29  ;;  %8469 = vst [vmem:[#allocation26_spill] sm:$0xff] %v7086_v5  ;;  %v8471_v37 = vunpack.i.h.bf16 %v6772_v22  ;;  %v7108_v20 = vsel %vm1133_vm8, %v1131_v23, %v1132_v43  ;;  %v8474_v22 = vld [vmem:[#allocation37_spill] sm:$0xff]  ;;  %v8477_v47 = vrot.slane %v8423_v45, 3  ;;  %v8479_v23 = vld [vmem:[#allocation10_spill] sm:$0xff]  ;;  %v4214_v4 = vunpack.i.h.bf16 %v4212_v16 }
 0x1d1   : > { %v2492_v41 = vsel %vm2479_vm11, %v6917_v52, %v8470_v8  ;;  %8472 = vst [vmem:[#allocation24_spill] sm:$0xff] %v7108_v20  ;;  %v8473_v52 = vld [vmem:[#allocation39_spill] sm:$0xff]  ;;  %v8480_v21 = vrot.slane %v8479_v23, 2  ;;  %v8481_v59 = vld [vmem:[#allocation9_spill] sm:$0xff]  ;;  %v4194_v8 = vunpack.i.h.bf16 %v4192_v7 }
 0x1d2   : > { %v2493_v13 = vsel %vm2479_vm11, %v6921_v29, %v8471_v37  ;;  %v2535_v30 = vsel %vm2522_vm12, %v2492_v41, %v4168_v35  ;;  %v8475_v46 = vpack.i.bf16 %v8473_v52, %v8474_v22  ;;  %v8476_v29 = vld [vmem:[#allocation54_spill] sm:$0xff]  ;;  %v7122_v32 = vsel %vm1133_vm8, %v1132_v43, %v8477_v47  ;;  %v8486_v37 = vld [vmem:[#allocation55_spill] sm:$0xff]  ;;  %v8487_v43 = vld [vmem:[#allocation56_spill] sm:$0xff] }
 0x1d3   : > { %v2536_v2 = vsel %vm2522_vm12, %v2493_v13, %v4169_v11  ;;  %4491 = vrot.lane.b32.xlu0 %v8476_v29, %s4848_s30  ;;  %8478 = vst [vmem:[#allocation38_spill] sm:$0xff] %v7122_v32  ;;  %v8482_v11 = vrot.slane %v8481_v59, 2  ;;  %v4193_v41 = vunpack.i.l.bf16 %v4192_v7  ;;  %v4134_v52 = vunpack.i.h.bf16 %v6726_v9  ;;  %v7142_v47 = vpop.permute.xlu0 %4231  ;;  %v8489_v13 = vld [vmem:[#allocation58_spill] sm:$0xff]  ;;  %v8490_v20 = vld [vmem:[#allocation57_spill] sm:$0xff] }
 0x1d4   : > { %4506 = vrot.lane.b32.xlu1 %v8475_v46, %s4842_s24  ;;  %v4133_v22 = vunpack.i.l.bf16 %v6726_v9  ;;  %v7140_v46 = vpop.permute.xlu1 %4206  ;;  %v4213_v7 = vunpack.i.l.bf16 %v4212_v16  ;;  %v8488_v17 = vpack.i.bf16 %v8486_v37, %v8487_v43  ;;  %v8491_v37 = vpack.i.bf16 %v8489_v13, %v8490_v20  ;;  %v8494_v20 = vld [vmem:[#allocation65_spill] sm:$0xff] }
 0x1d5   : > { %v7130_v35 = vsel %vm1048_vm7, %v8482_v11, %v8480_v21  ;;  %v2579_v11 = vsel %vm2565_vm13, %v2536_v2, %v4134_v52  ;;  %v4224_v52 = vunpack.i.h.bf16 %v4222_v58 }
 0x1d6   : > { %8483 = vst [vmem:[#allocation45_spill] sm:$0xff] %v7130_v35  ;;  %v2578_v21 = vsel %vm2565_vm13, %v2535_v30, %v4133_v22  ;;  %v2622_v9 = vsel %vm2608_vm14, %v2579_v11, %v4194_v8  ;;  %v4223_v35 = vunpack.i.l.bf16 %v4222_v58  ;;  %v8499_v11 = vld [vmem:[#allocation68_spill] sm:$0xff] }
 0x1d7   : > { %4501 = vrot.lane.b32.xlu0 %v8488_v17, %s4849_s5  ;;  %v2621_v48 = vsel %vm2608_vm14, %v2578_v21, %v4193_v41  ;;  %v7154_v59 = vpop.permute.xlu0 %4236  ;;  %v2665_v2 = vsel %vm2651_vm15, %v2622_v9, %v4214_v4  ;;  %v8501_v9 = vld [vmem:[#allocation48_spill] sm:$0xff] }
 0x1d8   : > { %4516 = vrot.lane.b32.xlu1 %v8485_v62, %s4848_s30  ;;  %v4217_v5 = vpop.permute.xlu1 %4216  ;;  %v2664_v16 = vsel %vm2651_vm15, %v2621_v48, %v4213_v7 }
 0x1d9   : > { %v4219_v30 = vunpack.i.h.bf16 %v4217_v5  ;;  %v4218_v22 = vunpack.i.l.bf16 %v4217_v5 }
 0x1db   : > { %4511 = vrot.lane.b32.xlu0 %v8476_v29, %s4846_s28  ;;  %v2707_v17 = vsel %vm2694_vm0, %v2664_v16, %v4218_v22  ;;  %v2708_v8 = vsel %vm2694_vm0, %v2665_v2, %v4219_v30  ;;  %v7168_v5 = vpop.permute.xlu0 %4241  ;;  %v8495_v29 = vld [vmem:[#allocation66_spill] sm:$0xff]  ;;  %v8504_v16 = vld [vmem:[#allocation53_spill] sm:$0xff] }
 0x1dc   : > { %4526 = vrot.lane.b32.xlu1 %v8491_v37, %s4849_s5  ;;  %v7166_v41 = vpop.permute.xlu1 %4226  ;;  %v7171_v48 = vsel %vm2737_vm1, %v2707_v17, %v4223_v35  ;;  %v7174_v58 = vsel %vm2737_vm1, %v2708_v8, %v4224_v52  ;;  %v8496_v4 = vpack.i.bf16 %v8494_v20, %v8495_v29  ;;  %v8498_v35 = vld [vmem:[#allocation67_spill] sm:$0xff]  ;;  %v8505_v52 = vpack.i.bf16 %v5882_v27, %v8504_v16  ;;  %v8506_v37 = vld [vmem:[#allocation69_spill] sm:$0xff]  ;;  %v8508_v20 = vld [vmem:[#allocation76_spill] sm:$0xff] }
 0x1dd   : > { %8492 = vst [vmem:[#allocation40_spill] sm:$0xff] %v7171_v48  ;;  %8493 = vst [vmem:[#allocation41_spill] sm:$0xff] %v7174_v58  ;;  %v8500_v7 = vpack.i.bf16 %v8498_v35, %v8499_v11  ;;  %v8509_v29 = vld [vmem:[#allocation77_spill] sm:$0xff] }
 0x1de   : > { %v8513_v27 = vld [vmem:[#allocation81_spill] sm:$0xff] }
 0x1df   : > { %4521 = vrot.lane.b32.xlu0 %v8496_v4, %s4847_s29  ;;  %v7186_v21 = vpop.permute.xlu0 %4261  ;;  %v8510_v4 = vld [vmem:[#allocation78_spill] sm:$0xff]  ;;  %v8524_v58 = vld [vmem:[#allocation61_spill] sm:$0xff] }
 0x1e0   : > { %4536 = vrot.lane.b32.xlu1 %v8485_v62, %s4846_s28  ;;  %v7184_v43 = vpop.permute.xlu1 %4246  ;;  %8497 = vst [vmem:[#allocation43_spill] sm:$0xff] %v7186_v21  ;;  %v8502_v62 = vld [vmem:[#allocation46_spill] sm:$0xff]  ;;  %v8511_v35 = vpack.i.bf16 %v8509_v29, %v8510_v4 }
 0x1e1   : > { %v8503_v30 = vpack.i.bf16 %v8501_v9, %v8502_v62  ;;  %v8514_v9 = vld [vmem:[#allocation80_spill] sm:$0xff]  ;;  %v8519_v29 = vld [vmem:[#allocation82_spill] sm:$0xff] }
 0x1e2   : > { %v8515_v62 = vpack.i.bf16 %v8513_v27, %v8514_v9  ;;  %v8521_v9 = vld [vmem:[#allocation94_spill] sm:$0xff] }
 0x1e3   : > { %4531 = vrot.lane.b32.xlu0 %v8503_v30, %s4842_s24  ;;  %v7198_v2 = vpop.permute.xlu0 %4266 }
 0x1e4   : > { %4546 = vrot.lane.b32.xlu1 %v8500_v7, %s4847_s29  ;;  %v7196_v22 = vpop.permute.xlu1 %4251 }
 0x1e7   : > { %4541 = vrot.lane.b32.xlu0 %v8506_v37, %s4848_s30  ;;  %v7208_v8 = vpop.permute.xlu0 %4271 }
 0x1e8   : > { %4556 = vrot.lane.b32.xlu1 %v8505_v52, %s4842_s24  ;;  %v7206_v17 = vpop.permute.xlu1 %4256  ;;  %8507 = vst [vmem:[#allocation42_spill] sm:$0xff] %v7208_v8  ;;  %v8518_v52 = vld [vmem:[#allocation84_spill] sm:$0xff] }
 0x1e9   : > { %v8520_v4 = vpack.i.bf16 %v8518_v52, %v8519_v29 }
 0x1eb   : > { %4551 = vrot.lane.b32.xlu0 %v8511_v35, %s4849_s5  ;;  %v4292_v7 = vpop.permute.xlu0 %4291 }
 0x1ec   : > { %4566 = vrot.lane.b32.xlu1 %v8508_v20, %s4848_s30  ;;  %v7216_v11 = vpop.permute.xlu1 %4276 }
 0x1ed   : > { %8512 = vst [vmem:[#allocation50_spill] sm:$0xff] %v7216_v11 }
 0x1ef   : > { %4561 = vrot.lane.b32.xlu0 %v8506_v37, %s4846_s28  ;;  %v7226_v16 = vpop.permute.xlu0 %4296 }
 0x1f0   : > { %4576 = vrot.lane.b32.xlu1 %v8515_v62, %s4849_s5  ;;  %v7224_v30 = vpop.permute.xlu1 %4281  ;;  %8517 = vst [vmem:[#allocation52_spill] sm:$0xff] %v7226_v16  ;;  %v8522_v62 = vld [vmem:[#allocation95_spill] sm:$0xff]  ;;  %v8525_v16 = vpack.i.bf16 %v5964_v63, %v8524_v58  ;;  %v8529_v63 = vld [vmem:[#allocation102_spill] sm:$0xff]  ;;  %v8530_v58 = vld [vmem:[#allocation85_spill] sm:$0xff] }
 0x1f1   : > { %8516 = vst [vmem:[#allocation49_spill] sm:$0xff] %v7224_v30  ;;  %v8523_v37 = vpack.i.bf16 %v8521_v9, %v8522_v62  ;;  %v8528_v9 = vpack.i.bf16 %v6046_v42, %v6028_v19 }
 0x1f3   : > { %4571 = vrot.lane.b32.xlu0 %v8520_v4, %s4847_s29  ;;  %v4302_v13 = vpop.permute.xlu0 %4301  ;;  %v8526_v4 = vld [vmem:[#allocation90_spill] sm:$0xff] }
 0x1f4   : > { %4586 = vrot.lane.b32.xlu1 %v8508_v20, %s4846_s28  ;;  %v4287_v35 = vpop.permute.xlu1 %4286  ;;  %v4304_v48 = vunpack.i.h.bf16 %v4302_v13  ;;  %v4303_v27 = vunpack.i.l.bf16 %v4302_v13  ;;  %v8527_v13 = vld [vmem:[#allocation91_spill] sm:$0xff] }
 0x1f5   : > { %v4289_v20 = vunpack.i.h.bf16 %v4287_v35  ;;  %v4288_v11 = vunpack.i.l.bf16 %v4287_v35  ;;  %v8531_v35 = vld [vmem:[#allocation89_spill] sm:$0xff] }
 0x1f6   : > { %v2465_v32 = vsel %vm2436_vm10, %v8526_v4, %v4303_v27  ;;  %v2466_v21 = vsel %vm2436_vm10, %v8527_v13, %v4304_v48  ;;  %v4294_v48 = vunpack.i.h.bf16 %v4292_v7 }
 0x1f7   : > { %4581 = vrot.lane.b32.xlu0 %v8525_v16, %s4842_s24  ;;  %v4322_v30 = vpop.permute.xlu0 %4321  ;;  %v2463_v16 = vsel %vm2436_vm10, %v8530_v58, %v4288_v11  ;;  %v8533_v58 = vld [vmem:[#allocation104_spill] sm:$0xff] }
 0x1f8   : > { %4596 = vrot.lane.b32.xlu1 %v8523_v37, %s4847_s29  ;;  %v4307_v8 = vpop.permute.xlu1 %4306  ;;  %v4293_v37 = vunpack.i.l.bf16 %v4292_v7 }
 0x1f9   : > { %v4309_v52 = vunpack.i.h.bf16 %v4307_v8  ;;  %v4308_v29 = vunpack.i.l.bf16 %v4307_v8  ;;  %v2464_v8 = vsel %vm2436_vm10, %v8531_v35, %v4289_v20 }
 0x1fa   : > { %v2507_v11 = vsel %vm2479_vm11, %v2464_v8, %v4294_v48  ;;  %v8535_v48 = vpack.i.bf16 %v6570_v36, %v6576_v1 }
 0x1fb   : > { %4591 = vrot.lane.b32.xlu0 %v8529_v63, %s4848_s30  ;;  %v7257_v62 = vsel %vm2479_vm11, %v2465_v32, %v4308_v29  ;;  %v7260_v27 = vsel %vm2479_vm11, %v2466_v21, %v4309_v52  ;;  %v7262_v19 = vpop.permute.xlu0 %4326  ;;  %v8534_v32 = vpack.i.bf16 %v6446_v38, %v6503_v49 }
 0x1fc   : > { %4606 = vrot.lane.b32.xlu1 %v8528_v9, %s4842_s24  ;;  %8532 = vst [vmem:[#allocation51_spill] sm:$0xff] %v7257_v62  ;;  %v4312_v4 = vpop.permute.xlu1 %4311  ;;  %v2506_v9 = vsel %vm2479_vm11, %v2463_v16, %v4293_v37 }
 0x1fd   : > { %v4314_v42 = vunpack.i.h.bf16 %v4312_v4  ;;  %v4313_v13 = vunpack.i.l.bf16 %v4312_v4 }
 0x1ff   : > { %4601 = vrot.lane.b32.xlu0 %v8534_v32, %s4849_s5  ;;  %v7273_v21 = vsel %vm2522_vm12, %v2507_v11, %v4314_v42  ;;  %v7276_v7 = vsel %vm2522_vm12, %v2506_v9, %v4313_v13  ;;  %v4332_v52 = vpop.permute.xlu0 %4331 }
 0x200   : > { %4616 = vrot.lane.b32.xlu1 %v8533_v58, %s4848_s30  ;;  %v4317_v20 = vpop.permute.xlu1 %4316  ;;  %v4334_v35 = vunpack.i.h.bf16 %v4332_v52  ;;  %v4333_v8 = vunpack.i.l.bf16 %v4332_v52 }
 0x201   : > { %v4319_v29 = vunpack.i.h.bf16 %v4317_v20  ;;  %v4318_v16 = vunpack.i.l.bf16 %v4317_v20 }
 0x202   : > { %v2469_v37 = vsel %vm2436_vm10, %v6545_v12, %v4333_v8  ;;  %v2470_v4 = vsel %vm2436_vm10, %v6564_v34, %v4334_v35  ;;  %v4324_v12 = vunpack.i.h.bf16 %v4322_v30  ;;  %v8539_v35 = vld [vmem:[#allocation75_spill] sm:$0xff] }
 0x203   : > { %4611 = vrot.lane.b32.xlu0 %v8529_v63, %s4846_s28  ;;  %v2467_v38 = vsel %vm2436_vm10, %v6525_v33, %v4318_v16  ;;  %v2468_v49 = vsel %vm2436_vm10, %v6529_v50, %v4319_v29  ;;  %v4352_v13 = vpop.permute.xlu0 %4351  ;;  %v8536_v33 = vpack.i.bf16 %v6609_v61, %v6615_v31  ;;  %v4323_v63 = vunpack.i.l.bf16 %v4322_v30  ;;  %v8538_v31 = vld [vmem:[#allocation79_spill] sm:$0xff] }
 0x204   : > { %4626 = vrot.lane.b32.xlu1 %v8535_v48, %s4849_s5  ;;  %v4337_v42 = vpop.permute.xlu1 %4336  ;;  %v8537_v61 = vpack.i.bf16 %v6638_v60, %v6642_v40  ;;  %v8540_v8 = vpack.i.bf16 %v8538_v31, %v8539_v35 }
 0x205   : > { %v4339_v9 = vunpack.i.h.bf16 %v4337_v42  ;;  %v4338_v36 = vunpack.i.l.bf16 %v4337_v42  ;;  %v2510_v16 = vsel %vm2479_vm11, %v2467_v38, %v4323_v63  ;;  %v8546_v63 = vld [vmem:[#allocation20_spill] sm:$0xff] }
 0x207   : > { %4621 = vrot.lane.b32.xlu0 %v8536_v33, %s4847_s29  ;;  %v2512_v50 = vsel %vm2479_vm11, %v2469_v37, %v4338_v36  ;;  %v2513_v1 = vsel %vm2479_vm11, %v2470_v4, %v4339_v9  ;;  %v4357_v34 = vpop.permute.xlu0 %4356  ;;  %v4354_v36 = vunpack.i.h.bf16 %v4352_v13  ;;  %v4353_v33 = vunpack.i.l.bf16 %v4352_v13 }
 0x208   : > { %4636 = vrot.lane.b32.xlu1 %v8533_v58, %s4846_s28  ;;  %v4342_v11 = vpop.permute.xlu1 %4341  ;;  %v4359_v52 = vunpack.i.h.bf16 %v4357_v34  ;;  %v4358_v29 = vunpack.i.l.bf16 %v4357_v34  ;;  %v2511_v58 = vsel %vm2479_vm11, %v2468_v49, %v4324_v12  ;;  %v8545_v12 = vld [vmem:[#allocation93_spill] sm:$0xff]  ;;  %v8548_v34 = vld [vmem:[#allocation16_spill] sm:$0xff] }
 0x209   : > { %v4344_v32 = vunpack.i.h.bf16 %v4342_v11  ;;  %v4343_v20 = vunpack.i.l.bf16 %v4342_v11  ;;  %v8547_v11 = vld [vmem:[#allocation5_spill] sm:$0xff] }
 0x20a   : > { %v7317_v38 = vsel %vm2522_vm12, %v2513_v1, %v4359_v52  ;;  %v7320_v49 = vsel %vm2522_vm12, %v2512_v50, %v4358_v29  ;;  %v8550_v52 = vld [vmem:[#allocation18_spill] sm:$0xff] }
 0x20b   : > { %4631 = vrot.lane.b32.xlu0 %v8540_v8, %s4842_s24  ;;  %v7311_v30 = vsel %vm2522_vm12, %v2511_v58, %v4344_v32  ;;  %v7314_v48 = vsel %vm2522_vm12, %v2510_v16, %v4343_v20  ;;  %8543 = vst [vmem:[#allocation39_spill] sm:$0xff] %v7317_v38  ;;  %8544 = vst [vmem:[#allocation37_spill] sm:$0xff] %v7320_v49  ;;  %v4362_v60 = vpop.permute.xlu0 %4361  ;;  %v8549_v32 = vld [vmem:[#allocation17_spill] sm:$0xff] }
 0x20c   : > { %4646 = vrot.lane.b32.xlu1 %v8537_v61, %s4847_s29  ;;  %8541 = vst [vmem:[#allocation33_spill] sm:$0xff] %v7311_v30  ;;  %8542 = vst [vmem:[#allocation29_spill] sm:$0xff] %v7314_v48  ;;  %v4347_v37 = vpop.permute.xlu1 %4346  ;;  %v4364_v42 = vunpack.i.h.bf16 %v4362_v60  ;;  %v4363_v9 = vunpack.i.l.bf16 %v4362_v60  ;;  %v8553_v8 = vld [vmem:[#allocation109_spill] sm:$0xff] }
 0x20d   : > { %v4349_v40 = vunpack.i.h.bf16 %v4347_v37  ;;  %v4348_v4 = vunpack.i.l.bf16 %v4347_v37  ;;  %v8554_v37 = vld [vmem:[#allocation23_spill] sm:$0xff]  ;;  %v8586_v38 = vld [vmem:[#allocation101_spill] sm:$0xff] }
 0x20e   : > { %v2473_v20 = vsel %vm2436_vm10, %v8549_v32, %v4363_v9  ;;  %v2474_v29 = vsel %vm2436_vm10, %v8550_v52, %v4364_v42  ;;  %v8555_v60 = vpack.i.bf16 %v8553_v8, %v8554_v37  ;;  %v8558_v9 = vld [vmem:[#allocation74_spill] sm:$0xff] }
 0x20f   : > { %4641 = vrot.lane.b32.xlu0 %v8546_v63, %s4848_s30  ;;  %v2471_v1 = vsel %vm2436_vm10, %v8547_v11, %v4348_v4  ;;  %v2472_v50 = vsel %vm2436_vm10, %v8548_v34, %v4349_v40  ;;  %v4377_v13 = vpop.permute.xlu0 %4376  ;;  %v702_v40 = vrot.slane %v8403_v26, 5 }
 0x210   : > { %4656 = vrot.lane.b32.xlu1 %v8545_v12, %s4845_s27  ;;  %v4367_v16 = vpop.permute.xlu1 %4366  ;;  %v7335_v58 = vsel %vm2479_vm11, %v2471_v1, %v4353_v33  ;;  %v7338_v61 = vsel %vm2479_vm11, %v2472_v50, %v4354_v36  ;;  %v8559_v12 = vld [vmem:[#allocation87_spill] sm:$0xff]  ;;  %v4379_v8 = vunpack.i.h.bf16 %v4377_v13  ;;  %v8563_v36 = vld [vmem:[#allocation22_spill] sm:$0xff] }
 0x211   : > { %8551 = vst [vmem:[#allocation54_spill] sm:$0xff] %v7335_v58  ;;  %8552 = vst [vmem:[#allocation10_spill] sm:$0xff] %v7338_v61  ;;  %v4369_v31 = vunpack.i.h.bf16 %v4367_v16  ;;  %v4368_v35 = vunpack.i.l.bf16 %v4367_v16 }
 0x213   : > { %4651 = vrot.lane.b32.xlu0 %v8555_v60, %s4849_s5  ;;  %v7348_v4 = vsel %vm2479_vm11, %v2473_v20, %v4368_v35  ;;  %v7351_v42 = vsel %vm2479_vm11, %v2474_v29, %v4369_v31  ;;  %v4382_v34 = vpop.permute.xlu0 %4381  ;;  %v4378_v20 = vunpack.i.l.bf16 %v4377_v13  ;;  %v8560_v35 = vrot.slane %v6272_v57, 5  ;;  %v8562_v60 = vld [vmem:[#allocation28_spill] sm:$0xff]  ;;  %v8568_v13 = vld [vmem:[#allocation110_spill] sm:$0xff] }
 0x214   : > { %4666 = vrot.lane.b32.xlu1 %v8546_v63, %s4846_s28  ;;  %8556 = vst [vmem:[#allocation60_spill] sm:$0xff] %v7348_v4  ;;  %8557 = vst [vmem:[#allocation55_spill] sm:$0xff] %v7351_v42  ;;  %v4372_v1 = vpop.permute.xlu1 %4371  ;;  %v4384_v52 = vunpack.i.h.bf16 %v4382_v34  ;;  %v4383_v16 = vunpack.i.l.bf16 %v4382_v34  ;;  %v8561_v31 = vrot.slane %v8402_v10, 5  ;;  %v8564_v33 = vpack.i.bf16 %v8562_v60, %v8563_v36  ;;  %v8566_v34 = vld [vmem:[#allocation83_spill] sm:$0xff] }
 0x215   : > { %v4374_v50 = vunpack.i.h.bf16 %v4372_v1  ;;  %v4373_v32 = vunpack.i.l.bf16 %v4372_v1  ;;  %v712_v29 = vsel %vm708_vm9, %v8560_v35, %v702_v40  ;;  %v8565_v1 = vld [vmem:[#allocation86_spill] sm:$0xff]  ;;  %v8569_v4 = vld [vmem:[#allocation111_spill] sm:$0xff]  ;;  %v4158_v36 = vunpack.i.l.bf16 %v6906_v0 }
 0x216   : > { %v711_v37 = vsel %vm708_vm9, %v702_v40, %v8561_v31  ;;  %v8567_v11 = vpack.i.bf16 %v8565_v1, %v8566_v34  ;;  %v2477_v42 = vsel %vm2436_vm10, %v712_v29, %v4383_v16  ;;  %v4159_v31 = vunpack.i.h.bf16 %v6906_v0  ;;  %v8573_v29 = vld [vmem:[#allocation96_spill] sm:$0xff]  ;;  %v8580_v16 = vld [vmem:[#allocation35_spill] sm:$0xff] }
 0x217   : > { %v2475_v63 = vsel %vm2436_vm10, %v8568_v13, %v4373_v32  ;;  %v2476_v35 = vsel %vm2436_vm10, %v8569_v4, %v4374_v50  ;;  %v2478_v40 = vsel %vm2436_vm10, %v711_v37, %v4384_v52  ;;  %v4392_v60 = vpop.permute.xlu0 %4391  ;;  %v8572_v50 = vld [vmem:[#allocation88_spill] sm:$0xff]  ;;  %v8574_v13 = vld [vmem:[#allocation99_spill] sm:$0xff]  ;;  %v8579_v37 = vld [vmem:[#allocation97_spill] sm:$0xff] }
 0x218   : > { %4676 = vrot.lane.b32.xlu1 %v8564_v33, %s4847_s29  ;;  %4661 = vrot.lane.b32.xlu0 %v8567_v11, %s4842_s24  ;;  %v4387_v33 = vpop.permute.xlu1 %4386  ;;  %v7382_v58 = vsel %vm2479_vm11, %v2475_v63, %v4378_v20  ;;  %v7385_v11 = vsel %vm2479_vm11, %v2476_v35, %v4379_v8  ;;  %v4394_v34 = vunpack.i.h.bf16 %v4392_v60  ;;  %v4393_v4 = vunpack.i.l.bf16 %v4392_v60  ;;  %v8577_v20 = vld [vmem:[#allocation100_spill] sm:$0xff] }
 0x219   : > { %8570 = vst [vmem:[#allocation56_spill] sm:$0xff] %v7382_v58  ;;  %8571 = vst [vmem:[#allocation58_spill] sm:$0xff] %v7385_v11  ;;  %v4389_v32 = vunpack.i.h.bf16 %v4387_v33  ;;  %v4388_v1 = vunpack.i.l.bf16 %v4387_v33  ;;  %v3993_v52 = vunpack.i.l.bf16 %v8572_v50  ;;  %v8578_v33 = vld [vmem:[#allocation98_spill] sm:$0xff]  ;;  %v4019_v0 = vunpack.i.h.bf16 %v8579_v37 }
 0x21a   : > { %v2437_v35 = vsel %vm2436_vm10, %v8577_v20, %v4393_v4  ;;  %v2438_v60 = vsel %vm2436_vm10, %v8578_v33, %v4394_v34  ;;  %v4164_v11 = vunpack.i.h.bf16 %v8580_v16  ;;  %v8581_v58 = vld [vmem:[#allocation34_spill] sm:$0xff]  ;;  %v4018_v34 = vunpack.i.l.bf16 %v8579_v37 }
 0x21b   : > { %v7396_v63 = vsel %vm2479_vm11, %v2477_v42, %v4388_v1  ;;  %v7399_v8 = vsel %vm2479_vm11, %v2478_v40, %v4389_v32  ;;  %v2451_v61 = vsel %vm2436_vm10, %v8581_v58, %v4158_v36  ;;  %v4397_v1 = vpop.permute.xlu0 %4396  ;;  %v4208_v32 = vunpack.i.l.bf16 %v7140_v46  ;;  %v8583_v58 = vld [vmem:[#allocation32_spill] sm:$0xff]  ;;  %v8584_v36 = vld [vmem:[#allocation30_spill] sm:$0xff] }
 0x21c   : > { %4686 = vrot.lane.b32.xlu1 %v8574_v13, %s4845_s27  ;;  %4671 = vrot.lane.b32.xlu0 %v6908_v25, %s4848_s30  ;;  %8575 = vst [vmem:[#allocation57_spill] sm:$0xff] %v7396_v63  ;;  %8576 = vst [vmem:[#allocation65_spill] sm:$0xff] %v7399_v8  ;;  %v4163_v13 = vunpack.i.l.bf16 %v8580_v16  ;;  %v4402_v42 = vpop.permute.xlu1 %4401  ;;  %v8582_v63 = vld [vmem:[#allocation36_spill] sm:$0xff]  ;;  %v4209_v33 = vunpack.i.h.bf16 %v7140_v46  ;;  %v4399_v8 = vunpack.i.h.bf16 %v4397_v1  ;;  %v4398_v49 = vunpack.i.l.bf16 %v4397_v1  ;;  %v8588_v46 = vld [vmem:[#allocation19_spill] sm:$0xff] }
 0x21d   : > { %v2452_v40 = vsel %vm2436_vm10, %v8582_v63, %v4159_v31  ;;  %v4404_v4 = vunpack.i.h.bf16 %v4402_v42  ;;  %v4403_v20 = vunpack.i.l.bf16 %v4402_v42  ;;  %v8585_v16 = vpack.i.bf16 %v8583_v58, %v8584_v36 }
 0x21e   : > { %v4028_v63 = vunpack.i.l.bf16 %v8586_v38  ;;  %v4174_v1 = vunpack.i.h.bf16 %v8588_v46  ;;  %v4173_v48 = vunpack.i.l.bf16 %v8588_v46  ;;  %v2495_v30 = vsel %vm2479_vm11, %v2452_v40, %v4164_v11  ;;  %v8591_v11 = vld [vmem:[#allocation2_spill] sm:$0xff] }
 0x21f   : > { %v7424_v42 = vsel %vm2479_vm11, %v2437_v35, %v4403_v20  ;;  %v7427_v37 = vsel %vm2479_vm11, %v2438_v60, %v4404_v4  ;;  %v4407_v36 = vpop.permute.xlu0 %4406  ;;  %v4720_v35 = vpack.i.bf16 %v8402_v10, %v8403_v26  ;;  %v4199_v60 = vunpack.i.h.bf16 %v7017_v55  ;;  %v8589_v20 = vld [vmem:[#allocation6_spill] sm:$0xff]  ;;  %v8611_v10 = vld [vmem:[#allocation13_spill] sm:$0xff] }
 0x220   : > { %4696 = vrot.lane.b32.xlu1 %v6908_v25, %s4846_s28  ;;  %4681 = vrot.lane.b32.xlu0 %v8585_v16, %s4849_s5  ;;  %8587 = vst [vmem:[#allocation66_spill] sm:$0xff] %v7427_v37  ;;  %v2494_v25 = vsel %vm2479_vm11, %v2451_v61, %v4163_v13  ;;  %v4417_v58 = vpop.permute.xlu1 %4416  ;;  %v4409_v31 = vunpack.i.h.bf16 %v4407_v36  ;;  %v4408_v62 = vunpack.i.l.bf16 %v4407_v36  ;;  %v2538_v4 = vsel %vm2522_vm12, %v2495_v30, %v4209_v33  ;;  %v8590_v37 = vld [vmem:[#allocation103_spill] sm:$0xff]  ;;  %v8592_v13 = vld [vmem:[#allocation21_spill] sm:$0xff] }
 0x221   : > { %v2537_v16 = vsel %vm2522_vm12, %v2494_v25, %v4208_v32  ;;  %v2440_v46 = vsel %vm2436_vm10, %v8589_v20, %v4399_v8  ;;  %v2439_v61 = vsel %vm2436_vm10, %v8590_v37, %v4398_v49  ;;  %v8593_v40 = vpack.i.bf16 %v8591_v11, %v8592_v13  ;;  %v8594_v32 = vld [vmem:[#allocation92_spill] sm:$0xff] }
 0x222   : > { %v8595_v25 = vpack.i.bf16 %v6272_v57, %v8594_v32  ;;  %v4198_v36 = vunpack.i.l.bf16 %v7017_v55  ;;  %v4204_v30 = vunpack.i.h.bf16 %v7102_v14  ;;  %v2482_v33 = vsel %vm2479_vm11, %v2439_v61, %v4408_v62 }
 0x223   : > { %v2483_v8 = vsel %vm2479_vm11, %v2440_v46, %v4409_v31  ;;  %v4203_v49 = vunpack.i.l.bf16 %v7102_v14  ;;  %v8596_v37 = vunpack.i.l.bf16 %v8559_v12  ;;  %v8597_v11 = vunpack.i.h.bf16 %v8559_v12 }
 0x224   : > { %4706 = vrot.lane.b32.xlu1 %v8593_v40, %s4847_s29  ;;  %4691 = vrot.lane.b32.xlu0 %v8595_v25, %s4842_s24  ;;  %v4427_v13 = vpop.permute.xlu1 %4426  ;;  %v2580_v55 = vsel %vm2565_vm13, %v2537_v16, %v4173_v48  ;;  %v4412_v40 = vpop.permute.xlu0 %4411  ;;  %v4239_v32 = vunpack.i.h.bf16 %v7154_v59  ;;  %v8598_v62 = vunpack.i.l.bf16 %v8558_v9  ;;  %v8599_v14 = vunpack.i.h.bf16 %v8558_v9 }
 0x225   : > { %v2525_v20 = vsel %vm2522_vm12, %v2482_v33, %v8596_v37  ;;  %v2526_v57 = vsel %vm2522_vm12, %v2483_v8, %v8597_v11  ;;  %v2581_v61 = vsel %vm2565_vm13, %v2538_v4, %v4174_v1  ;;  %v8600_v25 = vunpack.i.h.bf16 %v8572_v50  ;;  %v8601_v8 = vld [vmem:[#allocation105_spill] sm:$0xff] }
 0x226   : > { %v2568_v31 = vsel %vm2565_vm13, %v2525_v20, %v8598_v62  ;;  %v2569_v46 = vsel %vm2565_vm13, %v2526_v57, %v8599_v14  ;;  %v4414_v48 = vunpack.i.h.bf16 %v4412_v40  ;;  %v4413_v16 = vunpack.i.l.bf16 %v4412_v40  ;;  %v8602_v37 = vld [vmem:[#allocation25_spill] sm:$0xff] }
 0x227   : > { %v2611_v12 = vsel %vm2608_vm14, %v2568_v31, %v3993_v52  ;;  %v2612_v33 = vsel %vm2608_vm14, %v2569_v46, %v8600_v25  ;;  %v4419_v20 = vunpack.i.h.bf16 %v4417_v58  ;;  %v4418_v9 = vunpack.i.l.bf16 %v4417_v58 }
 0x228   : > { %4716 = vrot.lane.b32.xlu1 %v8601_v8, %s4845_s27  ;;  %4701 = vrot.lane.b32.xlu0 %v8602_v37, %s4848_s30  ;;  %v2654_v11 = vsel %vm2651_vm15, %v2611_v12, %v4018_v34  ;;  %v2655_v1 = vsel %vm2651_vm15, %v2612_v33, %v4019_v0  ;;  %v2624_v52 = vsel %vm2608_vm14, %v2581_v61, %v4414_v48  ;;  %v4437_v4 = vpop.permute.xlu1 %4436  ;;  %v4422_v57 = vpop.permute.xlu0 %4421  ;;  %v8603_v40 = vunpack.i.l.bf16 %v8573_v29  ;;  %v8606_v33 = vld [vmem:[#allocation44_spill] sm:$0xff] }
 0x229   : > { %v2623_v50 = vsel %vm2608_vm14, %v2580_v55, %v4413_v16  ;;  %v8604_v31 = vunpack.i.h.bf16 %v8573_v29  ;;  %v4238_v58 = vunpack.i.l.bf16 %v7154_v59  ;;  %v4429_v46 = vunpack.i.h.bf16 %v4427_v13 }
 0x22a   : > { %v2697_v62 = vsel %vm2694_vm0, %v2654_v11, %v8603_v40  ;;  %v4424_v34 = vunpack.i.h.bf16 %v4422_v57  ;;  %v4423_v12 = vunpack.i.l.bf16 %v4422_v57  ;;  %v4428_v0 = vunpack.i.l.bf16 %v4427_v13 }
 0x22b   : > { %v2698_v14 = vsel %vm2694_vm0, %v2655_v1, %v8604_v31  ;;  %v2666_v61 = vsel %vm2651_vm15, %v2623_v50, %v4418_v9  ;;  %v2667_v55 = vsel %vm2651_vm15, %v2624_v52, %v4419_v20  ;;  %v8605_v25 = vpack.i.bf16 %v7000_v18, %v7004_v44  ;;  %v8608_v20 = vld [vmem:[#allocation47_spill] sm:$0xff] }
 0x22c   : > { %4726 = vrot.lane.b32.xlu1 %v8602_v37, %s4846_s28  ;;  %v2740_v29 = vsel %vm2737_vm1, %v2697_v62, %v4028_v63  ;;  %v2453_v59 = vsel %vm2436_vm10, %v8606_v33, %v4198_v36  ;;  %v2709_v48 = vsel %vm2694_vm0, %v2666_v61, %v4423_v12  ;;  %v2710_v13 = vsel %vm2694_vm0, %v2667_v55, %v4424_v34  ;;  %v4447_v9 = vpop.permute.xlu1 %4446  ;;  %v4432_v11 = vpop.permute.xlu0 %4431  ;;  %v8615_v33 = vld [vmem:[#allocation62_spill] sm:$0xff] }
 0x22d   : > { %4711 = vrot.lane.b32.xlu0 %v8605_v25, %s4849_s5  ;;  %v8607_v16 = vunpack.i.h.bf16 %v8586_v38  ;;  %v2454_v37 = vsel %vm2436_vm10, %v8608_v20, %v4199_v60  ;;  %v7508_v44 = vsel %vm2737_vm1, %v2709_v48, %v4428_v0  ;;  %v7511_v63 = vsel %vm2737_vm1, %v2710_v13, %v4429_v46  ;;  %v8614_v25 = vld [vmem:[#allocation59_spill] sm:$0xff] }
 0x22e   : > { %v2496_v36 = vsel %vm2479_vm11, %v2453_v59, %v4203_v49  ;;  %v2497_v1 = vsel %vm2479_vm11, %v2454_v37, %v4204_v30  ;;  %v4434_v52 = vunpack.i.h.bf16 %v4432_v11  ;;  %v4433_v38 = vunpack.i.l.bf16 %v4432_v11 }
 0x22f   : > { %v2741_v8 = vsel %vm2737_vm1, %v2698_v14, %v8607_v16  ;;  %v2540_v50 = vsel %vm2522_vm12, %v2497_v1, %v4239_v32  ;;  %v2539_v57 = vsel %vm2522_vm12, %v2496_v36, %v4238_v58  ;;  %v8609_v60 = vpack.i.bf16 %v8413_v54, %v8407_v24 }
 0x230   : > { %v2781_v18 = vpack.c.bf16 %v2741_v8, %v2740_v29  ;;  %v2787_v40 = vpack.c.bf16 %v7511_v63, %v7508_v44  ;;  %v2583_v49 = vsel %vm2565_vm13, %v2540_v50, %v4434_v52  ;;  %v2582_v30 = vsel %vm2565_vm13, %v2539_v57, %v4433_v38  ;;  %v4442_v58 = vpop.permute.xlu0 %4441 }
 0x231   : > { %4736 = vrot.lane.b32.xlu1 %v8609_v60, %s4842_s24  ;;  %4721 = vrot.lane.b32.xlu0 %v4720_v35, %s4842_s24  ;;  %v8610_v32 = vmov 0.0   ;;  %v4229_v62 = vunpack.i.h.bf16 %v7166_v41  ;;  %v4228_v24 = vunpack.i.l.bf16 %v7166_v41  ;;  %v4439_v54 = vunpack.i.h.bf16 %v4437_v4  ;;  %v4457_v14 = vpop.permute.xlu1 %4456 }
 0x232   : > { %3857 = vmatmul.mubr.msk.bf16.vlgmr.msra.gmra.mrb[0].mxu1 %vm2844_vm4, %v2781_v18  ;;  %v4438_v31 = vunpack.i.l.bf16 %v4437_v4  ;;  %v4444_v46 = vunpack.i.h.bf16 %v4442_v58  ;;  %v4443_v34 = vunpack.i.l.bf16 %v4442_v58  ;;  %v4234_v26 = vunpack.i.h.bf16 %v7142_v47  ;;  %v8612_v4 = vld [vmem:[#allocation3_spill] sm:$0xff] }
 0x233   : > { %3860 = vmatprep.mubr.msk.bf16.mxu1 %vm4841_vm2, %v8610_v32  ;;  %v2626_v0 = vsel %vm2608_vm14, %v2583_v49, %v4439_v54  ;;  %v4233_v35 = vunpack.i.l.bf16 %v7142_v47  ;;  %v8613_v55 = vpack.i.bf16 %v8612_v4, %v8423_v45  ;;  %v2455_v29 = vsel %vm2436_vm10, %v8614_v25, %v4228_v24  ;;  %v8618_v54 = vld [vmem:[#allocation11_spill] sm:$0xff] }
 0x234   : > { %v2625_v12 = vsel %vm2608_vm14, %v2582_v30, %v4438_v31  ;;  %v2669_v41 = vsel %vm2651_vm15, %v2626_v0, %v4444_v46  ;;  %v2456_v59 = vsel %vm2436_vm10, %v8615_v33, %v4229_v62  ;;  %v4449_v48 = vunpack.i.h.bf16 %v4447_v9  ;;  %v8619_v31 = vld [vmem:[#allocation7_spill] sm:$0xff] }
 0x235   : > { %4751 = vrot.lane.b32.xlu1 %v8611_v10, %s4848_s30  ;;  %v2668_v61 = vsel %vm2651_vm15, %v2625_v12, %v4443_v34  ;;  %4731 = vrot.lane.b32.xlu0 %v8613_v55, %s4842_s24  ;;  %v4448_v13 = vunpack.i.l.bf16 %v4447_v9  ;;  %v4467_v16 = vpop.permute.xlu1 %4466  ;;  %v4452_v8 = vpop.permute.xlu0 %4451  ;;  %v4254_v47 = vunpack.i.h.bf16 %v7196_v22  ;;  %v4253_v20 = vunpack.i.l.bf16 %v7196_v22  ;;  %v8621_v0 = vld [vmem:[#allocation15_spill] sm:$0xff] }
 0x236   : > { %v4454_v37 = vunpack.i.h.bf16 %v4452_v8  ;;  %v4453_v11 = vunpack.i.l.bf16 %v4452_v8  ;;  %v4459_v18 = vunpack.i.h.bf16 %v4457_v14  ;;  %v4458_v36 = vunpack.i.l.bf16 %v4457_v14  ;;  %v8622_v8 = vld [vmem:[#allocation106_spill] sm:$0xff] }
 0x237   : > { %v2711_v45 = vsel %vm2694_vm0, %v2668_v61, %v4448_v13  ;;  %v2712_v1 = vsel %vm2694_vm0, %v2669_v41, %v4449_v48  ;;  %v8616_v52 = vpack.c.bf16 %v7029_v6, %v7023_v56  ;;  %v8617_v9 = vpack.i.bf16 %v7057_v39, %v7051_v3 }
 0x238   : > { %v7563_v22 = vsel %vm2737_vm1, %v2711_v45, %v4453_v11  ;;  %v7566_v38 = vsel %vm2737_vm1, %v2712_v1, %v4454_v37  ;;  %v2498_v56 = vsel %vm2479_vm11, %v2455_v29, %v4233_v35  ;;  %v2499_v6 = vsel %vm2479_vm11, %v2456_v59, %v4234_v26  ;;  %v8626_v37 = vld [vmem:[#allocation4_spill] sm:$0xff]  ;;  %v8627_v11 = vld [vmem:[#allocation63_spill] sm:$0xff] }
 0x239   : > { %4766 = vrot.lane.b32.xlu1 %v8617_v9, %s4847_s29  ;;  %4741 = vrot.lane.b32.xlu0 %v8611_v10, %s4846_s28  ;;  %v2788_v39 = vpack.c.bf16 %v7566_v38, %v7563_v22  ;;  %v4477_v3 = vpop.permute.xlu1 %4476  ;;  %v4462_v50 = vpop.permute.xlu0 %4461  ;;  %v2542_v57 = vsel %vm2522_vm12, %v2499_v6, %v4254_v47  ;;  %v2541_v60 = vsel %vm2522_vm12, %v2498_v56, %v4253_v20  ;;  %v4244_v58 = vunpack.i.h.bf16 %v7168_v5  ;;  %v8623_v47 = vld [vmem:[#allocation31_spill] sm:$0xff] }
 0x23a   : > { %3861 = vmatmul.mubr.msk.bf16.gmra.mrb[4].mxu1 %vm2844_vm4, %v8616_v52  ;;  %v4464_v49 = vunpack.i.h.bf16 %v4462_v50  ;;  %v4463_v30 = vunpack.i.l.bf16 %v4462_v50  ;;  %v2585_v62 = vsel %vm2565_vm13, %v2542_v57, %v4459_v18  ;;  %v2584_v24 = vsel %vm2565_vm13, %v2541_v60, %v4458_v36  ;;  %v8628_v36 = vld [vmem:[#allocation64_spill] sm:$0xff]  ;;  %v8658_v38 = vld [vmem:[#allocation51_spill] sm:$0xff] }
 0x23b   : > { %3864 = vmatprep.mubr.msk.bf16.mxu1 %vm4841_vm2, %v8610_v32  ;;  %v8620_v14 = vpack.i.bf16 %v8618_v54, %v8619_v31  ;;  %v4243_v46 = vunpack.i.l.bf16 %v7168_v5  ;;  %v4249_v10 = vunpack.i.h.bf16 %v7184_v43  ;;  %v4248_v26 = vunpack.i.l.bf16 %v7184_v43  ;;  %v8625_v43 = vld [vmem:[#allocation108_spill] sm:$0xff] }
 0x23c   : > { %v2628_v34 = vsel %vm2608_vm14, %v2585_v62, %v4464_v49  ;;  %v2627_v12 = vsel %vm2608_vm14, %v2584_v24, %v4463_v30  ;;  %v4469_v35 = vunpack.i.h.bf16 %v4467_v16  ;;  %v4468_v61 = vunpack.i.l.bf16 %v4467_v16 }
 0x23d   : > { %4781 = vrot.lane.b32.xlu1 %v8620_v14, %s4847_s29  ;;  %4746 = vrot.lane.b32.xlu0 %v8621_v0, %s4848_s30  ;;  %v4487_v41 = vpop.permute.xlu1 %4486  ;;  %v4472_v4 = vpop.permute.xlu0 %4471  ;;  %v4269_v55 = vunpack.i.h.bf16 %v7198_v2  ;;  %v4268_v25 = vunpack.i.l.bf16 %v7198_v2  ;;  %v4479_v33 = vunpack.i.h.bf16 %v4477_v3  ;;  %v4478_v59 = vunpack.i.l.bf16 %v4477_v3 }
 0x23e   : > { %v4474_v5 = vunpack.i.h.bf16 %v4472_v4  ;;  %v4473_v29 = vunpack.i.l.bf16 %v4472_v4  ;;  %v2670_v48 = vsel %vm2651_vm15, %v2627_v12, %v4468_v61  ;;  %v2671_v13 = vsel %vm2651_vm15, %v2628_v34, %v4469_v35 }
 0x23f   : > { %v8624_v20 = vpack.c.bf16 %v8622_v8, %v8623_v47  ;;  %v2457_v18 = vsel %vm2436_vm10, %v8627_v11, %v4243_v46  ;;  %v2458_v45 = vsel %vm2436_vm10, %v8628_v36, %v4244_v58  ;;  %v1094_v54 = vrot.slane %v8479_v23, 3  ;;  %v8631_v23 = vld [vmem:[#allocation8_spill] sm:$0xff]  ;;  %v8640_v47 = vld [vmem:[#allocation71_spill] sm:$0xff]  ;;  %v8641_v11 = vld [vmem:[#allocation49_spill] sm:$0xff] }
 0x240   : > { %v2713_v16 = vsel %vm2694_vm0, %v2670_v48, %v4473_v29  ;;  %v2714_v2 = vsel %vm2694_vm0, %v2671_v13, %v4474_v5  ;;  %v2500_v6 = vsel %vm2479_vm11, %v2457_v18, %v4248_v26  ;;  %v2501_v3 = vsel %vm2479_vm11, %v2458_v45, %v4249_v10  ;;  %v8639_v13 = vld [vmem:[#allocation70_spill] sm:$0xff] }
 0x241   : > { %4786 = vrot.lane.b32.xlu1 %v8625_v43, %s4845_s27  ;;  %4756 = vrot.lane.b32.xlu0 %v8626_v37, %s4845_s27  ;;  %v4482_v52 = vpop.permute.xlu0 %4481  ;;  %v7613_v9 = vsel %vm2737_vm1, %v2713_v16, %v4478_v59  ;;  %v7616_v56 = vsel %vm2737_vm1, %v2714_v2, %v4479_v33  ;;  %v2544_v60 = vsel %vm2522_vm12, %v2501_v3, %v4269_v55  ;;  %v4259_v31 = vunpack.i.h.bf16 %v7206_v17  ;;  %v8637_v59 = vld [vmem:[#allocation24_spill] sm:$0xff] }
 0x242   : > { %3865 = vmatmul.mubr.msk.bf16.gmra.mrb[8].mxu1 %vm2844_vm4, %v8624_v20  ;;  %v4497_v1 = vpop.permute.xlu1 %4496  ;;  %v4484_v50 = vunpack.i.h.bf16 %v4482_v52  ;;  %v4483_v57 = vunpack.i.l.bf16 %v4482_v52  ;;  %v2543_v49 = vsel %vm2522_vm12, %v2500_v6, %v4268_v25  ;;  %v2789_v30 = vpack.c.bf16 %v7616_v56, %v7613_v9  ;;  %v8635_v25 = vld [vmem:[#allocation43_spill] sm:$0xff] }
 0x243   : > { %3868 = vmatprep.mubr.msk.bf16.mxu1 %vm4841_vm2, %v8610_v32  ;;  %v4258_v14 = vunpack.i.l.bf16 %v7206_v17  ;;  %v4489_v58 = vunpack.i.h.bf16 %v4487_v41  ;;  %v4488_v46 = vunpack.i.l.bf16 %v4487_v41  ;;  %v8629_v61 = vpack.c.bf16 %v7092_v15, %v7089_v53  ;;  %v8633_v17 = vld [vmem:[#allocation12_spill] sm:$0xff]  ;;  %v8636_v15 = vld [vmem:[#allocation38_spill] sm:$0xff] }
 0x244   : > { %v2587_v62 = vsel %vm2565_vm13, %v2544_v60, %v4484_v50  ;;  %v2586_v24 = vsel %vm2565_vm13, %v2543_v49, %v4483_v57  ;;  %v8634_v41 = vrot.slane %v8633_v17, 3  ;;  %v4264_v5 = vunpack.i.h.bf16 %v8635_v25  ;;  %v8642_v49 = vld [vmem:[#allocation107_spill] sm:$0xff] }
 0x245   : > { %4791 = vrot.lane.b32.xlu1 %v7079_v51, %s4846_s28  ;;  %4761 = vrot.lane.b32.xlu0 %v7079_v51, %s4848_s30  ;;  %v4492_v12 = vpop.permute.xlu0 %4491  ;;  %v2629_v26 = vsel %vm2608_vm14, %v2586_v24, %v4488_v46  ;;  %v2630_v35 = vsel %vm2608_vm14, %v2587_v62, %v4489_v58  ;;  %v8630_v51 = vld [vmem:[#allocation14_spill] sm:$0xff]  ;;  %v4263_v29 = vunpack.i.l.bf16 %v8635_v25  ;;  %v8638_v48 = vpack.i.bf16 %v8636_v15, %v8637_v59  ;;  %v8643_v62 = vld [vmem:[#allocation45_spill] sm:$0xff]  ;;  %v8648_v17 = vld [vmem:[#allocation27_spill] sm:$0xff] }
 0x246   : > { %v4507_v34 = vpop.permute.xlu1 %4506  ;;  %v4494_v0 = vunpack.i.h.bf16 %v4492_v12  ;;  %v4493_v10 = vunpack.i.l.bf16 %v4492_v12  ;;  %v8632_v4 = vpack.i.bf16 %v8630_v51, %v8631_v23  ;;  %v1171_v55 = vsel %vm1133_vm8, %v1094_v54, %v8634_v41  ;;  %v8650_v25 = vld [vmem:[#allocation42_spill] sm:$0xff] }
 0x247   : > { %v2459_v8 = vsel %vm2436_vm10, %v8639_v13, %v4258_v14  ;;  %v2460_v20 = vsel %vm2436_vm10, %v8640_v47, %v4259_v31  ;;  %v4499_v43 = vunpack.i.h.bf16 %v4497_v1  ;;  %v4498_v16 = vunpack.i.l.bf16 %v4497_v1  ;;  %v8645_v31 = vld [vmem:[#allocation9_spill] sm:$0xff] }
 0x248   : > { %v2672_v33 = vsel %vm2651_vm15, %v2629_v26, %v4493_v10  ;;  %v2673_v53 = vsel %vm2651_vm15, %v2630_v35, %v4494_v0  ;;  %v4284_v18 = vunpack.i.h.bf16 %v8641_v11  ;;  %v4283_v36 = vunpack.i.l.bf16 %v8641_v11 }
 0x249   : > { %4801 = vrot.lane.b32.xlu1 %v8632_v4, %s4849_s5  ;;  %4771 = vrot.lane.b32.xlu0 %v8638_v48, %s4849_s5  ;;  %v4502_v37 = vpop.permute.xlu0 %4501  ;;  %v4509_v6 = vunpack.i.h.bf16 %v4507_v34  ;;  %v4508_v3 = vunpack.i.l.bf16 %v4507_v34  ;;  %v2715_v50 = vsel %vm2694_vm0, %v2672_v33, %v4498_v16  ;;  %v2716_v57 = vsel %vm2694_vm0, %v2673_v53, %v4499_v43  ;;  %v8651_v53 = vld [vmem:[#allocation50_spill] sm:$0xff] }
 0x24a   : > { %3869 = vmatmul.mubr.msk.bf16.gmra.mrb[12].mxu1 %vm2844_vm4, %v8629_v61  ;;  %v4517_v2 = vpop.permute.xlu1 %4516  ;;  %v4504_v45 = vunpack.i.h.bf16 %v4502_v37  ;;  %v4503_v52 = vunpack.i.l.bf16 %v4502_v37  ;;  %v8644_v24 = vpack.i.bf16 %v8642_v49, %v8643_v62  ;;  %v8646_v14 = vrot.slane %v8645_v31, 3 }
 0x24b   : > { %3872 = vmatprep.mubr.msk.bf16.mxu1 %vm4841_vm2, %v8610_v32  ;;  %v2502_v46 = vsel %vm2479_vm11, %v2459_v8, %v4263_v29  ;;  %v2503_v34 = vsel %vm2479_vm11, %v2460_v20, %v4264_v5  ;;  %v4274_v5 = vunpack.i.h.bf16 %v8650_v25  ;;  %v4273_v29 = vunpack.i.l.bf16 %v8650_v25  ;;  %v8652_v20 = vld [vmem:[#allocation52_spill] sm:$0xff] }
 0x24c   : > { %v7666_v60 = vsel %vm2737_vm1, %v2715_v50, %v4503_v52  ;;  %v7669_v1 = vsel %vm2737_vm1, %v2716_v57, %v4504_v45  ;;  %v1172_v58 = vsel %vm1133_vm8, %v8646_v14, %v1094_v54  ;;  %v2546_v35 = vsel %vm2522_vm12, %v2503_v34, %v4284_v18  ;;  %v8647_v54 = vld [vmem:[#allocation26_spill] sm:$0xff]  ;;  %v8653_v50 = vld [vmem:[#allocation72_spill] sm:$0xff]  ;;  %v8654_v57 = vld [vmem:[#allocation73_spill] sm:$0xff] }
 0x24d   : > { %4776 = vrot.lane.b32.xlu0 %v8644_v24, %s4847_s29  ;;  %v2790_v12 = vpack.c.bf16 %v7669_v1, %v7666_v60  ;;  %v4512_v10 = vpop.permute.xlu0 %4511  ;;  %v4795_v26 = vpack.i.bf16 %v1171_v55, %v1172_v58  ;;  %v2545_v61 = vsel %vm2522_vm12, %v2502_v46, %v4283_v36  ;;  %v2589_v4 = vsel %vm2565_vm13, %v2546_v35, %v4509_v6  ;;  %v8655_v35 = vld [vmem:[#allocation41_spill] sm:$0xff] }
 0x24e   : > { %v4527_v0 = vpop.permute.xlu1 %4526  ;;  %v4514_v51 = vunpack.i.h.bf16 %v4512_v10  ;;  %v4513_v23 = vunpack.i.l.bf16 %v4512_v10  ;;  %v2588_v28 = vsel %vm2565_vm13, %v2545_v61, %v4508_v3  ;;  %v8649_v41 = vpack.c.bf16 %v8647_v54, %v8648_v17  ;;  %v8656_v61 = vld [vmem:[#allocation40_spill] sm:$0xff] }
 0x24f   : > { %v4279_v15 = vunpack.i.h.bf16 %v8651_v53  ;;  %v4278_v59 = vunpack.i.l.bf16 %v8651_v53  ;;  %v4519_v48 = vunpack.i.h.bf16 %v4517_v2  ;;  %v4518_v13 = vunpack.i.l.bf16 %v4517_v2 }
 0x250   : > { %v2632_v55 = vsel %vm2608_vm14, %v2589_v4, %v4514_v51  ;;  %v2631_v33 = vsel %vm2608_vm14, %v2588_v28, %v4513_v23  ;;  %v4299_v43 = vunpack.i.h.bf16 %v8652_v20  ;;  %v4298_v16 = vunpack.i.l.bf16 %v8652_v20 }
 0x251   : > { %4796 = vrot.lane.b32.xlu0 %v4795_v26, %s4849_s5  ;;  %v4522_v47 = vpop.permute.xlu0 %4521  ;;  %v4529_v18 = vunpack.i.h.bf16 %v4527_v0  ;;  %v4528_v36 = vunpack.i.l.bf16 %v4527_v0  ;;  %v2674_v45 = vsel %vm2651_vm15, %v2631_v33, %v4518_v13  ;;  %v2675_v52 = vsel %vm2651_vm15, %v2632_v55, %v4519_v48 }
 0x252   : > { %3873 = vmatmul.mubr.msk.bf16.gmra.mrb[16].mxu1 %vm2844_vm4, %v8649_v41  ;;  %v4537_v8 = vpop.permute.xlu1 %4536  ;;  %v4524_v37 = vunpack.i.h.bf16 %v4522_v47  ;;  %v4523_v11 = vunpack.i.l.bf16 %v4522_v47  ;;  %v2461_v2 = vsel %vm2436_vm10, %v8653_v50, %v4273_v29  ;;  %v2462_v49 = vsel %vm2436_vm10, %v8654_v57, %v4274_v5 }
 0x253   : > { %3876 = vmatprep.mubr.msk.bf16.mxu1 %vm4841_vm2, %v8610_v32  ;;  %v2504_v58 = vsel %vm2479_vm11, %v2461_v2, %v4278_v59  ;;  %v2505_v46 = vsel %vm2479_vm11, %v2462_v49, %v4279_v15  ;;  %v8657_v51 = vpack.c.bf16 %v8655_v35, %v8656_v61  ;;  %v4539_v54 = vunpack.i.h.bf16 %v4537_v8 }
 0x254   : > { %v2717_v6 = vsel %vm2694_vm0, %v2674_v45, %v4523_v11  ;;  %v2718_v3 = vsel %vm2694_vm0, %v2675_v52, %v4524_v37  ;;  %v2548_v10 = vsel %vm2522_vm12, %v2505_v46, %v4299_v43  ;;  %v2547_v26 = vsel %vm2522_vm12, %v2504_v58, %v4298_v16 }
 0x255   : > { %v4532_v24 = vpop.permute.xlu0 %4531  ;;  %v7711_v31 = vsel %vm2737_vm1, %v2717_v6, %v4528_v36  ;;  %v7714_v14 = vsel %vm2737_vm1, %v2718_v3, %v4529_v18  ;;  %v4538_v17 = vunpack.i.l.bf16 %v4537_v8  ;;  %v4329_v58 = vunpack.i.h.bf16 %v7262_v19 }
 0x256   : > { %v4547_v62 = vpop.permute.xlu1 %4546  ;;  %v4534_v34 = vunpack.i.h.bf16 %v4532_v24  ;;  %v4533_v0 = vunpack.i.l.bf16 %v4532_v24  ;;  %v2791_v23 = vpack.c.bf16 %v7714_v14, %v7711_v31  ;;  %v4328_v46 = vunpack.i.l.bf16 %v7262_v19 }
 0x257   : > { %v4549_v59 = vunpack.i.h.bf16 %v4547_v62  ;;  %v4548_v48 = vunpack.i.l.bf16 %v4547_v62  ;;  %v2552_v22 = vsel %vm2522_vm12, %v7260_v27, %v4329_v58 }
 0x258   : > { %v2591_v4 = vsel %vm2565_vm13, %v2548_v10, %v4534_v34  ;;  %v2590_v28 = vsel %vm2565_vm13, %v2547_v26, %v4533_v0 }
 0x259   : > { %v4542_v25 = vpop.permute.xlu0 %4541  ;;  %v2633_v55 = vsel %vm2608_vm14, %v2590_v28, %v4538_v17  ;;  %v2634_v33 = vsel %vm2608_vm14, %v2591_v4, %v4539_v54 }
 0x25a   : > { %3877 = vmatmul.mubr.msk.bf16.gmra.mrb[20].mxu1 %vm2844_vm4, %v8657_v51  ;;  %v4557_v41 = vpop.permute.xlu1 %4556  ;;  %v4544_v5 = vunpack.i.h.bf16 %v4542_v25  ;;  %v4543_v29 = vunpack.i.l.bf16 %v4542_v25 }
 0x25b   : > { %3880 = vmatprep.mubr.msk.bf16.mxu1 %vm4841_vm2, %v8610_v32  ;;  %v4559_v16 = vunpack.i.h.bf16 %v4557_v41  ;;  %v4558_v8 = vunpack.i.l.bf16 %v4557_v41 }
 0x25c   : > { %v2676_v53 = vsel %vm2651_vm15, %v2633_v55, %v4543_v29  ;;  %v2677_v15 = vsel %vm2651_vm15, %v2634_v33, %v4544_v5 }
 0x25d   : > { %v4552_v47 = vpop.permute.xlu0 %4551  ;;  %v2719_v37 = vsel %vm2694_vm0, %v2676_v53, %v4548_v48  ;;  %v2720_v11 = vsel %vm2694_vm0, %v2677_v15, %v4549_v59  ;;  %v2593_v44 = vsel %vm2565_vm13, %v7273_v21, %v4559_v16  ;;  %v2592_v63 = vsel %vm2565_vm13, %v7276_v7, %v4558_v8 }
 0x25e   : > { %v4567_v13 = vpop.permute.xlu1 %4566  ;;  %v4554_v20 = vunpack.i.h.bf16 %v4552_v47  ;;  %v4553_v43 = vunpack.i.l.bf16 %v4552_v47 }
 0x25f   : > { %v4569_v57 = vunpack.i.h.bf16 %v4567_v13  ;;  %v4568_v49 = vunpack.i.l.bf16 %v4567_v13 }
 0x260   : > { %v7741_v18 = vsel %vm2737_vm1, %v2719_v37, %v4553_v43  ;;  %v7744_v36 = vsel %vm2737_vm1, %v2720_v11, %v4554_v20 }
 0x261   : > { %v2792_v45 = vpack.c.bf16 %v7744_v36, %v7741_v18  ;;  %v4562_v6 = vpop.permute.xlu0 %4561  ;;  %v8664_v36 = vld [vmem:[#allocation54_spill] sm:$0xff] }
 0x262   : > { %3881 = vmatmul.mubr.msk.bf16.gmra.mrb[24].mxu1 %vm2844_vm4, %v2787_v40  ;;  %v4577_v52 = vpop.permute.xlu1 %4576  ;;  %v4564_v3 = vunpack.i.h.bf16 %v4562_v6  ;;  %v4563_v50 = vunpack.i.l.bf16 %v4562_v6 }
 0x263   : > { %3884 = vmatprep.mubr.msk.bf16.mxu1 %vm4841_vm2, %v8610_v32  ;;  %v4579_v10 = vunpack.i.h.bf16 %v4577_v52  ;;  %v4578_v26 = vunpack.i.l.bf16 %v4577_v52 }
 0x264   : > { %v2636_v40 = vsel %vm2608_vm14, %v2593_v44, %v4564_v3  ;;  %v2635_v2 = vsel %vm2608_vm14, %v2592_v63, %v4563_v50 }
 0x265   : > { %v4572_v24 = vpop.permute.xlu0 %4571  ;;  %v2678_v21 = vsel %vm2651_vm15, %v2635_v2, %v4568_v49  ;;  %v2679_v7 = vsel %vm2651_vm15, %v2636_v40, %v4569_v57  ;;  %v8659_v57 = vld [vmem:[#allocation33_spill] sm:$0xff] }
 0x266   : > { %v4587_v62 = vpop.permute.xlu1 %4586  ;;  %v4574_v34 = vunpack.i.h.bf16 %v4572_v24  ;;  %v4573_v0 = vunpack.i.l.bf16 %v4572_v24 }
 0x267   : > { %v4589_v29 = vunpack.i.h.bf16 %v4587_v62  ;;  %v4588_v55 = vunpack.i.l.bf16 %v4587_v62  ;;  %v8660_v62 = vld [vmem:[#allocation29_spill] sm:$0xff] }
 0x268   : > { %v2721_v35 = vsel %vm2694_vm0, %v2678_v21, %v4573_v0  ;;  %v2722_v61 = vsel %vm2694_vm0, %v2679_v7, %v4574_v34 }
 0x269   : > { %v4582_v51 = vpop.permute.xlu0 %4581  ;;  %v7769_v4 = vsel %vm2737_vm1, %v2721_v35, %v4578_v26  ;;  %v7772_v28 = vsel %vm2737_vm1, %v2722_v61, %v4579_v10 }
 0x26a   : > { %3885 = vmatmul.mubr.msk.bf16.gmra.mrb[28].mxu1 %vm2844_vm4, %v2788_v39  ;;  %v4597_v19 = vpop.permute.xlu1 %4596  ;;  %v4584_v54 = vunpack.i.h.bf16 %v4582_v51  ;;  %v4583_v17 = vunpack.i.l.bf16 %v4582_v51  ;;  %v2551_v39 = vsel %vm2522_vm12, %v8658_v38, %v4328_v46  ;;  %v2793_v41 = vpack.c.bf16 %v7772_v28, %v7769_v4 }
 0x26b   : > { %3888 = vmatprep.mubr.msk.bf16.mxu1 %vm4841_vm2, %v8610_v32  ;;  %v4599_v20 = vunpack.i.h.bf16 %v4597_v19  ;;  %v4598_v43 = vunpack.i.l.bf16 %v4597_v19 }
 0x26c   : > { %v2595_v25 = vsel %vm2565_vm13, %v2552_v22, %v4584_v54  ;;  %v2594_v5 = vsel %vm2565_vm13, %v2551_v39, %v4583_v17 }
 0x26d   : > { %v4592_v53 = vpop.permute.xlu0 %4591  ;;  %v2637_v48 = vsel %vm2608_vm14, %v2594_v5, %v4588_v55  ;;  %v2638_v27 = vsel %vm2608_vm14, %v2595_v25, %v4589_v29  ;;  %v8661_v5 = vld [vmem:[#allocation39_spill] sm:$0xff]  ;;  %v8662_v55 = vld [vmem:[#allocation37_spill] sm:$0xff] }
 0x26e   : > { %v4607_v33 = vpop.permute.xlu1 %4606  ;;  %v4594_v15 = vunpack.i.h.bf16 %v4592_v53  ;;  %v4593_v59 = vunpack.i.l.bf16 %v4592_v53 }
 0x26f   : > { %v4609_v52 = vunpack.i.h.bf16 %v4607_v33  ;;  %v4608_v6 = vunpack.i.l.bf16 %v4607_v33 }
 0x270   : > { %v2680_v13 = vsel %vm2651_vm15, %v2637_v48, %v4593_v59  ;;  %v2681_v47 = vsel %vm2651_vm15, %v2638_v27, %v4594_v15 }
 0x271   : > { %v4602_v8 = vpop.permute.xlu0 %4601  ;;  %v2723_v3 = vsel %vm2694_vm0, %v2680_v13, %v4598_v43  ;;  %v2724_v9 = vsel %vm2694_vm0, %v2681_v47, %v4599_v20  ;;  %v2597_v49 = vsel %vm2565_vm13, %v8659_v57, %v4609_v52  ;;  %v2596_v24 = vsel %vm2565_vm13, %v8660_v62, %v4608_v6 }
 0x272   : > { %3889 = vmatmul.mubr.msk.bf16.gmra.mrb[32].mxu1 %vm2844_vm4, %v2789_v30  ;;  %v4617_v16 = vpop.permute.xlu1 %4616  ;;  %v4604_v37 = vunpack.i.h.bf16 %v4602_v8  ;;  %v4603_v11 = vunpack.i.l.bf16 %v4602_v8 }
 0x273   : > { %3892 = vmatprep.mubr.msk.bf16.mxu1 %vm4841_vm2, %v8610_v32  ;;  %v4619_v34 = vunpack.i.h.bf16 %v4617_v16  ;;  %v4618_v0 = vunpack.i.l.bf16 %v4617_v16 }
 0x274   : > { %v7795_v56 = vsel %vm2737_vm1, %v2723_v3, %v4603_v11  ;;  %v7798_v30 = vsel %vm2737_vm1, %v2724_v9, %v4604_v37 }
 0x275   : > { %v2794_v50 = vpack.c.bf16 %v7798_v30, %v7795_v56  ;;  %v4612_v63 = vpop.permute.xlu0 %4611 }
 0x276   : > { %v4627_v44 = vpop.permute.xlu1 %4626  ;;  %v4614_v40 = vunpack.i.h.bf16 %v4612_v63  ;;  %v4613_v2 = vunpack.i.l.bf16 %v4612_v63 }
 0x277   : > { %v4629_v35 = vunpack.i.h.bf16 %v4627_v44  ;;  %v4628_v61 = vunpack.i.l.bf16 %v4627_v44 }
 0x278   : > { %v2640_v58 = vsel %vm2608_vm14, %v2597_v49, %v4614_v40  ;;  %v2639_v46 = vsel %vm2608_vm14, %v2596_v24, %v4613_v2  ;;  %v8663_v24 = vld [vmem:[#allocation10_spill] sm:$0xff] }
 0x279   : > { %v4622_v26 = vpop.permute.xlu0 %4621  ;;  %v2682_v19 = vsel %vm2651_vm15, %v2639_v46, %v4618_v0  ;;  %v2683_v60 = vsel %vm2651_vm15, %v2640_v58, %v4619_v34 }
 0x27a   : > { %3893 = vmatmul.mubr.msk.bf16.gmra.mrb[36].mxu1 %vm2844_vm4, %v2790_v12  ;;  %v4637_v10 = vpop.permute.xlu1 %4636  ;;  %v4624_v21 = vunpack.i.h.bf16 %v4622_v26  ;;  %v4623_v7 = vunpack.i.l.bf16 %v4622_v26 }
 0x27b   : > { %3896 = vmatprep.mubr.msk.bf16.mxu1 %vm4841_vm2, %v8610_v32  ;;  %v4639_v53 = vunpack.i.h.bf16 %v4637_v10  ;;  %v4638_v15 = vunpack.i.l.bf16 %v4637_v10 }
 0x27c   : > { %v2725_v1 = vsel %vm2694_vm0, %v2682_v19, %v4623_v7  ;;  %v2726_v12 = vsel %vm2694_vm0, %v2683_v60, %v4624_v21 }
 0x27d   : > { %v4632_v54 = vpop.permute.xlu0 %4631  ;;  %v7819_v17 = vsel %vm2737_vm1, %v2725_v1, %v4628_v61  ;;  %v7822_v22 = vsel %vm2737_vm1, %v2726_v12, %v4629_v35 }
 0x27e   : > { %v4647_v51 = vpop.permute.xlu1 %4646  ;;  %v4634_v38 = vunpack.i.h.bf16 %v4632_v54  ;;  %v4633_v39 = vunpack.i.l.bf16 %v4632_v54  ;;  %v2795_v25 = vpack.c.bf16 %v7822_v22, %v7819_v17 }
 0x27f   : > { %v4649_v20 = vunpack.i.h.bf16 %v4647_v51  ;;  %v4648_v43 = vunpack.i.l.bf16 %v4647_v51 }
 0x280   : > { %v2599_v29 = vsel %vm2565_vm13, %v8661_v5, %v4634_v38  ;;  %v2598_v33 = vsel %vm2565_vm13, %v8662_v55, %v4633_v39 }
 0x281   : > { %v4642_v48 = vpop.permute.xlu0 %4641  ;;  %v2641_v14 = vsel %vm2608_vm14, %v2598_v33, %v4638_v15 }
 0x282   : > { %3897 = vmatmul.mubr.msk.bf16.gmra.mrb[40].mxu1 %vm2844_vm4, %v2791_v23  ;;  %v4657_v59 = vpop.permute.xlu1 %4656  ;;  %v4644_v27 = vunpack.i.h.bf16 %v4642_v48  ;;  %v4643_v31 = vunpack.i.l.bf16 %v4642_v48  ;;  %v2642_v23 = vsel %vm2608_vm14, %v2599_v29, %v4639_v53 }
 0x283   : > { %3900 = vmatprep.mubr.msk.bf16.mxu1 %vm4841_vm2, %v8610_v32  ;;  %v4659_v52 = vunpack.i.h.bf16 %v4657_v59  ;;  %v4658_v6 = vunpack.i.l.bf16 %v4657_v59 }
 0x284   : > { %v2684_v13 = vsel %vm2651_vm15, %v2641_v14, %v4643_v31  ;;  %v2685_v47 = vsel %vm2651_vm15, %v2642_v23, %v4644_v27  ;;  %v8665_v27 = vld [vmem:[#allocation55_spill] sm:$0xff]  ;;  %v8666_v14 = vld [vmem:[#allocation60_spill] sm:$0xff] }
 0x285   : > { %v4652_v8 = vpop.permute.xlu0 %4651  ;;  %v2727_v3 = vsel %vm2694_vm0, %v2684_v13, %v4648_v43  ;;  %v2728_v9 = vsel %vm2694_vm0, %v2685_v47, %v4649_v20  ;;  %v2558_v18 = vsel %vm2522_vm12, %v8663_v24, %v4659_v52 }
 0x286   : > { %v4667_v16 = vpop.permute.xlu1 %4666  ;;  %v4654_v37 = vunpack.i.h.bf16 %v4652_v8  ;;  %v4653_v11 = vunpack.i.l.bf16 %v4652_v8 }
 0x287   : > { %v4669_v34 = vunpack.i.h.bf16 %v4667_v16  ;;  %v4668_v0 = vunpack.i.l.bf16 %v4667_v16 }
 0x288   : > { %v7847_v44 = vsel %vm2737_vm1, %v2727_v3, %v4653_v11  ;;  %v7850_v63 = vsel %vm2737_vm1, %v2728_v9, %v4654_v37 }
 0x289   : > { %v2796_v40 = vpack.c.bf16 %v7850_v63, %v7847_v44  ;;  %v8668_v63 = vld [vmem:[#allocation58_spill] sm:$0xff] }
 0x28a   : > { %3901 = vmatmul.mubr.msk.bf16.gmra.mrb[44].mxu1 %vm2844_vm4, %v2792_v45  ;;  %v4677_v2 = vpop.permute.xlu1 %4676  ;;  %v4662_v57 = vpop.permute.xlu0 %4661  ;;  %v2557_v45 = vsel %vm2522_vm12, %v8664_v36, %v4658_v6 }
 0x28b   : > { %3904 = vmatprep.mubr.msk.bf16.mxu1 %vm4841_vm2, %v8610_v32  ;;  %v4664_v49 = vunpack.i.h.bf16 %v4662_v57  ;;  %v4663_v62 = vunpack.i.l.bf16 %v4662_v57  ;;  %v4679_v1 = vunpack.i.h.bf16 %v4677_v2  ;;  %v4678_v12 = vunpack.i.l.bf16 %v4677_v2 }
 0x28d   : > { %v2601_v58 = vsel %vm2565_vm13, %v2558_v18, %v4664_v49  ;;  %v2600_v46 = vsel %vm2565_vm13, %v2557_v45, %v4663_v62 }
 0x28e   : > { %v4687_v10 = vpop.permute.xlu1 %4686  ;;  %v4672_v26 = vpop.permute.xlu0 %4671  ;;  %v2643_v35 = vsel %vm2608_vm14, %v2600_v46, %v4668_v0  ;;  %v2644_v61 = vsel %vm2608_vm14, %v2601_v58, %v4669_v34 }
 0x28f   : > { %v4674_v21 = vunpack.i.h.bf16 %v4672_v26  ;;  %v4673_v7 = vunpack.i.l.bf16 %v4672_v26  ;;  %v4689_v5 = vunpack.i.h.bf16 %v4687_v10  ;;  %v4688_v29 = vunpack.i.l.bf16 %v4687_v10 }
 0x291   : > { %v2686_v19 = vsel %vm2651_vm15, %v2643_v35, %v4673_v7  ;;  %v2687_v60 = vsel %vm2651_vm15, %v2644_v61, %v4674_v21  ;;  %v2560_v31 = vsel %vm2522_vm12, %v8665_v27, %v4689_v5  ;;  %v2559_v23 = vsel %vm2522_vm12, %v8666_v14, %v4688_v29  ;;  %v8667_v61 = vld [vmem:[#allocation56_spill] sm:$0xff] }
 0x292   : > { %3905 = vmatmul.mubr.msk.bf16.gmra.mrb[48].mxu1 %vm2844_vm4, %v2793_v41  ;;  %v4697_v51 = vpop.permute.xlu1 %4696  ;;  %v4682_v54 = vpop.permute.xlu0 %4681  ;;  %v2729_v55 = vsel %vm2694_vm0, %v2686_v19, %v4678_v12  ;;  %v2730_v4 = vsel %vm2694_vm0, %v2687_v60, %v4679_v1 }
 0x293   : > { %3908 = vmatprep.mubr.msk.bf16.mxu1 %vm4841_vm2, %v8610_v32  ;;  %v4684_v38 = vunpack.i.h.bf16 %v4682_v54  ;;  %v4683_v39 = vunpack.i.l.bf16 %v4682_v54  ;;  %v4699_v20 = vunpack.i.h.bf16 %v4697_v51  ;;  %v4698_v43 = vunpack.i.l.bf16 %v4697_v51 }
 0x295   : > { %v2772_v28 = vsel %vm2737_vm1, %v2729_v55, %v4683_v39  ;;  %v2773_v41 = vsel %vm2737_vm1, %v2730_v4, %v4684_v38 }
 0x296   : > { %v2797_v33 = vpack.c.bf16 %v2773_v41, %v2772_v28  ;;  %v4707_v53 = vpop.permute.xlu1 %4706  ;;  %v4692_v15 = vpop.permute.xlu0 %4691  ;;  %v8669_v41 = vld [vmem:[#allocation65_spill] sm:$0xff] }
 0x297   : > { %v4694_v59 = vunpack.i.h.bf16 %v4692_v15  ;;  %v4693_v48 = vunpack.i.l.bf16 %v4692_v15  ;;  %v4708_v3 = vunpack.i.l.bf16 %v4707_v53 }
 0x299   : > { %v2603_v13 = vsel %vm2565_vm13, %v2560_v31, %v4694_v59  ;;  %v2602_v47 = vsel %vm2565_vm13, %v2559_v23, %v4693_v48 }
 0x29a   : > { %3909 = vmatmul.mubr.msk.bf16.gmra.mrb[52].mxu1 %vm2844_vm4, %v2794_v50  ;;  %v4717_v16 = vpop.permute.xlu1 %4716  ;;  %v4702_v8 = vpop.permute.xlu0 %4701  ;;  %v2645_v52 = vsel %vm2608_vm14, %v2602_v47, %v4698_v43  ;;  %v2646_v6 = vsel %vm2608_vm14, %v2603_v13, %v4699_v20  ;;  %v4709_v50 = vunpack.i.h.bf16 %v4707_v53  ;;  %v8670_v53 = vld [vmem:[#allocation57_spill] sm:$0xff] }
 0x29b   : > { %3912 = vmatprep.mubr.msk.bf16.mxu1 %vm4841_vm2, %v8610_v32  ;;  %v4704_v37 = vunpack.i.h.bf16 %v4702_v8  ;;  %v4703_v11 = vunpack.i.l.bf16 %v4702_v8  ;;  %v4719_v26 = vunpack.i.h.bf16 %v4717_v16 }
 0x29d   : > { %v2688_v56 = vsel %vm2651_vm15, %v2645_v52, %v4703_v11  ;;  %v2689_v30 = vsel %vm2651_vm15, %v2646_v6, %v4704_v37 }
 0x29e   : > { %v4727_v9 = vpop.permute.xlu1 %4726  ;;  %v2731_v62 = vsel %vm2694_vm0, %v2688_v56, %v4708_v3  ;;  %v2732_v24 = vsel %vm2694_vm0, %v2689_v30, %v4709_v50  ;;  %v8671_v30 = vld [vmem:[#allocation66_spill] sm:$0xff] }
 0x29f   : > { %v4712_v2 = vpop.permute.xlu0 %4711  ;;  %v4729_v60 = vunpack.i.h.bf16 %v4727_v9  ;;  %v4728_v1 = vunpack.i.l.bf16 %v4727_v9 }
 0x2a0   : > { %v4714_v57 = vunpack.i.h.bf16 %v4712_v2  ;;  %v4713_v49 = vunpack.i.l.bf16 %v4712_v2 }
 0x2a2   : > { %3913 = vmatmul.mubr.msk.bf16.gmra.mrb[56].mxu1 %vm2844_vm4, %v2795_v25  ;;  %v2774_v18 = vsel %vm2737_vm1, %v2731_v62, %v4713_v49  ;;  %v2775_v36 = vsel %vm2737_vm1, %v2732_v24, %v4714_v57  ;;  %v4718_v25 = vunpack.i.l.bf16 %v4717_v16 }
 0x2a3   : > { %3916 = vmatprep.mubr.msk.bf16.mxu1 %vm4841_vm2, %v8610_v32  ;;  %v2798_v45 = vpack.c.bf16 %v2775_v36, %v2774_v18  ;;  %v4737_v58 = vpop.permute.xlu1 %4736  ;;  %v4722_v46 = vpop.permute.xlu0 %4721 }
 0x2a4   : > { %v4723_v10 = vunpack.i.l.bf16 %v4722_v46  ;;  %v4724_v7 = vunpack.i.h.bf16 %v4722_v46  ;;  %v2561_v19 = vsel %vm2522_vm12, %v8667_v61, %v4718_v25  ;;  %v4739_v51 = vunpack.i.h.bf16 %v4737_v58 }
 0x2a5   : > { %v4738_v29 = vunpack.i.l.bf16 %v4737_v58 }
 0x2a6   : > { %v2604_v44 = vsel %vm2565_vm13, %v2561_v19, %v4723_v10 }
 0x2a7   : > { %v4752_v34 = vpop.permute.xlu1 %4751  ;;  %v7902_v0 = vpop.permute.xlu0 %4731  ;;  %v2647_v28 = vsel %vm2608_vm14, %v2604_v44, %v4728_v1 }
 0x2a8   : > { %v4754_v55 = vunpack.i.h.bf16 %v4752_v34  ;;  %v4753_v4 = vunpack.i.l.bf16 %v4752_v34  ;;  %v4733_v27 = vunpack.i.l.bf16 %v7902_v0  ;;  %v4734_v46 = vunpack.i.h.bf16 %v7902_v0 }
 0x2aa   : > { %3917 = vmatmul.mubr.msk.bf16.gmra.mrb[60].mxu1 %vm2844_vm4, %v2796_v40  ;;  %v2562_v40 = vsel %vm2522_vm12, %v8668_v63, %v4719_v26 }
 0x2ab   : > { %3920 = vmatprep.mubr.msk.bf16.mxu1 %vm4841_vm2, %v8610_v32  ;;  %v7910_v17 = vpop.permute.xlu1 %4766  ;;  %v7912_v22 = vpop.permute.xlu0 %4741  ;;  %v2605_v54 = vsel %vm2565_vm13, %v2562_v40, %v4724_v7 }
 0x2ac   : > { %v4769_v31 = vunpack.i.h.bf16 %v7910_v17  ;;  %v4768_v14 = vunpack.i.l.bf16 %v7910_v17  ;;  %v2648_v13 = vsel %vm2608_vm14, %v2605_v54, %v4729_v60  ;;  %v4744_v0 = vunpack.i.h.bf16 %v7912_v22 }
 0x2ad   : > { %v4743_v40 = vunpack.i.l.bf16 %v7912_v22 }
 0x2af   : > { %v4782_v21 = vpop.permute.xlu1 %4781  ;;  %v7914_v35 = vpop.permute.xlu0 %4746 }
 0x2b0   : > { %v4784_v47 = vunpack.i.h.bf16 %v4782_v21  ;;  %v4783_v20 = vunpack.i.l.bf16 %v4782_v21 }
 0x2b2   : > { %3921 = vmatmul.mubr.msk.bf16.gmra.mrb[64].mxu1 %vm2844_vm4, %v2797_v33 }
 0x2b3   : > { %3924 = vmatprep.mubr.msk.bf16.mxu1 %vm4841_vm2, %v8610_v32  ;;  %v4787_v12 = vpop.permute.xlu1 %4786  ;;  %v4757_v5 = vpop.permute.xlu0 %4756 }
 0x2b4   : > { %v4789_v38 = vunpack.i.h.bf16 %v4787_v12  ;;  %v4788_v39 = vunpack.i.l.bf16 %v4787_v12  ;;  %v4759_v59 = vunpack.i.h.bf16 %v4757_v5  ;;  %v4758_v48 = vunpack.i.l.bf16 %v4757_v5 }
 0x2b5   : > { %v4748_v5 = vunpack.i.l.bf16 %v7914_v35 }
 0x2b6   : > { %v2564_v33 = vsel %vm2522_vm12, %v8669_v41, %v4789_v38  ;;  %v2563_v15 = vsel %vm2522_vm12, %v8670_v53, %v4788_v39  ;;  %v2523_v56 = vsel %vm2522_vm12, %v7424_v42, %v4758_v48  ;;  %v2524_v50 = vsel %vm2522_vm12, %v8671_v30, %v4759_v59 }
 0x2b7   : > { %v4792_v23 = vpop.permute.xlu1 %4791  ;;  %v4762_v8 = vpop.permute.xlu0 %4761  ;;  %v2606_v37 = vsel %vm2565_vm13, %v2563_v15, %v4738_v29  ;;  %v2607_v11 = vsel %vm2565_vm13, %v2564_v33, %v4739_v51  ;;  %v2566_v34 = vsel %vm2565_vm13, %v2523_v56, %v4733_v27  ;;  %v2567_v61 = vsel %vm2565_vm13, %v2524_v50, %v4734_v46 }
 0x2b8   : > { %v4794_v43 = vunpack.i.h.bf16 %v4792_v23  ;;  %v4793_v16 = vunpack.i.l.bf16 %v4792_v23  ;;  %v4764_v52 = vunpack.i.h.bf16 %v4762_v8  ;;  %v4763_v6 = vunpack.i.l.bf16 %v4762_v8 }
 0x2b9   : > { %v2609_v54 = vsel %vm2608_vm14, %v2566_v34, %v4743_v40  ;;  %v2610_v38 = vsel %vm2608_vm14, %v2567_v61, %v4744_v0  ;;  %v4749_v39 = vunpack.i.h.bf16 %v7914_v35 }
 0x2ba   : > { %3925 = vmatmul.mubr.msk.bf16.gmra.mrb[68].mxu1 %vm2844_vm4, %v2798_v45  ;;  %v2649_v3 = vsel %vm2608_vm14, %v2606_v37, %v4793_v16  ;;  %v2650_v9 = vsel %vm2608_vm14, %v2607_v11, %v4794_v43  ;;  %v2690_v49 = vsel %vm2651_vm15, %v2647_v28, %v4763_v6  ;;  %v2691_v62 = vsel %vm2651_vm15, %v2648_v13, %v4764_v52 }
 0x2bb   : > { %3928 = vmatprep.mubr.msk.bf16.mxu1 %vm4841_vm2, %v8610_v32  ;;  %v2692_v2 = vsel %vm2651_vm15, %v2649_v3, %v4753_v4  ;;  %v2693_v57 = vsel %vm2651_vm15, %v2650_v9, %v4754_v55  ;;  %v4802_v24 = vpop.permute.xlu1 %4801  ;;  %v4772_v58 = vpop.permute.xlu0 %4771  ;;  %v2733_v21 = vsel %vm2694_vm0, %v2690_v49, %v4768_v14  ;;  %v2734_v7 = vsel %vm2694_vm0, %v2691_v62, %v4769_v31 }
 0x2bc   : > { %v4804_v42 = vunpack.i.h.bf16 %v4802_v24  ;;  %v4803_v18 = vunpack.i.l.bf16 %v4802_v24  ;;  %v2735_v36 = vsel %vm2694_vm0, %v2692_v2, %v4783_v20  ;;  %v2736_v45 = vsel %vm2694_vm0, %v2693_v57, %v4784_v47 }
 0x2bd   : > { %v4774_v17 = vunpack.i.h.bf16 %v4772_v58  ;;  %v4773_v25 = vunpack.i.l.bf16 %v4772_v58  ;;  %v2652_v22 = vsel %vm2651_vm15, %v2609_v54, %v4748_v5  ;;  %v2653_v55 = vsel %vm2651_vm15, %v2610_v38, %v4749_v39 }
 0x2be   : > { %v2778_v10 = vsel %vm2737_vm1, %v2735_v36, %v4803_v18  ;;  %v2779_v26 = vsel %vm2737_vm1, %v2736_v45, %v4804_v42 }
 0x2bf   : > { %v2800_v19 = vpack.c.bf16 %v2779_v26, %v2778_v10  ;;  %v2776_v44 = vsel %vm2737_vm1, %v2733_v21, %v4773_v25  ;;  %v2777_v63 = vsel %vm2737_vm1, %v2734_v7, %v4774_v17  ;;  %v4777_v1 = vpop.permute.xlu0 %4776 }
 0x2c0   : > { %v2799_v60 = vpack.c.bf16 %v2777_v63, %v2776_v44  ;;  %v4779_v12 = vunpack.i.h.bf16 %v4777_v1  ;;  %v4778_v51 = vunpack.i.l.bf16 %v4777_v1 }
 0x2c2   : > { %3929 = vmatmul.mubr.msk.bf16.gmra.mrb[72].mxu1 %vm2844_vm4, %v2799_v60  ;;  %v2695_v41 = vsel %vm2694_vm0, %v2652_v22, %v4778_v51  ;;  %v2696_v33 = vsel %vm2694_vm0, %v2653_v55, %v4779_v12 }
 0x2c3   : > { %3932 = vmatprep.mubr.msk.bf16.mxu1 %vm4841_vm2, %v8610_v32  ;;  %v4797_v29 = vpop.permute.xlu0 %4796  ;;  %v7980_v32 = vld [vmem:[%s8058_s3] ss:$0 sm:$0xff] }
 0x2c4   : > { %v4799_v4 = vunpack.i.h.bf16 %v4797_v29  ;;  %v4798_v28 = vunpack.i.l.bf16 %v4797_v29 }
 0x2c6   : > { %v2738_v53 = vsel %vm2737_vm1, %v2695_v41, %v4798_v28  ;;  %v2739_v15 = vsel %vm2737_vm1, %v2696_v33, %v4799_v4 }
 0x2c7   : > { %v2780_v35 = vpack.c.bf16 %v2739_v15, %v2738_v53 }
 0x2c9   : > { %3853 = vmatmul.mubr.msk.bf16.vlgmr.msra.gmra.mrb[84].mxu0 %vm2844_vm4, %v2780_v35 }
 0x2ca   : > { %3933 = vmatmul.mubr.msk.bf16.gmra.mrb[76].mxu1 %vm2844_vm4, %v2800_v19 }
 0x305   : > { %v2954_v59 = vpop.f32.mrb[0].mxu1 }
 0x306   : > { %v2955_v48 = vadd.f32 %v7980_v32, %v2954_v59  ;;  %v3858_v27 = vpop.f32.mrb[1].mxu1 }
 0x307   : > { %v2957_v31 = vpop.f32.mrb[2].mxu1 }
 0x308   : > { %v2958_v14 = vadd.f32 %v7980_v32, %v2957_v31  ;;  %v3859_v23 = vpop.f32.mrb[3].mxu1  ;;  %v3115_v13 = vmax.f32 %v2955_v48, 0.0 }
 0x30a   : > { %v3116_v47 = vmax.f32 %v2958_v14, 0.0 }
 0x30c   : > { %v3591_v20 = vpack.c.bf16 %v3116_v47, %v3115_v13 }
 0x30d   : > { %v2962_v43 = vpop.f32.mrb[4].mxu1 }
 0x30e   : > { %3688 = vst [vmem:[%s7989_s23 + $0x8] sm:$0xff] %v3591_v20   ;;  %v2963_v16 = vadd.f32 %v7980_v32, %v2962_v43  ;;  %v3862_v8 = vpop.f32.mrb[5].mxu1 }
 0x30f   : > { %v2965_v37 = vpop.f32.mrb[6].mxu1 }
 0x310   : > { %v2966_v11 = vadd.f32 %v7980_v32, %v2965_v37  ;;  %v3863_v52 = vpop.f32.mrb[7].mxu1  ;;  %v3117_v6 = vmax.f32 %v2963_v16, 0.0 }
 0x312   : > { %v3118_v56 = vmax.f32 %v2966_v11, 0.0 }
 0x314   : > { %v3596_v30 = vpack.c.bf16 %v3118_v56, %v3117_v6 }
 0x315   : > { %v2970_v50 = vpop.f32.mrb[8].mxu1 }
 0x316   : > { %3689 = vst [vmem:[%s7989_s23 + $0x10] sm:$0xff] %v3596_v30   ;;  %v2971_v3 = vadd.f32 %v7980_v32, %v2970_v50  ;;  %v3866_v9 = vpop.f32.mrb[9].mxu1 }
 0x317   : > { %v2973_v2 = vpop.f32.mrb[10].mxu1 }
 0x318   : > { %v2974_v57 = vadd.f32 %v7980_v32, %v2973_v2  ;;  %v3867_v49 = vpop.f32.mrb[11].mxu1  ;;  %v3119_v62 = vmax.f32 %v2971_v3, 0.0 }
 0x31a   : > { %v3120_v24 = vmax.f32 %v2974_v57, 0.0 }
 0x31c   : > { %v3601_v42 = vpack.c.bf16 %v3120_v24, %v3119_v62 }
 0x31d   : > { %v2978_v18 = vpop.f32.mrb[12].mxu1 }
 0x31e   : > { %3690 = vst [vmem:[%s7989_s23 + $0x18] sm:$0xff] %v3601_v42   ;;  %v2979_v36 = vadd.f32 %v7980_v32, %v2978_v18  ;;  %v3870_v45 = vpop.f32.mrb[13].mxu1 }
 0x31f   : > { %v2981_v58 = vpop.f32.mrb[14].mxu1 }
 0x320   : > { %v2982_v46 = vadd.f32 %v7980_v32, %v2981_v58  ;;  %v3871_v34 = vpop.f32.mrb[15].mxu1  ;;  %v3121_v17 = vmax.f32 %v2979_v36, 0.0 }
 0x322   : > { %v3122_v25 = vmax.f32 %v2982_v46, 0.0 }
 0x324   : > { %v3606_v10 = vpack.c.bf16 %v3122_v25, %v3121_v17 }
 0x325   : > { %v2986_v26 = vpop.f32.mrb[16].mxu1 }
 0x326   : > { %3691 = vst [vmem:[%s7989_s23 + $0x20] sm:$0xff] %v3606_v10   ;;  %v2987_v21 = vadd.f32 %v7980_v32, %v2986_v26  ;;  %v3874_v7 = vpop.f32.mrb[17].mxu1 }
 0x327   : > { %v2989_v61 = vpop.f32.mrb[18].mxu1 }
 0x328   : > { %v2990_v19 = vadd.f32 %v7980_v32, %v2989_v61  ;;  %v3875_v44 = vpop.f32.mrb[19].mxu1  ;;  %v3123_v63 = vmax.f32 %v2987_v21, 0.0 }
 0x32a   : > { %v3124_v0 = vmax.f32 %v2990_v19, 0.0 }
 0x32c   : > { %v3611_v40 = vpack.c.bf16 %v3124_v0, %v3123_v63 }
 0x32d   : > { %v2994_v60 = vpop.f32.mrb[20].mxu1 }
 0x32e   : > { %3692 = vst [vmem:[%s7989_s23 + $0x28] sm:$0xff] %v3611_v40   ;;  %v2995_v1 = vadd.f32 %v7980_v32, %v2994_v60  ;;  %v3878_v12 = vpop.f32.mrb[21].mxu1 }
 0x32f   : > { %v2997_v51 = vpop.f32.mrb[22].mxu1 }
 0x330   : > { %v2998_v54 = vadd.f32 %v7980_v32, %v2997_v51  ;;  %v3879_v38 = vpop.f32.mrb[23].mxu1  ;;  %v3125_v39 = vmax.f32 %v2995_v1, 0.0 }
 0x332   : > { %v3126_v5 = vmax.f32 %v2998_v54, 0.0 }
 0x334   : > { %v3616_v29 = vpack.c.bf16 %v3126_v5, %v3125_v39 }
 0x335   : > { %v3002_v22 = vpop.f32.mrb[24].mxu1 }
 0x336   : > { %3693 = vst [vmem:[%s7989_s23 + $0x30] sm:$0xff] %v3616_v29   ;;  %v3003_v55 = vadd.f32 %v7980_v32, %v3002_v22  ;;  %v3882_v4 = vpop.f32.mrb[25].mxu1 }
 0x337   : > { %v3005_v28 = vpop.f32.mrb[26].mxu1 }
 0x338   : > { %v3006_v41 = vadd.f32 %v7980_v32, %v3005_v28  ;;  %v3883_v33 = vpop.f32.mrb[27].mxu1  ;;  %v3127_v53 = vmax.f32 %v3003_v55, 0.0 }
 0x33a   : > { %v3128_v15 = vmax.f32 %v3006_v41, 0.0 }
 0x33c   : > { %v3621_v35 = vpack.c.bf16 %v3128_v15, %v3127_v53 }
 0x33d   : > { %v3010_v59 = vpop.f32.mrb[28].mxu1 }
 0x33e   : > { %3694 = vst [vmem:[%s7989_s23 + $0x38] sm:$0xff] %v3621_v35   ;;  %v3011_v48 = vadd.f32 %v7980_v32, %v3010_v59  ;;  %v3886_v27 = vpop.f32.mrb[29].mxu1 }
 0x33f   : > { %v3013_v31 = vpop.f32.mrb[30].mxu1 }
 0x340   : > { %v3014_v14 = vadd.f32 %v7980_v32, %v3013_v31  ;;  %v3887_v23 = vpop.f32.mrb[31].mxu1  ;;  %v3129_v13 = vmax.f32 %v3011_v48, 0.0 }
 0x342   : > { %v3130_v47 = vmax.f32 %v3014_v14, 0.0 }
 0x344   : > { %v3626_v20 = vpack.c.bf16 %v3130_v47, %v3129_v13 }
 0x345   : > { %v3018_v43 = vpop.f32.mrb[32].mxu1 }
 0x346   : > { %3695 = vst [vmem:[%s7989_s23 + $0x40] sm:$0xff] %v3626_v20   ;;  %v3019_v16 = vadd.f32 %v7980_v32, %v3018_v43  ;;  %v3890_v8 = vpop.f32.mrb[33].mxu1 }
 0x347   : > { %v3021_v37 = vpop.f32.mrb[34].mxu1 }
 0x348   : > { %v3022_v11 = vadd.f32 %v7980_v32, %v3021_v37  ;;  %v3891_v52 = vpop.f32.mrb[35].mxu1  ;;  %v3131_v6 = vmax.f32 %v3019_v16, 0.0 }
 0x34a   : > { %v3132_v56 = vmax.f32 %v3022_v11, 0.0 }
 0x34c   : > { %v3631_v30 = vpack.c.bf16 %v3132_v56, %v3131_v6 }
 0x34d   : > { %v3026_v50 = vpop.f32.mrb[36].mxu1 }
 0x34e   : > { %3696 = vst [vmem:[%s7989_s23 + $0x48] sm:$0xff] %v3631_v30   ;;  %v3027_v3 = vadd.f32 %v7980_v32, %v3026_v50  ;;  %v3894_v9 = vpop.f32.mrb[37].mxu1 }
 0x34f   : > { %v3029_v2 = vpop.f32.mrb[38].mxu1 }
 0x350   : > { %v3030_v57 = vadd.f32 %v7980_v32, %v3029_v2  ;;  %v3895_v49 = vpop.f32.mrb[39].mxu1  ;;  %v3133_v62 = vmax.f32 %v3027_v3, 0.0 }
 0x352   : > { %v3134_v24 = vmax.f32 %v3030_v57, 0.0 }
 0x354   : > { %v3636_v42 = vpack.c.bf16 %v3134_v24, %v3133_v62 }
 0x355   : > { %v3034_v18 = vpop.f32.mrb[40].mxu1 }
 0x356   : > { %3697 = vst [vmem:[%s7989_s23 + $0x50] sm:$0xff] %v3636_v42   ;;  %v3035_v36 = vadd.f32 %v7980_v32, %v3034_v18  ;;  %v3898_v45 = vpop.f32.mrb[41].mxu1 }
 0x357   : > { %v3037_v58 = vpop.f32.mrb[42].mxu1 }
 0x358   : > { %v3038_v46 = vadd.f32 %v7980_v32, %v3037_v58  ;;  %v3899_v34 = vpop.f32.mrb[43].mxu1  ;;  %v3135_v17 = vmax.f32 %v3035_v36, 0.0 }
 0x35a   : > { %v3136_v25 = vmax.f32 %v3038_v46, 0.0 }
 0x35c   : > { %v3641_v10 = vpack.c.bf16 %v3136_v25, %v3135_v17 }
 0x35d   : > { %v3042_v26 = vpop.f32.mrb[44].mxu1 }
 0x35e   : > { %3698 = vst [vmem:[%s7989_s23 + $0x58] sm:$0xff] %v3641_v10   ;;  %v3043_v21 = vadd.f32 %v7980_v32, %v3042_v26  ;;  %v3902_v7 = vpop.f32.mrb[45].mxu1 }
 0x35f   : > { %v3045_v61 = vpop.f32.mrb[46].mxu1 }
 0x360   : > { %v3046_v19 = vadd.f32 %v7980_v32, %v3045_v61  ;;  %v3903_v44 = vpop.f32.mrb[47].mxu1  ;;  %v3137_v63 = vmax.f32 %v3043_v21, 0.0 }
 0x362   : > { %v3138_v0 = vmax.f32 %v3046_v19, 0.0 }
 0x364   : > { %v3646_v40 = vpack.c.bf16 %v3138_v0, %v3137_v63 }
 0x365   : > { %v3050_v60 = vpop.f32.mrb[48].mxu1 }
 0x366   : > { %3699 = vst [vmem:[%s7989_s23 + $0x60] sm:$0xff] %v3646_v40   ;;  %v3051_v1 = vadd.f32 %v7980_v32, %v3050_v60  ;;  %v3906_v12 = vpop.f32.mrb[49].mxu1 }
 0x367   : > { %v3053_v51 = vpop.f32.mrb[50].mxu1 }
 0x368   : > { %v3054_v54 = vadd.f32 %v7980_v32, %v3053_v51  ;;  %v3907_v38 = vpop.f32.mrb[51].mxu1  ;;  %v3139_v39 = vmax.f32 %v3051_v1, 0.0 }
 0x36a   : > { %v3140_v5 = vmax.f32 %v3054_v54, 0.0 }
 0x36c   : > { %v3651_v29 = vpack.c.bf16 %v3140_v5, %v3139_v39 }
 0x36d   : > { %v3058_v22 = vpop.f32.mrb[52].mxu1 }
 0x36e   : > { %3700 = vst [vmem:[%s7989_s23 + $0x68] sm:$0xff] %v3651_v29   ;;  %v3059_v55 = vadd.f32 %v7980_v32, %v3058_v22  ;;  %v3910_v4 = vpop.f32.mrb[53].mxu1 }
 0x36f   : > { %v3061_v28 = vpop.f32.mrb[54].mxu1 }
 0x370   : > { %v3062_v41 = vadd.f32 %v7980_v32, %v3061_v28  ;;  %v3911_v33 = vpop.f32.mrb[55].mxu1  ;;  %v3141_v53 = vmax.f32 %v3059_v55, 0.0 }
 0x372   : > { %v3142_v15 = vmax.f32 %v3062_v41, 0.0 }
 0x374   : > { %v3656_v35 = vpack.c.bf16 %v3142_v15, %v3141_v53 }
 0x375   : > { %v3066_v59 = vpop.f32.mrb[56].mxu1 }
 0x376   : > { %3701 = vst [vmem:[%s7989_s23 + $0x70] sm:$0xff] %v3656_v35   ;;  %v3067_v48 = vadd.f32 %v7980_v32, %v3066_v59  ;;  %v3914_v27 = vpop.f32.mrb[57].mxu1 }
 0x377   : > { %v3069_v31 = vpop.f32.mrb[58].mxu1 }
 0x378   : > { %v3070_v14 = vadd.f32 %v7980_v32, %v3069_v31  ;;  %v3915_v23 = vpop.f32.mrb[59].mxu1  ;;  %v3143_v13 = vmax.f32 %v3067_v48, 0.0 }
 0x37a   : > { %v3144_v47 = vmax.f32 %v3070_v14, 0.0 }
 0x37c   : > { %v3661_v20 = vpack.c.bf16 %v3144_v47, %v3143_v13 }
 0x37d   : > { %v3074_v43 = vpop.f32.mrb[60].mxu1 }
 0x37e   : > { %3702 = vst [vmem:[%s7989_s23 + $0x78] sm:$0xff] %v3661_v20   ;;  %v3075_v16 = vadd.f32 %v7980_v32, %v3074_v43  ;;  %v3918_v8 = vpop.f32.mrb[61].mxu1 }
 0x37f   : > { %v3077_v37 = vpop.f32.mrb[62].mxu1 }
 0x380   : > { %v3078_v11 = vadd.f32 %v7980_v32, %v3077_v37  ;;  %v3919_v52 = vpop.f32.mrb[63].mxu1  ;;  %v3145_v6 = vmax.f32 %v3075_v16, 0.0 }
 0x382   : > { %v3146_v56 = vmax.f32 %v3078_v11, 0.0 }
 0x384   : > { %v3666_v30 = vpack.c.bf16 %v3146_v56, %v3145_v6 }
 0x385   : > { %v3082_v50 = vpop.f32.mrb[64].mxu1 }
 0x386   : > { %3703 = vst [vmem:[%s7989_s23 + $0x80] sm:$0xff] %v3666_v30   ;;  %v3083_v3 = vadd.f32 %v7980_v32, %v3082_v50  ;;  %v3922_v9 = vpop.f32.mrb[65].mxu1 }
 0x387   : > { %v3085_v2 = vpop.f32.mrb[66].mxu1 }
 0x388   : > { %v3086_v57 = vadd.f32 %v7980_v32, %v3085_v2  ;;  %v3923_v49 = vpop.f32.mrb[67].mxu1  ;;  %v3147_v62 = vmax.f32 %v3083_v3, 0.0 }
 0x38a   : > { %v3148_v24 = vmax.f32 %v3086_v57, 0.0 }
 0x38c   : > { %v3671_v42 = vpack.c.bf16 %v3148_v24, %v3147_v62 }
 0x38d   : > { %v3090_v18 = vpop.f32.mrb[68].mxu1 }
 0x38e   : > { %3704 = vst [vmem:[%s7989_s23 + $0x88] sm:$0xff] %v3671_v42   ;;  %v3091_v36 = vadd.f32 %v7980_v32, %v3090_v18  ;;  %v3926_v45 = vpop.f32.mrb[69].mxu1 }
 0x38f   : > { %v3093_v58 = vpop.f32.mrb[70].mxu1 }
 0x390   : > { %v3094_v46 = vadd.f32 %v7980_v32, %v3093_v58  ;;  %v3927_v34 = vpop.f32.mrb[71].mxu1  ;;  %v3149_v17 = vmax.f32 %v3091_v36, 0.0 }
 0x392   : > { %v3150_v25 = vmax.f32 %v3094_v46, 0.0 }
 0x394   : > { %v3676_v10 = vpack.c.bf16 %v3150_v25, %v3149_v17 }
 0x395   : > { %v3098_v26 = vpop.f32.mrb[72].mxu1 }
 0x396   : > { %3705 = vst [vmem:[%s7989_s23 + $0x90] sm:$0xff] %v3676_v10   ;;  %v3099_v21 = vadd.f32 %v7980_v32, %v3098_v26  ;;  %v3930_v7 = vpop.f32.mrb[73].mxu1 }
 0x397   : > { %v3101_v61 = vpop.f32.mrb[74].mxu1 }
 0x398   : > { %v3102_v19 = vadd.f32 %v7980_v32, %v3101_v61  ;;  %v3931_v44 = vpop.f32.mrb[75].mxu1  ;;  %v3151_v63 = vmax.f32 %v3099_v21, 0.0 }
 0x39a   : > { %v3152_v0 = vmax.f32 %v3102_v19, 0.0 }
 0x39c   : > { %v3681_v40 = vpack.c.bf16 %v3152_v0, %v3151_v63  ;;  %v2946_v60 = vpop.f32.mrb[84].mxu0 }
 0x39d   : > { %v3106_v1 = vpop.f32.mrb[76].mxu1  ;;  %v2947_v12 = vadd.f32 %v7980_v32, %v2946_v60  ;;  %v3854_v54 = vpop.f32.mrb[85].mxu0 }
 0x39e   : > { %3706 = vst [vmem:[%s7989_s23 + $0x98] sm:$0xff] %v3681_v40   ;;  %v3107_v51 = vadd.f32 %v7980_v32, %v3106_v1  ;;  %v3934_v38 = vpop.f32.mrb[77].mxu1  ;;  %v2949_v39 = vpop.f32.mrb[86].mxu0 }
 0x39f   : > { %v3109_v5 = vpop.f32.mrb[78].mxu1  ;;  %v2950_v29 = vadd.f32 %v7980_v32, %v2949_v39  ;;  %v3855_v55 = vpop.f32.mrb[87].mxu0  ;;  %v3113_v28 = vmax.f32 %v2947_v12, 0.0 }
 0x3a0   : > { %v3110_v22 = vadd.f32 %v7980_v32, %v3109_v5  ;;  %v3935_v4 = vpop.f32.mrb[79].mxu1  ;;  %v3153_v41 = vmax.f32 %v3107_v51, 0.0 }
 0x3a1   : > { %v3114_v33 = vmax.f32 %v2950_v29, 0.0 }
 0x3a2   : > { %v3154_v53 = vmax.f32 %v3110_v22, 0.0 }
 0x3a3   : > { %v3586_v15 = vpack.c.bf16 %v3114_v33, %v3113_v28 }
 0x3a4   : > { %v3686_v35 = vpack.c.bf16 %v3154_v53, %v3153_v41 }
 0x3a5   : > { %3587 = vst [vmem:[%s7989_s23] sm:$0xff] %v3586_v15  }
 0x3a6   : > { %3707 = vst [vmem:[%s7989_s23 + $0xa0] sm:$0xff] %v3686_v35  }
 0x3a7 PF: > { %s14_s15 = sadd.s32 1, %s4837_s15  }
 0x3a8   : > { %p11_p4 = scmp.ge.s32.totalorder %s14_s15, 4  }
 0x3aa   :  { %13 = sbr.rel (!%p11_p4) target bundleno = 1 (0x1), region = 66 }

</bundles_post_ra>
